<compile_context>
chip_gen: v7x
topology: tpu7x:2x2x1
jax: 0.10.0
libtpu: 0.0.40
codegen_flags: <defaults>
</compile_context>

<pallas_src>
import jax
import jax.numpy as jnp
from jax.experimental import pallas as pl
from jax.experimental.pallas import tpu as pltpu

EPS = 1e-5
VMEM_LIMIT = 32 * 1024 * 1024  # safe scoped-VMEM budget on v5e/v6e/v7x


# ----------------------------------------------------------------- helpers ---

def _round_up(x, m):
    return ((x + m - 1) // m) * m


def _pad_last(a, target):
    if a.shape[-1] == target:
        return a
    pad = [(0, 0)] * a.ndim
    pad[-1] = (0, target - a.shape[-1])
    return jnp.pad(a, pad)


def _pack_conv_weight(w, cp):
    """PyTorch (Cout, Cin, 3, 3) -> (9*Cp, Cp) bf16, K rows ordered (kh, kw, cin)."""
    cout, cin, _, _ = w.shape
    w = jnp.transpose(w, (2, 3, 1, 0))                       # (3, 3, Cin, Cout)
    w = jnp.pad(w, ((0, 0), (0, 0), (0, cp - cin), (0, cp - cout)))
    return w.reshape(9 * cp, cp).astype(jnp.bfloat16)


def _fold_bn(stats, gamma, beta, count):
    """Fold batch stats into per-channel scale/shift: BN(x) = x*scale + shift."""
    s = jnp.sum(stats, axis=0)                               # (2, C)
    mean = s[0] / count
    var = jnp.maximum(s[1] / count - mean * mean, 0.0)
    # TODO(synk): switch to centered (two-pass) variance for very large N*H*W
    # to avoid E[x^2]-E[x]^2 cancellation.
    scale = gamma * jax.lax.rsqrt(var + EPS)
    shift = beta - mean * scale
    return scale.reshape(1, -1), shift.reshape(1, -1)


# ----------------------------------------------------------------- kernels ---

def _conv3x3_from_padded(xpad_sc, w_ref, H, W, C):
    """im2col over zero-padded (H+2, W+2, C) f32 scratch; one bf16 MXU matmul
    with K = 9*C.  Returns (H*W, C) f32."""
    taps = []
    for kh in range(3):
        for kw in range(3):
            taps.append(xpad_sc[kh:kh + H, kw:kw + W, :].reshape(H * W, C))
    patch = jnp.concatenate(taps, axis=-1).astype(jnp.bfloat16)   # (H*W, 9C)
    return jnp.dot(patch, w_ref[...], preferred_element_type=jnp.float32)


def _emit_stats(stats_ref, acc):
    s = jnp.sum(acc, axis=0, keepdims=True)                  # (1, C)
    sq = jnp.sum(acc * acc, axis=0, keepdims=True)           # (1, C)
    stats_ref[...] = jnp.concatenate([s, sq], axis=0).reshape(stats_ref.shape)


def conv_stats_kernel(x_ref, w_ref, raw_ref, stats_ref, xpad_sc):
    """conv1: raw f32 conv output + per-tile per-channel (sum, sumsq)."""
    _, H, W, C = x_ref.shape
    xpad_sc[...] = jnp.zeros_like(xpad_sc)       # zero halo; interior overwritten
    xpad_sc[1:H + 1, 1:W + 1, :] = x_ref[0]
    acc = _conv3x3_from_padded(xpad_sc, w_ref, H, W, C)
    raw_ref[...] = acc.reshape(raw_ref.shape)
    _emit_stats(stats_ref, acc)


def bn_relu_conv_stats_kernel(raw1_ref, scale_ref, shift_ref, w_ref,
                              raw2_ref, stats_ref, xpad_sc):
    """Apply folded BN1 + ReLU (f32), then conv2 + per-tile stats."""
    _, H, W, C = raw1_ref.shape
    y = jnp.maximum(raw1_ref[0] * scale_ref[...] + shift_ref[...], 0.0)
    xpad_sc[...] = jnp.zeros_like(xpad_sc)
    xpad_sc[1:H + 1, 1:W + 1, :] = y
    acc = _conv3x3_from_padded(xpad_sc, w_ref, H, W, C)
    raw2_ref[...] = acc.reshape(raw2_ref.shape)
    _emit_stats(stats_ref, acc)


def bn_add_relu_kernel(raw2_ref, scale_ref, shift_ref, id_ref, o_ref):
    """Apply folded BN2 + residual add + ReLU (all f32 VPU math)."""
    y = raw2_ref[...] * scale_ref[...] + shift_ref[...] + id_ref[...]
    o_ref[...] = jnp.maximum(y, 0.0)


# ----------------------------------------------------------- pallas_call wrap ---

def _act_spec(H, W, C):
    return pl.BlockSpec((1, H, W, C), lambda b: (b, 0, 0, 0))


def _stats_spec(C):
    return pl.BlockSpec((1, 2, C), lambda b: (b, 0, 0))


def _full_spec(shape):
    nd = len(shape)
    return pl.BlockSpec(shape, lambda b: (0,) * nd)   # same block every step


def _compiler_params():
    return pltpu.CompilerParams(dimension_semantics=("parallel",),
                                vmem_limit_bytes=VMEM_LIMIT)


def _conv1_call(x, w, B, H, W, C):
    cost = pl.CostEstimate(
        flops=2 * B * H * W * (9 * C) * C, transcendentals=0,
        bytes_accessed=2 * B * H * W * C * 4 + 9 * C * C * 2 + B * 2 * C * 4)
    return pl.pallas_call(
        conv_stats_kernel,
        out_shape=(jax.ShapeDtypeStruct((B, H, W, C), jnp.float32),
                   jax.ShapeDtypeStruct((B, 2, C), jnp.float32)),
        grid=(B,),
        in_specs=[_act_spec(H, W, C), _full_spec((9 * C, C))],
        out_specs=(_act_spec(H, W, C), _stats_spec(C)),
        scratch_shapes=[pltpu.VMEM((H + 2, W + 2, C), jnp.float32)],
        compiler_params=_compiler_params(),
        cost_estimate=cost,
    )(x, w)


def _conv2_call(raw1, scale1, shift1, w, B, H, W, C):
    cost = pl.CostEstimate(
        flops=2 * B * H * W * (9 * C) * C + 3 * B * H * W * C, transcendentals=0,
        bytes_accessed=2 * B * H * W * C * 4 + 9 * C * C * 2
                       + B * 2 * C * 4 + 2 * C * 4)
    return pl.pallas_call(
        bn_relu_conv_stats_kernel,
        out_shape=(jax.ShapeDtypeStruct((B, H, W, C), jnp.float32),
                   jax.ShapeDtypeStruct((B, 2, C), jnp.float32)),
        grid=(B,),
        in_specs=[_act_spec(H, W, C), _full_spec((1, C)), _full_spec((1, C)),
                  _full_spec((9 * C, C))],
        out_specs=(_act_spec(H, W, C), _stats_spec(C)),
        scratch_shapes=[pltpu.VMEM((H + 2, W + 2, C), jnp.float32)],
        compiler_params=_compiler_params(),
        cost_estimate=cost,
    )(raw1, scale1, shift1, w)


def _bn_add_relu_call(raw2, scale2, shift2, ident, B, H, W, C):
    cost = pl.CostEstimate(
        flops=4 * B * H * W * C, transcendentals=0,
        bytes_accessed=3 * B * H * W * C * 4 + 2 * C * 4)
    return pl.pallas_call(
        bn_add_relu_kernel,
        out_shape=jax.ShapeDtypeStruct((B, H, W, C), jnp.float32),
        grid=(B,),
        in_specs=[_act_spec(H, W, C), _full_spec((1, C)), _full_spec((1, C)),
                  _act_spec(H, W, C)],
        out_specs=_act_spec(H, W, C),
        compiler_params=_compiler_params(),
        cost_estimate=cost,
    )(raw2, scale2, shift2, ident)


# ------------------------------------------------------------------ forward ---

def basic_block_forward(x_nchw, params):
    """x_nchw: (B, C, H, W) float32.  Returns (B, C, H, W) float32."""
    w1, g1, b1 = params["w1"], params["gamma1"], params["beta1"]
    w2, g2, b2 = params["w2"], params["gamma2"], params["beta2"]
    B, C_in, H, W = x_nchw.shape
    planes = w1.shape[0]
    assert C_in == planes, "identity add requires inplanes == planes (stride=1, no downsample)"

    Cp = _round_up(max(C_in, planes, 128), 128)   # lane-dense channel width

    # NCHW -> NHWC + channel pad (glue; a caller that stays NHWC avoids the
    # transposes entirely).
    x = jnp.transpose(x_nchw, (0, 2, 3, 1)).astype(jnp.float32)
    x = _pad_last(x, Cp)                                      # (B, H, W, Cp)

    w1p = _pack_conv_weight(w1, Cp)                           # (9*Cp, Cp) bf16
    w2p = _pack_conv_weight(w2, Cp)
    g1p = _pad_last(g1.astype(jnp.float32), Cp)
    b1p = _pad_last(b1.astype(jnp.float32), Cp)
    g2p = _pad_last(g2.astype(jnp.float32), Cp)
    b2p = _pad_last(b2.astype(jnp.float32), Cp)

    n = B * H * W

    # Pass 1: conv1 + batch-stat accumulation.
    raw1, stats1 = _conv1_call(x, w1p, B, H, W, Cp)
    scale1, shift1 = _fold_bn(stats1, g1p, b1p, n)            # O(C) glue

    # Pass 2: BN1-apply + ReLU fused with conv2 + batch-stat accumulation.
    raw2, stats2 = _conv2_call(raw1, scale1, shift1, w2p, B, H, W, Cp)
    scale2, shift2 = _fold_bn(stats2, g2p, b2p, n)

    # Pass 3: BN2-apply + residual add + ReLU.
    out = _bn_add_relu_call(raw2, scale2, shift2, x, B, H, W, Cp)

    out = out[..., :planes]                                   # drop channel pad
    return jnp.transpose(out, (0, 3, 1, 2))                   # NHWC -> NCHW


# ---------------------------------------------------------------- reference ---

def _reference_forward(x, params):
    def conv(a, w):
        return jax.lax.conv_general_dilated(
            a, w, window_strides=(1, 1), padding=((1, 1), (1, 1)),
            dimension_numbers=("NCHW", "OIHW", "NCHW"),
            precision=jax.lax.Precision.HIGHEST)

    def bn(a, gamma, beta):
        mean = jnp.mean(a, axis=(0, 2, 3), keepdims=True)
        var = jnp.var(a, axis=(0, 2, 3), keepdims=True)
        g = gamma.reshape(1, -1, 1, 1)
        b = beta.reshape(1, -1, 1, 1)
        return (a - mean) * jax.lax.rsqrt(var + EPS) * g + b

    out = jax.nn.relu(bn(conv(x, params["w1"]), params["gamma1"], params["beta1"]))
    out = bn(conv(out, params["w2"]), params["gamma2"], params["beta2"])
    return jax.nn.relu(out + x)


def init_params(key, inplanes, planes):
    k1, k2, k3, k4, k5, k6 = jax.random.split(key, 6)
    # PyTorch conv3x3 weight layout: (Cout, Cin, 3, 3), bias=False.
    w1 = 0.1 * jax.random.normal(k1, (planes, inplanes, 3, 3), jnp.float32)
    w2 = 0.1 * jax.random.normal(k2, (planes, planes, 3, 3), jnp.float32)
    gamma1 = 1.0 + 0.1 * jax.random.normal(k3, (planes,), jnp.float32)
    beta1 = 0.1 * jax.random.normal(k4, (planes,), jnp.float32)
    gamma2 = 1.0 + 0.1 * jax.random.normal(k5, (planes,), jnp.float32)
    beta2 = 0.1 * jax.random.normal(k6, (planes,), jnp.float32)
    return dict(w1=w1, gamma1=gamma1, beta1=beta1,
                w2=w2, gamma2=gamma2, beta2=beta2)


if __name__ == "__main__":
    B, C, H, W = 2, 4, 16, 16       # inplanes = planes = 4, stride = 1
    key = jax.random.PRNGKey(0)
    kx, kp = jax.random.split(key)
    x = jax.random.normal(kx, (B, C, H, W), jnp.float32)
    params = init_params(kp, C, C)

    out = jax.jit(basic_block_forward)(x, params)
    jax.block_until_ready(out)
    assert out.shape == (B, C, H, W)

    ref = _reference_forward(x, params)
    err = float(jnp.max(jnp.abs(out - ref) / (1.0 + jnp.abs(ref))))
    assert err < 5e-2, f"mismatch vs reference: {err}"
    print("KERNEL_OK")
</pallas_src>

<mosaic_0001>
module attributes {stable_mosaic.version = 11 : i64} {
  func.func @conv_stats_kernel(%arg0: i32, %arg1: memref<1x16x16x128xf32, #tpu.memory_space<vmem>>, %arg2: memref<1152x128xbf16, #tpu.memory_space<vmem>>, %arg3: memref<1x16x16x128xf32, #tpu.memory_space<vmem>>, %arg4: memref<1x2x128xf32, #tpu.memory_space<vmem>>, %arg5: memref<18x18x128xf32, #tpu.memory_space<vmem>>) attributes {dimension_semantics = [#tpu.dimension_semantics<parallel>], iteration_bounds = array<i64: 2>, scalar_prefetch = 0 : i64, scratch_operands = 1 : i64, tpu.core_type = #tpu.core_type<tc>, window_params = [{transform_indices = @transform_0, window_bounds = array<i64: 1, 16, 16, 128>}, {pipeline_mode = #tpu.pipeline_mode<synchronous>, transform_indices = @transform_1, window_bounds = array<i64: 1152, 128>}, {transform_indices = @transform_2, window_bounds = array<i64: 1, 16, 16, 128>}, {transform_indices = @transform_3, window_bounds = array<i64: 1, 2, 128>}]} {
    %cst = arith.constant 0.000000e+00 : f32
    %0 = vector.broadcast %cst : f32 to vector<18x18x128xf32>
    %c0 = arith.constant 0 : index
    %c0_0 = arith.constant 0 : index
    %c0_1 = arith.constant 0 : index
    %1 = vector.load %arg5[%c0, %c0_0, %c0_1] : memref<18x18x128xf32, #tpu.memory_space<vmem>>, vector<18x18x128xf32>
    tpu.vector_store %arg5[%c0, %c0_0, %c0_1], %0 {strides = array<i32>} : memref<18x18x128xf32, #tpu.memory_space<vmem>>, vector<18x18x128xf32>,
    %c0_2 = arith.constant 0 : index
    %c0_3 = arith.constant 0 : index
    %c0_4 = arith.constant 0 : index
    %c0_5 = arith.constant 0 : index
    %2 = vector.load %arg1[%c0_2, %c0_3, %c0_4, %c0_5] : memref<1x16x16x128xf32, #tpu.memory_space<vmem>>, vector<1x16x16x128xf32>
    %3 = vector.shape_cast %2 : vector<1x16x16x128xf32> to vector<16x16x128xf32>
    %c1 = arith.constant 1 : index
    %c1_6 = arith.constant 1 : index
    %c0_7 = arith.constant 0 : index
    %4 = vector.load %arg5[%c1, %c1_6, %c0_7] : memref<18x18x128xf32, #tpu.memory_space<vmem>>, vector<16x16x128xf32>
    tpu.vector_store %arg5[%c1, %c1_6, %c0_7], %3 {strides = array<i32>} : memref<18x18x128xf32, #tpu.memory_space<vmem>>, vector<16x16x128xf32>,
    %c0_8 = arith.constant 0 : index
    %c0_9 = arith.constant 0 : index
    %c0_10 = arith.constant 0 : index
    %5 = vector.load %arg5[%c0_8, %c0_9, %c0_10] : memref<18x18x128xf32, #tpu.memory_space<vmem>>, vector<16x16x128xf32>
    %6 = vector.shape_cast %5 : vector<16x16x128xf32> to vector<256x128xf32>
    %c0_11 = arith.constant 0 : index
    %c1_12 = arith.constant 1 : index
    %c0_13 = arith.constant 0 : index
    %7 = vector.load %arg5[%c0_11, %c1_12, %c0_13] : memref<18x18x128xf32, #tpu.memory_space<vmem>>, vector<16x16x128xf32>
    %8 = vector.shape_cast %7 : vector<16x16x128xf32> to vector<256x128xf32>
    %c0_14 = arith.constant 0 : index
    %c2 = arith.constant 2 : index
    %c0_15 = arith.constant 0 : index
    %9 = vector.load %arg5[%c0_14, %c2, %c0_15] : memref<18x18x128xf32, #tpu.memory_space<vmem>>, vector<16x16x128xf32>
    %10 = vector.shape_cast %9 : vector<16x16x128xf32> to vector<256x128xf32>
    %c1_16 = arith.constant 1 : index
    %c0_17 = arith.constant 0 : index
    %c0_18 = arith.constant 0 : index
    %11 = vector.load %arg5[%c1_16, %c0_17, %c0_18] : memref<18x18x128xf32, #tpu.memory_space<vmem>>, vector<16x16x128xf32>
    %12 = vector.shape_cast %11 : vector<16x16x128xf32> to vector<256x128xf32>
    %c1_19 = arith.constant 1 : index
    %c1_20 = arith.constant 1 : index
    %c0_21 = arith.constant 0 : index
    %13 = vector.load %arg5[%c1_19, %c1_20, %c0_21] : memref<18x18x128xf32, #tpu.memory_space<vmem>>, vector<16x16x128xf32>
    %14 = vector.shape_cast %13 : vector<16x16x128xf32> to vector<256x128xf32>
    %c1_22 = arith.constant 1 : index
    %c2_23 = arith.constant 2 : index
    %c0_24 = arith.constant 0 : index
    %15 = vector.load %arg5[%c1_22, %c2_23, %c0_24] : memref<18x18x128xf32, #tpu.memory_space<vmem>>, vector<16x16x128xf32>
    %16 = vector.shape_cast %15 : vector<16x16x128xf32> to vector<256x128xf32>
    %c2_25 = arith.constant 2 : index
    %c0_26 = arith.constant 0 : index
    %c0_27 = arith.constant 0 : index
    %17 = vector.load %arg5[%c2_25, %c0_26, %c0_27] : memref<18x18x128xf32, #tpu.memory_space<vmem>>, vector<16x16x128xf32>
    %18 = vector.shape_cast %17 : vector<16x16x128xf32> to vector<256x128xf32>
    %c2_28 = arith.constant 2 : index
    %c1_29 = arith.constant 1 : index
    %c0_30 = arith.constant 0 : index
    %19 = vector.load %arg5[%c2_28, %c1_29, %c0_30] : memref<18x18x128xf32, #tpu.memory_space<vmem>>, vector<16x16x128xf32>
    %20 = vector.shape_cast %19 : vector<16x16x128xf32> to vector<256x128xf32>
    %c2_31 = arith.constant 2 : index
    %c2_32 = arith.constant 2 : index
    %c0_33 = arith.constant 0 : index
    %21 = vector.load %arg5[%c2_31, %c2_32, %c0_33] : memref<18x18x128xf32, #tpu.memory_space<vmem>>, vector<16x16x128xf32>
    %22 = vector.shape_cast %21 : vector<16x16x128xf32> to vector<256x128xf32>
    %23 = tpu.concatenate %6, %8, %10, %12, %14, %16, %18, %20, %22 in 1 : vector<256x128xf32>, vector<256x128xf32>, vector<256x128xf32>, vector<256x128xf32>, vector<256x128xf32>, vector<256x128xf32>, vector<256x128xf32>, vector<256x128xf32>, vector<256x128xf32> -> vector<256x1152xf32>
    %24 = arith.truncf %23 : vector<256x1152xf32> to vector<256x1152xbf16>
    %c0_34 = arith.constant 0 : index
    %c0_35 = arith.constant 0 : index
    %25 = vector.load %arg2[%c0_34, %c0_35] : memref<1152x128xbf16, #tpu.memory_space<vmem>>, vector<1152x128xbf16>
    %cst_36 = arith.constant dense<0.000000e+00> : vector<256x128xf32>
    %26 = tpu.matmul %24, %25, %cst_36 {dimension_numbers = #tpu.dot_dimension_numbers<[1], [0], [0], [1], [0, 0, 1, 1], [], []>} : vector<256x1152xbf16>, vector<1152x128xbf16>, vector<256x128xf32> -> vector<256x128xf32>
    %27 = vector.shape_cast %26 : vector<256x128xf32> to vector<1x16x16x128xf32>
    %c0_37 = arith.constant 0 : index
    %c0_38 = arith.constant 0 : index
    %c0_39 = arith.constant 0 : index
    %c0_40 = arith.constant 0 : index
    %28 = vector.load %arg3[%c0_37, %c0_38, %c0_39, %c0_40] : memref<1x16x16x128xf32, #tpu.memory_space<vmem>>, vector<1x16x16x128xf32>
    tpu.vector_store %arg3[%c0_37, %c0_38, %c0_39, %c0_40], %27 {strides = array<i32>} : memref<1x16x16x128xf32, #tpu.memory_space<vmem>>, vector<1x16x16x128xf32>,
    %cst_41 = arith.constant dense<0.000000e+00> : vector<128xf32>
    %29 = vector.multi_reduction <add>, %26, %cst_41 [0] : vector<256x128xf32> to vector<128xf32>
    %30 = vector.shape_cast %29 : vector<128xf32> to vector<1x128xf32>
    %31 = arith.mulf %26, %26 : vector<256x128xf32>
    %cst_42 = arith.constant dense<0.000000e+00> : vector<128xf32>
    %32 = vector.multi_reduction <add>, %31, %cst_42 [0] : vector<256x128xf32> to vector<128xf32>
    %33 = vector.shape_cast %32 : vector<128xf32> to vector<1x128xf32>
    %34 = tpu.concatenate %30, %33 in 0 : vector<1x128xf32>, vector<1x128xf32> -> vector<2x128xf32>
    %35 = vector.shape_cast %34 : vector<2x128xf32> to vector<1x2x128xf32>
    %c0_43 = arith.constant 0 : index
    %c0_44 = arith.constant 0 : index
    %c0_45 = arith.constant 0 : index
    %36 = vector.load %arg4[%c0_43, %c0_44, %c0_45] : memref<1x2x128xf32, #tpu.memory_space<vmem>>, vector<1x2x128xf32>
    tpu.vector_store %arg4[%c0_43, %c0_44, %c0_45], %35 {strides = array<i32>} : memref<1x2x128xf32, #tpu.memory_space<vmem>>, vector<1x2x128xf32>,
    return
  }
  func.func @transform_0(%arg0: i32) -> (i32, i32, i32, i32) {
    %c0_i32 = arith.constant 0 : i32
    %c0_i32_0 = arith.constant 0 : i32
    %c0_i32_1 = arith.constant 0 : i32
    %c0_i32_2 = arith.constant 0 : i32
    return %arg0, %c0_i32, %c0_i32_0, %c0_i32_1 : i32, i32, i32, i32
  }
  func.func @transform_1(%arg0: i32) -> (i32, i32) {
    %c0_i32 = arith.constant 0 : i32
    %c0_i32_0 = arith.constant 0 : i32
    %c0_i32_1 = arith.constant 0 : i32
    return %c0_i32, %c0_i32_0 : i32, i32
  }
  func.func @transform_2(%arg0: i32) -> (i32, i32, i32, i32) {
    %c0_i32 = arith.constant 0 : i32
    %c0_i32_0 = arith.constant 0 : i32
    %c0_i32_1 = arith.constant 0 : i32
    %c0_i32_2 = arith.constant 0 : i32
    return %arg0, %c0_i32, %c0_i32_0, %c0_i32_1 : i32, i32, i32, i32
  }
  func.func @transform_3(%arg0: i32) -> (i32, i32, i32) {
    %c0_i32 = arith.constant 0 : i32
    %c0_i32_0 = arith.constant 0 : i32
    %c0_i32_1 = arith.constant 0 : i32
    return %arg0, %c0_i32, %c0_i32_0 : i32, i32, i32
  }
}

module attributes {stable_mosaic.version = 11 : i64} {
  func.func @bn_relu_conv_stats_kernel(%arg0: i32, %arg1: memref<1x16x16x128xf32, #tpu.memory_space<vmem>>, %arg2: memref<1x128xf32, #tpu.memory_space<vmem>>, %arg3: memref<1x128xf32, #tpu.memory_space<vmem>>, %arg4: memref<1152x128xbf16, #tpu.memory_space<vmem>>, %arg5: memref<1x16x16x128xf32, #tpu.memory_space<vmem>>, %arg6: memref<1x2x128xf32, #tpu.memory_space<vmem>>, %arg7: memref<18x18x128xf32, #tpu.memory_space<vmem>>) attributes {dimension_semantics = [#tpu.dimension_semantics<parallel>], iteration_bounds = array<i64: 2>, scalar_prefetch = 0 : i64, scratch_operands = 1 : i64, tpu.core_type = #tpu.core_type<tc>, window_params = [{transform_indices = @transform_0, window_bounds = array<i64: 1, 16, 16, 128>}, {pipeline_mode = #tpu.pipeline_mode<synchronous>, transform_indices = @transform_1, window_bounds = array<i64: 1, 128>}, {pipeline_mode = #tpu.pipeline_mode<synchronous>, transform_indices = @transform_2, window_bounds = array<i64: 1, 128>}, {pipeline_mode = #tpu.pipeline_mode<synchronous>, transform_indices = @transform_3, window_bounds = array<i64: 1152, 128>}, {transform_indices = @transform_4, window_bounds = array<i64: 1, 16, 16, 128>}, {transform_indices = @transform_5, window_bounds = array<i64: 1, 2, 128>}]} {
    %c0 = arith.constant 0 : index
    %c0_0 = arith.constant 0 : index
    %c0_1 = arith.constant 0 : index
    %c0_2 = arith.constant 0 : index
    %0 = vector.load %arg1[%c0, %c0_0, %c0_1, %c0_2] : memref<1x16x16x128xf32, #tpu.memory_space<vmem>>, vector<1x16x16x128xf32>
    %1 = vector.shape_cast %0 : vector<1x16x16x128xf32> to vector<16x16x128xf32>
    %c0_3 = arith.constant 0 : index
    %c0_4 = arith.constant 0 : index
    %2 = vector.load %arg2[%c0_3, %c0_4] : memref<1x128xf32, #tpu.memory_space<vmem>>, vector<1x128xf32>
    %3 = vector.shape_cast %2 : vector<1x128xf32> to vector<1x1x128xf32>
    %4 = vector.broadcast %3 : vector<1x1x128xf32> to vector<16x16x128xf32>
    %5 = arith.mulf %1, %4 : vector<16x16x128xf32>
    %c0_5 = arith.constant 0 : index
    %c0_6 = arith.constant 0 : index
    %6 = vector.load %arg3[%c0_5, %c0_6] : memref<1x128xf32, #tpu.memory_space<vmem>>, vector<1x128xf32>
    %7 = vector.shape_cast %6 : vector<1x128xf32> to vector<1x1x128xf32>
    %8 = vector.broadcast %7 : vector<1x1x128xf32> to vector<16x16x128xf32>
    %9 = arith.addf %5, %8 : vector<16x16x128xf32>
    %cst = arith.constant 0.000000e+00 : f32
    %10 = vector.broadcast %cst : f32 to vector<16x16x128xf32>
    %11 = arith.maximumf %9, %10 : vector<16x16x128xf32>
    %cst_7 = arith.constant 0.000000e+00 : f32
    %12 = vector.broadcast %cst_7 : f32 to vector<18x18x128xf32>
    %c0_8 = arith.constant 0 : index
    %c0_9 = arith.constant 0 : index
    %c0_10 = arith.constant 0 : index
    %13 = vector.load %arg7[%c0_8, %c0_9, %c0_10] : memref<18x18x128xf32, #tpu.memory_space<vmem>>, vector<18x18x128xf32>
    tpu.vector_store %arg7[%c0_8, %c0_9, %c0_10], %12 {strides = array<i32>} : memref<18x18x128xf32, #tpu.memory_space<vmem>>, vector<18x18x128xf32>,
    %c1 = arith.constant 1 : index
    %c1_11 = arith.constant 1 : index
    %c0_12 = arith.constant 0 : index
    %14 = vector.load %arg7[%c1, %c1_11, %c0_12] : memref<18x18x128xf32, #tpu.memory_space<vmem>>, vector<16x16x128xf32>
    tpu.vector_store %arg7[%c1, %c1_11, %c0_12], %11 {strides = array<i32>} : memref<18x18x128xf32, #tpu.memory_space<vmem>>, vector<16x16x128xf32>,
    %c0_13 = arith.constant 0 : index
    %c0_14 = arith.constant 0 : index
    %c0_15 = arith.constant 0 : index
    %15 = vector.load %arg7[%c0_13, %c0_14, %c0_15] : memref<18x18x128xf32, #tpu.memory_space<vmem>>, vector<16x16x128xf32>
    %16 = vector.shape_cast %15 : vector<16x16x128xf32> to vector<256x128xf32>
    %c0_16 = arith.constant 0 : index
    %c1_17 = arith.constant 1 : index
    %c0_18 = arith.constant 0 : index
    %17 = vector.load %arg7[%c0_16, %c1_17, %c0_18] : memref<18x18x128xf32, #tpu.memory_space<vmem>>, vector<16x16x128xf32>
    %18 = vector.shape_cast %17 : vector<16x16x128xf32> to vector<256x128xf32>
    %c0_19 = arith.constant 0 : index
    %c2 = arith.constant 2 : index
    %c0_20 = arith.constant 0 : index
    %19 = vector.load %arg7[%c0_19, %c2, %c0_20] : memref<18x18x128xf32, #tpu.memory_space<vmem>>, vector<16x16x128xf32>
    %20 = vector.shape_cast %19 : vector<16x16x128xf32> to vector<256x128xf32>
    %c1_21 = arith.constant 1 : index
    %c0_22 = arith.constant 0 : index
    %c0_23 = arith.constant 0 : index
    %21 = vector.load %arg7[%c1_21, %c0_22, %c0_23] : memref<18x18x128xf32, #tpu.memory_space<vmem>>, vector<16x16x128xf32>
    %22 = vector.shape_cast %21 : vector<16x16x128xf32> to vector<256x128xf32>
    %c1_24 = arith.constant 1 : index
    %c1_25 = arith.constant 1 : index
    %c0_26 = arith.constant 0 : index
    %23 = vector.load %arg7[%c1_24, %c1_25, %c0_26] : memref<18x18x128xf32, #tpu.memory_space<vmem>>, vector<16x16x128xf32>
    %24 = vector.shape_cast %23 : vector<16x16x128xf32> to vector<256x128xf32>
    %c1_27 = arith.constant 1 : index
    %c2_28 = arith.constant 2 : index
    %c0_29 = arith.constant 0 : index
    %25 = vector.load %arg7[%c1_27, %c2_28, %c0_29] : memref<18x18x128xf32, #tpu.memory_space<vmem>>, vector<16x16x128xf32>
    %26 = vector.shape_cast %25 : vector<16x16x128xf32> to vector<256x128xf32>
    %c2_30 = arith.constant 2 : index
    %c0_31 = arith.constant 0 : index
    %c0_32 = arith.constant 0 : index
    %27 = vector.load %arg7[%c2_30, %c0_31, %c0_32] : memref<18x18x128xf32, #tpu.memory_space<vmem>>, vector<16x16x128xf32>
    %28 = vector.shape_cast %27 : vector<16x16x128xf32> to vector<256x128xf32>
    %c2_33 = arith.constant 2 : index
    %c1_34 = arith.constant 1 : index
    %c0_35 = arith.constant 0 : index
    %29 = vector.load %arg7[%c2_33, %c1_34, %c0_35] : memref<18x18x128xf32, #tpu.memory_space<vmem>>, vector<16x16x128xf32>
    %30 = vector.shape_cast %29 : vector<16x16x128xf32> to vector<256x128xf32>
    %c2_36 = arith.constant 2 : index
    %c2_37 = arith.constant 2 : index
    %c0_38 = arith.constant 0 : index
    %31 = vector.load %arg7[%c2_36, %c2_37, %c0_38] : memref<18x18x128xf32, #tpu.memory_space<vmem>>, vector<16x16x128xf32>
    %32 = vector.shape_cast %31 : vector<16x16x128xf32> to vector<256x128xf32>
    %33 = tpu.concatenate %16, %18, %20, %22, %24, %26, %28, %30, %32 in 1 : vector<256x128xf32>, vector<256x128xf32>, vector<256x128xf32>, vector<256x128xf32>, vector<256x128xf32>, vector<256x128xf32>, vector<256x128xf32>, vector<256x128xf32>, vector<256x128xf32> -> vector<256x1152xf32>
    %34 = arith.truncf %33 : vector<256x1152xf32> to vector<256x1152xbf16>
    %c0_39 = arith.constant 0 : index
    %c0_40 = arith.constant 0 : index
    %35 = vector.load %arg4[%c0_39, %c0_40] : memref<1152x128xbf16, #tpu.memory_space<vmem>>, vector<1152x128xbf16>
    %cst_41 = arith.constant dense<0.000000e+00> : vector<256x128xf32>
    %36 = tpu.matmul %34, %35, %cst_41 {dimension_numbers = #tpu.dot_dimension_numbers<[1], [0], [0], [1], [0, 0, 1, 1], [], []>} : vector<256x1152xbf16>, vector<1152x128xbf16>, vector<256x128xf32> -> vector<256x128xf32>
    %37 = vector.shape_cast %36 : vector<256x128xf32> to vector<1x16x16x128xf32>
    %c0_42 = arith.constant 0 : index
    %c0_43 = arith.constant 0 : index
    %c0_44 = arith.constant 0 : index
    %c0_45 = arith.constant 0 : index
    %38 = vector.load %arg5[%c0_42, %c0_43, %c0_44, %c0_45] : memref<1x16x16x128xf32, #tpu.memory_space<vmem>>, vector<1x16x16x128xf32>
    tpu.vector_store %arg5[%c0_42, %c0_43, %c0_44, %c0_45], %37 {strides = array<i32>} : memref<1x16x16x128xf32, #tpu.memory_space<vmem>>, vector<1x16x16x128xf32>,
    %cst_46 = arith.constant dense<0.000000e+00> : vector<128xf32>
    %39 = vector.multi_reduction <add>, %36, %cst_46 [0] : vector<256x128xf32> to vector<128xf32>
    %40 = vector.shape_cast %39 : vector<128xf32> to vector<1x128xf32>
    %41 = arith.mulf %36, %36 : vector<256x128xf32>
    %cst_47 = arith.constant dense<0.000000e+00> : vector<128xf32>
    %42 = vector.multi_reduction <add>, %41, %cst_47 [0] : vector<256x128xf32> to vector<128xf32>
    %43 = vector.shape_cast %42 : vector<128xf32> to vector<1x128xf32>
    %44 = tpu.concatenate %40, %43 in 0 : vector<1x128xf32>, vector<1x128xf32> -> vector<2x128xf32>
    %45 = vector.shape_cast %44 : vector<2x128xf32> to vector<1x2x128xf32>
    %c0_48 = arith.constant 0 : index
    %c0_49 = arith.constant 0 : index
    %c0_50 = arith.constant 0 : index
    %46 = vector.load %arg6[%c0_48, %c0_49, %c0_50] : memref<1x2x128xf32, #tpu.memory_space<vmem>>, vector<1x2x128xf32>
    tpu.vector_store %arg6[%c0_48, %c0_49, %c0_50], %45 {strides = array<i32>} : memref<1x2x128xf32, #tpu.memory_space<vmem>>, vector<1x2x128xf32>,
    return
  }
  func.func @transform_0(%arg0: i32) -> (i32, i32, i32, i32) {
    %c0_i32 = arith.constant 0 : i32
    %c0_i32_0 = arith.constant 0 : i32
    %c0_i32_1 = arith.constant 0 : i32
    %c0_i32_2 = arith.constant 0 : i32
    return %arg0, %c0_i32, %c0_i32_0, %c0_i32_1 : i32, i32, i32, i32
  }
  func.func @transform_1(%arg0: i32) -> (i32, i32) {
    %c0_i32 = arith.constant 0 : i32
    %c0_i32_0 = arith.constant 0 : i32
    %c0_i32_1 = arith.constant 0 : i32
    return %c0_i32, %c0_i32_0 : i32, i32
  }
  func.func @transform_2(%arg0: i32) -> (i32, i32) {
    %c0_i32 = arith.constant 0 : i32
    %c0_i32_0 = arith.constant 0 : i32
    %c0_i32_1 = arith.constant 0 : i32
    return %c0_i32, %c0_i32_0 : i32, i32
  }
  func.func @transform_3(%arg0: i32) -> (i32, i32) {
    %c0_i32 = arith.constant 0 : i32
    %c0_i32_0 = arith.constant 0 : i32
    %c0_i32_1 = arith.constant 0 : i32
    return %c0_i32, %c0_i32_0 : i32, i32
  }
  func.func @transform_4(%arg0: i32) -> (i32, i32, i32, i32) {
    %c0_i32 = arith.constant 0 : i32
    %c0_i32_0 = arith.constant 0 : i32
    %c0_i32_1 = arith.constant 0 : i32
    %c0_i32_2 = arith.constant 0 : i32
    return %arg0, %c0_i32, %c0_i32_0, %c0_i32_1 : i32, i32, i32, i32
  }
  func.func @transform_5(%arg0: i32) -> (i32, i32, i32) {
    %c0_i32 = arith.constant 0 : i32
    %c0_i32_0 = arith.constant 0 : i32
    %c0_i32_1 = arith.constant 0 : i32
    return %arg0, %c0_i32, %c0_i32_0 : i32, i32, i32
  }
}

module attributes {stable_mosaic.version = 11 : i64} {
  func.func @bn_add_relu_kernel(%arg0: i32, %arg1: memref<1x16x16x128xf32, #tpu.memory_space<vmem>>, %arg2: memref<1x128xf32, #tpu.memory_space<vmem>>, %arg3: memref<1x128xf32, #tpu.memory_space<vmem>>, %arg4: memref<1x16x16x128xf32, #tpu.memory_space<vmem>>, %arg5: memref<1x16x16x128xf32, #tpu.memory_space<vmem>>) attributes {dimension_semantics = [#tpu.dimension_semantics<parallel>], iteration_bounds = array<i64: 2>, scalar_prefetch = 0 : i64, scratch_operands = 0 : i64, tpu.core_type = #tpu.core_type<tc>, window_params = [{transform_indices = @transform_0, window_bounds = array<i64: 1, 16, 16, 128>}, {pipeline_mode = #tpu.pipeline_mode<synchronous>, transform_indices = @transform_1, window_bounds = array<i64: 1, 128>}, {pipeline_mode = #tpu.pipeline_mode<synchronous>, transform_indices = @transform_2, window_bounds = array<i64: 1, 128>}, {transform_indices = @transform_3, window_bounds = array<i64: 1, 16, 16, 128>}, {transform_indices = @transform_4, window_bounds = array<i64: 1, 16, 16, 128>}]} {
    %c0 = arith.constant 0 : index
    %c0_0 = arith.constant 0 : index
    %c0_1 = arith.constant 0 : index
    %c0_2 = arith.constant 0 : index
    %0 = vector.load %arg1[%c0, %c0_0, %c0_1, %c0_2] : memref<1x16x16x128xf32, #tpu.memory_space<vmem>>, vector<1x16x16x128xf32>
    %c0_3 = arith.constant 0 : index
    %c0_4 = arith.constant 0 : index
    %1 = vector.load %arg2[%c0_3, %c0_4] : memref<1x128xf32, #tpu.memory_space<vmem>>, vector<1x128xf32>
    %2 = vector.shape_cast %1 : vector<1x128xf32> to vector<1x1x1x128xf32>
    %3 = vector.broadcast %2 : vector<1x1x1x128xf32> to vector<1x16x16x128xf32>
    %4 = arith.mulf %0, %3 : vector<1x16x16x128xf32>
    %c0_5 = arith.constant 0 : index
    %c0_6 = arith.constant 0 : index
    %5 = vector.load %arg3[%c0_5, %c0_6] : memref<1x128xf32, #tpu.memory_space<vmem>>, vector<1x128xf32>
    %6 = vector.shape_cast %5 : vector<1x128xf32> to vector<1x1x1x128xf32>
    %7 = vector.broadcast %6 : vector<1x1x1x128xf32> to vector<1x16x16x128xf32>
    %8 = arith.addf %4, %7 : vector<1x16x16x128xf32>
    %c0_7 = arith.constant 0 : index
    %c0_8 = arith.constant 0 : index
    %c0_9 = arith.constant 0 : index
    %c0_10 = arith.constant 0 : index
    %9 = vector.load %arg4[%c0_7, %c0_8, %c0_9, %c0_10] : memref<1x16x16x128xf32, #tpu.memory_space<vmem>>, vector<1x16x16x128xf32>
    %10 = arith.addf %8, %9 : vector<1x16x16x128xf32>
    %cst = arith.constant 0.000000e+00 : f32
    %11 = vector.broadcast %cst : f32 to vector<1x16x16x128xf32>
    %12 = arith.maximumf %10, %11 : vector<1x16x16x128xf32>
    %c0_11 = arith.constant 0 : index
    %c0_12 = arith.constant 0 : index
    %c0_13 = arith.constant 0 : index
    %c0_14 = arith.constant 0 : index
    %13 = vector.load %arg5[%c0_11, %c0_12, %c0_13, %c0_14] : memref<1x16x16x128xf32, #tpu.memory_space<vmem>>, vector<1x16x16x128xf32>
    tpu.vector_store %arg5[%c0_11, %c0_12, %c0_13, %c0_14], %12 {strides = array<i32>} : memref<1x16x16x128xf32, #tpu.memory_space<vmem>>, vector<1x16x16x128xf32>,
    return
  }
  func.func @transform_0(%arg0: i32) -> (i32, i32, i32, i32) {
    %c0_i32 = arith.constant 0 : i32
    %c0_i32_0 = arith.constant 0 : i32
    %c0_i32_1 = arith.constant 0 : i32
    %c0_i32_2 = arith.constant 0 : i32
    return %arg0, %c0_i32, %c0_i32_0, %c0_i32_1 : i32, i32, i32, i32
  }
  func.func @transform_1(%arg0: i32) -> (i32, i32) {
    %c0_i32 = arith.constant 0 : i32
    %c0_i32_0 = arith.constant 0 : i32
    %c0_i32_1 = arith.constant 0 : i32
    return %c0_i32, %c0_i32_0 : i32, i32
  }
  func.func @transform_2(%arg0: i32) -> (i32, i32) {
    %c0_i32 = arith.constant 0 : i32
    %c0_i32_0 = arith.constant 0 : i32
    %c0_i32_1 = arith.constant 0 : i32
    return %c0_i32, %c0_i32_0 : i32, i32
  }
  func.func @transform_3(%arg0: i32) -> (i32, i32, i32, i32) {
    %c0_i32 = arith.constant 0 : i32
    %c0_i32_0 = arith.constant 0 : i32
    %c0_i32_1 = arith.constant 0 : i32
    %c0_i32_2 = arith.constant 0 : i32
    return %arg0, %c0_i32, %c0_i32_0, %c0_i32_1 : i32, i32, i32, i32
  }
  func.func @transform_4(%arg0: i32) -> (i32, i32, i32, i32) {
    %c0_i32 = arith.constant 0 : i32
    %c0_i32_0 = arith.constant 0 : i32
    %c0_i32_1 = arith.constant 0 : i32
    %c0_i32_2 = arith.constant 0 : i32
    return %arg0, %c0_i32, %c0_i32_0, %c0_i32_1 : i32, i32, i32, i32
  }
}

</mosaic_0001>

<bundles_post_ra>
// kernel: basic_block_forward.5
= control target key start
LH: loop header
LB: loop body
LE: loop exit
PB: predicated region body
PF: predicated region fallthrough
CT: control target
= control target key end

     0   :  { %s582_s15 = smov 0   ;;  %s783_s0 = inlined_call_operand.vmem [shape: f32[2,16,16,128], index: 0, kind: input, shape index: {}]   ;;  %s784_s1 = inlined_call_operand.vmem [shape: f32[1,128], index: 1, kind: input, shape index: {}]   ;;  %s785_s2 = inlined_call_operand.vmem [shape: f32[1,128], index: 2, kind: input, shape index: {}]   ;;  %s786_s3 = inlined_call_operand.vmem [shape: f32[2,16,16,128], index: 3, kind: input, shape index: {}]   ;;  %s787_s4 = inlined_call_operand.vmem [shape: f32[2,16,16,128], index: 4, kind: output, shape index: {}]  }
   0x1 LB: > { %s523_s16 = sadd.s32 4294967295, %s555_s15   ;;  %p527_p0 = scmp.ge.s32.totalorder %s555_s15, 1  ;;  %s555_s15 = sphi %s582_s15, %s14_s15  }
   0x2   : > { %p172_p1 = scmp.lt.s32.totalorder %s555_s15, 3 }
   0x4   : > { %p173_p2 = pnand %p527_p0, %p172_p1 }
   0x5   : > { %p203_p3 = scmp.lt.s32.totalorder (!%p173_p2), %s523_s16, 1  ;;  %v595_v0 = vld [vmem:[%s784_s1] ss:$0 sm:$0xff] (!%p173_p2) }
   0x6   : > { %176 = sbr.rel (%p173_p2) target bundleno = 55 (0x37), region = 36  ;;  %v613_v2 = vld [vmem:[%s785_s2] ss:$0 sm:$0xff] (!%p173_p2) }
   0xd   : > { %s789_s16 = smov (!%p203_p3, %s523_s16), 1 }
   0xe   : > { %s590_s17 = sshll.u32 %s789_s16, 8 }
   0xf   : > { %s601_s22 = scalar_lea.vmem %s783_s0, %s590_s17  ;;  %s607_s25 = scalar_lea.vmem %s786_s3, %s590_s17 }
  0x10   : > { %v218_v1 = vld [vmem:[%s601_s22] sm:$0xff]  ;;  %v219_v3 = vld [vmem:[%s601_s22 + $0x8] sm:$0xff]  ;;  %v220_v7 = vld [vmem:[%s601_s22 + $0x10] sm:$0xff]  ;;  %s643_s30 = scalar_lea.vmem %s787_s4, %s590_s17 }
  0x11   : > { %v257_v4 = vmul.f32 %v595_v0, %v218_v1  ;;  %v328_v5 = vld [vmem:[%s607_s25] sm:$0xff]  ;;  %v258_v6 = vmul.f32 %v595_v0, %v219_v3  ;;  %v329_v8 = vld [vmem:[%s607_s25 + $0x8] sm:$0xff]  ;;  %v259_v9 = vmul.f32 %v595_v0, %v220_v7  ;;  %v221_v10 = vld [vmem:[%s601_s22 + $0x18] sm:$0xff] }
  0x12   : > { %v222_v11 = vld [vmem:[%s601_s22 + $0x20] sm:$0xff]  ;;  %v330_v14 = vld [vmem:[%s607_s25 + $0x10] sm:$0xff]  ;;  %v260_v15 = vmul.f32 %v595_v0, %v221_v10  ;;  %v331_v16 = vld [vmem:[%s607_s25 + $0x18] sm:$0xff] }
  0x13   : > { %v296_v12 = vadd.f32 %v613_v2, %v257_v4  ;;  %v297_v13 = vadd.f32 %v613_v2, %v258_v6  ;;  %v261_v17 = vmul.f32 %v595_v0, %v222_v11  ;;  %v223_v18 = vld [vmem:[%s601_s22 + $0x28] sm:$0xff]  ;;  %v298_v19 = vadd.f32 %v613_v2, %v259_v9  ;;  %v332_v20 = vld [vmem:[%s607_s25 + $0x20] sm:$0xff]  ;;  %v224_v22 = vld [vmem:[%s601_s22 + $0x30] sm:$0xff] }
  0x14   : > { %v262_v21 = vmul.f32 %v595_v0, %v223_v18  ;;  %v225_v23 = vld [vmem:[%s601_s22 + $0x38] sm:$0xff]  ;;  %v299_v26 = vadd.f32 %v613_v2, %v260_v15  ;;  %v333_v28 = vld [vmem:[%s607_s25 + $0x28] sm:$0xff]  ;;  %v263_v31 = vmul.f32 %v595_v0, %v224_v22  ;;  %v226_v33 = vld [vmem:[%s601_s22 + $0x40] sm:$0xff] }
  0x15   : > { %v360_v24 = vadd.f32 %v328_v5, %v296_v12  ;;  %v361_v25 = vadd.f32 %v329_v8, %v297_v13  ;;  %v300_v27 = vadd.f32 %v613_v2, %v261_v17  ;;  %v362_v29 = vadd.f32 %v330_v14, %v298_v19  ;;  %v227_v34 = vld [vmem:[%s601_s22 + $0x48] sm:$0xff]  ;;  %v334_v39 = vld [vmem:[%s607_s25 + $0x30] sm:$0xff]  ;;  %v335_v40 = vld [vmem:[%s607_s25 + $0x38] sm:$0xff] }
  0x16   : > { %v301_v30 = vadd.f32 %v613_v2, %v262_v21  ;;  %v264_v32 = vmul.f32 %v595_v0, %v225_v23  ;;  %v363_v37 = vadd.f32 %v331_v16, %v299_v26  ;;  %v228_v41 = vld [vmem:[%s601_s22 + $0x50] sm:$0xff]  ;;  %v302_v44 = vadd.f32 %v613_v2, %v263_v31  ;;  %v229_v46 = vld [vmem:[%s601_s22 + $0x58] sm:$0xff]  ;;  %v230_v47 = vld [vmem:[%s601_s22 + $0x60] sm:$0xff] }
  0x17   : > { %v392_v35 = vmax.f32 %v360_v24, 0.0  ;;  %v393_v36 = vmax.f32 %v361_v25, 0.0  ;;  %v364_v38 = vadd.f32 %v332_v20, %v300_v27  ;;  %v394_v42 = vmax.f32 %v362_v29, 0.0  ;;  %v231_v52 = vld [vmem:[%s601_s22 + $0x68] sm:$0xff]  ;;  %v336_v56 = vld [vmem:[%s607_s25 + $0x40] sm:$0xff]  ;;  %v338_v61 = vld [vmem:[%s607_s25 + $0x50] sm:$0xff] }
  0x18   : > { %v365_v43 = vadd.f32 %v333_v28, %v301_v30  ;;  %v303_v45 = vadd.f32 %v613_v2, %v264_v32  ;;  %v395_v48 = vmax.f32 %v363_v37, 0.0  ;;  %v265_v50 = vmul.f32 %v595_v0, %v226_v33  ;;  %v337_v57 = vld [vmem:[%s607_s25 + $0x48] sm:$0xff]  ;;  %v232_v1 = vld [vmem:[%s601_s22 + $0x70] sm:$0xff]  ;;  %v233_v3 = vld [vmem:[%s601_s22 + $0x78] sm:$0xff] }
  0x19   : > { %424 = vst [vmem:[%s643_s30] sm:$0xff] %v392_v35  ;;  %425 = vst [vmem:[%s643_s30 + $0x8] sm:$0xff] %v393_v36  ;;  %v396_v49 = vmax.f32 %v364_v38, 0.0  ;;  %v266_v51 = vmul.f32 %v595_v0, %v227_v34  ;;  %v366_v54 = vadd.f32 %v334_v39, %v302_v44  ;;  %v267_v58 = vmul.f32 %v595_v0, %v228_v41  ;;  %v339_v7 = vld [vmem:[%s607_s25 + $0x58] sm:$0xff]  ;;  %v340_v8 = vld [vmem:[%s607_s25 + $0x60] sm:$0xff] }
  0x1a   : > { %426 = vst [vmem:[%s643_s30 + $0x10] sm:$0xff] %v394_v42  ;;  %v397_v53 = vmax.f32 %v365_v43, 0.0  ;;  %v367_v55 = vadd.f32 %v335_v40, %v303_v45  ;;  %427 = vst [vmem:[%s643_s30 + $0x18] sm:$0xff] %v395_v48  ;;  %v304_v59 = vadd.f32 %v613_v2, %v265_v50  ;;  %v268_v62 = vmul.f32 %v595_v0, %v229_v46  ;;  %v341_v14 = vld [vmem:[%s607_s25 + $0x68] sm:$0xff]  ;;  %v234_v19 = vld [vmem:[%s601_s22 + $0x80] sm:$0xff] }
  0x1b   : > { %428 = vst [vmem:[%s643_s30 + $0x20] sm:$0xff] %v396_v49  ;;  %v305_v60 = vadd.f32 %v613_v2, %v266_v51  ;;  %v269_v63 = vmul.f32 %v595_v0, %v230_v47  ;;  %v398_v4 = vmax.f32 %v366_v54, 0.0  ;;  %v306_v6 = vadd.f32 %v613_v2, %v267_v58  ;;  %v235_v20 = vld [vmem:[%s601_s22 + $0x88] sm:$0xff]  ;;  %v342_v25 = vld [vmem:[%s607_s25 + $0x70] sm:$0xff]  ;;  %v343_v26 = vld [vmem:[%s607_s25 + $0x78] sm:$0xff] }
  0x1c   : > { %429 = vst [vmem:[%s643_s30 + $0x28] sm:$0xff] %v397_v53  ;;  %v399_v5 = vmax.f32 %v367_v55, 0.0  ;;  %v270_v9 = vmul.f32 %v595_v0, %v231_v52  ;;  %v368_v10 = vadd.f32 %v336_v56, %v304_v59  ;;  %v307_v12 = vadd.f32 %v613_v2, %v268_v62  ;;  %v236_v27 = vld [vmem:[%s601_s22 + $0x90] sm:$0xff]  ;;  %v237_v32 = vld [vmem:[%s601_s22 + $0x98] sm:$0xff]  ;;  %v238_v33 = vld [vmem:[%s601_s22 + $0xa0] sm:$0xff] }
  0x1d   : > { %v369_v11 = vadd.f32 %v337_v57, %v305_v60  ;;  %v308_v13 = vadd.f32 %v613_v2, %v269_v63  ;;  %430 = vst [vmem:[%s643_s30 + $0x30] sm:$0xff] %v398_v4  ;;  %v370_v15 = vadd.f32 %v338_v61, %v306_v6  ;;  %v271_v17 = vmul.f32 %v595_v0, %v232_v1  ;;  %v239_v38 = vld [vmem:[%s601_s22 + $0xa8] sm:$0xff]  ;;  %v344_v42 = vld [vmem:[%s607_s25 + $0x80] sm:$0xff]  ;;  %v346_v47 = vld [vmem:[%s607_s25 + $0x90] sm:$0xff] }
  0x1e   : > { %431 = vst [vmem:[%s643_s30 + $0x38] sm:$0xff] %v399_v5  ;;  %v309_v16 = vadd.f32 %v613_v2, %v270_v9  ;;  %v272_v18 = vmul.f32 %v595_v0, %v233_v3  ;;  %v400_v21 = vmax.f32 %v368_v10, 0.0  ;;  %v371_v23 = vadd.f32 %v339_v7, %v307_v12  ;;  %v345_v43 = vld [vmem:[%s607_s25 + $0x88] sm:$0xff]  ;;  %v240_v50 = vld [vmem:[%s601_s22 + $0xb0] sm:$0xff]  ;;  %v241_v51 = vld [vmem:[%s601_s22 + $0xb8] sm:$0xff] }
  0x1f   : > { %v401_v22 = vmax.f32 %v369_v11, 0.0  ;;  %v372_v24 = vadd.f32 %v340_v8, %v308_v13  ;;  %v402_v28 = vmax.f32 %v370_v15, 0.0  ;;  %v310_v30 = vadd.f32 %v613_v2, %v271_v17  ;;  %v347_v55 = vld [vmem:[%s607_s25 + $0x98] sm:$0xff]  ;;  %v348_v56 = vld [vmem:[%s607_s25 + $0xa0] sm:$0xff]  ;;  %v349_v62 = vld [vmem:[%s607_s25 + $0xa8] sm:$0xff] }
  0x20   : > { %v373_v29 = vadd.f32 %v341_v14, %v309_v16  ;;  %v311_v31 = vadd.f32 %v613_v2, %v272_v18  ;;  %432 = vst [vmem:[%s643_s30 + $0x40] sm:$0xff] %v400_v21  ;;  %v403_v34 = vmax.f32 %v371_v23, 0.0  ;;  %v273_v36 = vmul.f32 %v595_v0, %v234_v19  ;;  %v242_v5 = vld [vmem:[%s601_s22 + $0xc0] sm:$0xff]  ;;  %v243_v6 = vld [vmem:[%s601_s22 + $0xc8] sm:$0xff]  ;;  %v350_v11 = vld [vmem:[%s607_s25 + $0xb0] sm:$0xff] }
  0x21   : > { %433 = vst [vmem:[%s643_s30 + $0x48] sm:$0xff] %v401_v22  ;;  %v404_v35 = vmax.f32 %v372_v24, 0.0  ;;  %v274_v37 = vmul.f32 %v595_v0, %v235_v20  ;;  %434 = vst [vmem:[%s643_s30 + $0x50] sm:$0xff] %v402_v28  ;;  %v374_v40 = vadd.f32 %v342_v25, %v310_v30  ;;  %v275_v44 = vmul.f32 %v595_v0, %v236_v27  ;;  %v351_v12 = vld [vmem:[%s607_s25 + $0xb8] sm:$0xff]  ;;  %v244_v13 = vld [vmem:[%s601_s22 + $0xd0] sm:$0xff] }
  0x22   : > { %v405_v39 = vmax.f32 %v373_v29, 0.0  ;;  %v375_v41 = vadd.f32 %v343_v26, %v311_v31  ;;  %435 = vst [vmem:[%s643_s30 + $0x58] sm:$0xff] %v403_v34  ;;  %v312_v45 = vadd.f32 %v613_v2, %v273_v36  ;;  %v276_v48 = vmul.f32 %v595_v0, %v237_v32  ;;  %v245_v18 = vld [vmem:[%s601_s22 + $0xd8] sm:$0xff]  ;;  %v246_v19 = vld [vmem:[%s601_s22 + $0xe0] sm:$0xff]  ;;  %v247_v24 = vld [vmem:[%s601_s22 + $0xe8] sm:$0xff] }
  0x23   : > { %436 = vst [vmem:[%s643_s30 + $0x60] sm:$0xff] %v404_v35  ;;  %v313_v46 = vadd.f32 %v613_v2, %v274_v37  ;;  %v277_v49 = vmul.f32 %v595_v0, %v238_v33  ;;  %v406_v52 = vmax.f32 %v374_v40, 0.0  ;;  %v314_v54 = vadd.f32 %v613_v2, %v275_v44  ;;  %v352_v28 = vld [vmem:[%s607_s25 + $0xc0] sm:$0xff]  ;;  %v353_v29 = vld [vmem:[%s607_s25 + $0xc8] sm:$0xff]  ;;  %v354_v33 = vld [vmem:[%s607_s25 + $0xd0] sm:$0xff] }
  0x24   : > { %437 = vst [vmem:[%s643_s30 + $0x68] sm:$0xff] %v405_v39  ;;  %v407_v53 = vmax.f32 %v375_v41, 0.0  ;;  %v278_v57 = vmul.f32 %v595_v0, %v239_v38  ;;  %v376_v58 = vadd.f32 %v344_v42, %v312_v45  ;;  %v315_v60 = vadd.f32 %v613_v2, %v276_v48  ;;  %v248_v36 = vld [vmem:[%s601_s22 + $0xf0] sm:$0xff]  ;;  %v249_v37 = vld [vmem:[%s601_s22 + $0xf8] sm:$0xff]  ;;  %v356_v42 = vld [vmem:[%s607_s25 + $0xe0] sm:$0xff] }
  0x25   : > { %v377_v59 = vadd.f32 %v345_v43, %v313_v46  ;;  %v316_v61 = vadd.f32 %v613_v2, %v277_v49  ;;  %438 = vst [vmem:[%s643_s30 + $0x70] sm:$0xff] %v406_v52  ;;  %v378_v63 = vadd.f32 %v346_v47, %v314_v54  ;;  %v279_v3 = vmul.f32 %v595_v0, %v240_v50  ;;  %v355_v41 = vld [vmem:[%s607_s25 + $0xd8] sm:$0xff]  ;;  %v357_v48 = vld [vmem:[%s607_s25 + $0xe8] sm:$0xff] }
  0x26   : > { %439 = vst [vmem:[%s643_s30 + $0x78] sm:$0xff] %v407_v53  ;;  %v317_v1 = vadd.f32 %v613_v2, %v278_v57  ;;  %v280_v4 = vmul.f32 %v595_v0, %v241_v51  ;;  %v408_v7 = vmax.f32 %v376_v58, 0.0  ;;  %v379_v9 = vadd.f32 %v347_v55, %v315_v60  ;;  %v358_v57 = vld [vmem:[%s607_s25 + $0xf0] sm:$0xff]  ;;  %v359_v58 = vld [vmem:[%s607_s25 + $0xf8] sm:$0xff] }
  0x27   : > { %v409_v8 = vmax.f32 %v377_v59, 0.0  ;;  %v380_v10 = vadd.f32 %v348_v56, %v316_v61  ;;  %v410_v14 = vmax.f32 %v378_v63, 0.0  ;;  %v318_v16 = vadd.f32 %v613_v2, %v279_v3 }
  0x28   : > { %v381_v15 = vadd.f32 %v349_v62, %v317_v1  ;;  %v319_v17 = vadd.f32 %v613_v2, %v280_v4  ;;  %440 = vst [vmem:[%s643_s30 + $0x80] sm:$0xff] %v408_v7  ;;  %v411_v20 = vmax.f32 %v379_v9, 0.0  ;;  %v281_v22 = vmul.f32 %v595_v0, %v242_v5 }
  0x29   : > { %441 = vst [vmem:[%s643_s30 + $0x88] sm:$0xff] %v409_v8  ;;  %v412_v21 = vmax.f32 %v380_v10, 0.0  ;;  %v282_v23 = vmul.f32 %v595_v0, %v243_v6  ;;  %442 = vst [vmem:[%s643_s30 + $0x90] sm:$0xff] %v410_v14  ;;  %v382_v26 = vadd.f32 %v350_v11, %v318_v16  ;;  %v283_v30 = vmul.f32 %v595_v0, %v244_v13 }
  0x2a   : > { %v413_v25 = vmax.f32 %v381_v15, 0.0  ;;  %v383_v27 = vadd.f32 %v351_v12, %v319_v17  ;;  %443 = vst [vmem:[%s643_s30 + $0x98] sm:$0xff] %v411_v20  ;;  %v320_v31 = vadd.f32 %v613_v2, %v281_v22  ;;  %v284_v34 = vmul.f32 %v595_v0, %v245_v18 }
  0x2b   : > { %444 = vst [vmem:[%s643_s30 + $0xa0] sm:$0xff] %v412_v21  ;;  %v321_v32 = vadd.f32 %v613_v2, %v282_v23  ;;  %v285_v35 = vmul.f32 %v595_v0, %v246_v19  ;;  %v414_v38 = vmax.f32 %v382_v26, 0.0  ;;  %v322_v40 = vadd.f32 %v613_v2, %v283_v30 }
  0x2c   : > { %445 = vst [vmem:[%s643_s30 + $0xa8] sm:$0xff] %v413_v25  ;;  %v415_v39 = vmax.f32 %v383_v27, 0.0  ;;  %v286_v43 = vmul.f32 %v595_v0, %v247_v24  ;;  %v384_v44 = vadd.f32 %v352_v28, %v320_v31  ;;  %v323_v46 = vadd.f32 %v613_v2, %v284_v34 }
  0x2d   : > { %v385_v45 = vadd.f32 %v353_v29, %v321_v32  ;;  %v324_v47 = vadd.f32 %v613_v2, %v285_v35  ;;  %446 = vst [vmem:[%s643_s30 + $0xb0] sm:$0xff] %v414_v38  ;;  %v386_v49 = vadd.f32 %v354_v33, %v322_v40  ;;  %v287_v51 = vmul.f32 %v595_v0, %v248_v36 }
  0x2e   : > { %447 = vst [vmem:[%s643_s30 + $0xb8] sm:$0xff] %v415_v39  ;;  %v325_v50 = vadd.f32 %v613_v2, %v286_v43  ;;  %v288_v52 = vmul.f32 %v595_v0, %v249_v37  ;;  %v416_v53 = vmax.f32 %v384_v44, 0.0  ;;  %v387_v55 = vadd.f32 %v355_v41, %v323_v46 }
  0x2f   : > { %v417_v54 = vmax.f32 %v385_v45, 0.0  ;;  %v388_v56 = vadd.f32 %v356_v42, %v324_v47  ;;  %v418_v59 = vmax.f32 %v386_v49, 0.0  ;;  %v326_v61 = vadd.f32 %v613_v2, %v287_v51 }
  0x30   : > { %v389_v60 = vadd.f32 %v357_v48, %v325_v50  ;;  %v327_v62 = vadd.f32 %v613_v2, %v288_v52  ;;  %448 = vst [vmem:[%s643_s30 + $0xc0] sm:$0xff] %v416_v53  ;;  %v419_v0 = vmax.f32 %v387_v55, 0.0 }
  0x31   : > { %449 = vst [vmem:[%s643_s30 + $0xc8] sm:$0xff] %v417_v54  ;;  %v420_v63 = vmax.f32 %v388_v56, 0.0  ;;  %450 = vst [vmem:[%s643_s30 + $0xd0] sm:$0xff] %v418_v59  ;;  %v390_v3 = vadd.f32 %v358_v57, %v326_v61 }
  0x32   : > { %v421_v1 = vmax.f32 %v389_v60, 0.0  ;;  %v391_v4 = vadd.f32 %v359_v58, %v327_v62  ;;  %451 = vst [vmem:[%s643_s30 + $0xd8] sm:$0xff] %v419_v0 }
  0x33   : > { %452 = vst [vmem:[%s643_s30 + $0xe0] sm:$0xff] %v420_v63  ;;  %v422_v5 = vmax.f32 %v390_v3, 0.0 }
  0x34   : > { %453 = vst [vmem:[%s643_s30 + $0xe8] sm:$0xff] %v421_v1  ;;  %v423_v6 = vmax.f32 %v391_v4, 0.0 }
  0x35   : > { %454 = vst [vmem:[%s643_s30 + $0xf0] sm:$0xff] %v422_v5 }
  0x36   : > { %455 = vst [vmem:[%s643_s30 + $0xf8] sm:$0xff] %v423_v6 }
  0x37 PF: > { %s14_s15 = sadd.s32 1, %s555_s15  }
  0x38   : > { %p11_p4 = scmp.ge.s32.totalorder %s14_s15, 4  }
  0x3a   :  { %13 = sbr.rel (!%p11_p4) target bundleno = 1 (0x1), region = 69 }

// kernel: basic_block_forward.4
= control target key start
LH: loop header
LB: loop body
LE: loop exit
PB: predicated region body
PF: predicated region fallthrough
CT: control target
= control target key end

     0   :  { %s3253_s18 = smov 0   ;;  %s4288_s0 = inlined_call_operand.vmem [shape: f32[2,16,16,128], index: 0, kind: input, shape index: {}]   ;;  %s4289_s1 = inlined_call_operand.vmem [shape: f32[1,128], index: 1, kind: input, shape index: {}]   ;;  %s4290_s2 = inlined_call_operand.vmem [shape: f32[1,128], index: 2, kind: input, shape index: {}]   ;;  %s4291_s3 = inlined_call_operand.vmem [shape: bf16[1152,128], index: 3, kind: input, shape index: {}]   ;;  %s4292_s4 = inlined_call_operand.vmem [shape: f32[2,16,16,128], index: 4, kind: output, shape index: {0}]   ;;  %s4293_s5 = inlined_call_operand.vmem [shape: f32[2,2,128], index: 5, kind: output, shape index: {1}]  }
   0x1 LB: > { %s2507_s19 = sadd.s32 4294967295, %s3219_s18   ;;  %p2511_p0 = scmp.ge.s32.totalorder %s3219_s18, 1  ;;  %s3219_s18 = sphi %s3253_s18, %s16_s18  }
   0x2   : > { %p190_p1 = scmp.lt.s32.totalorder %s3219_s18, 3 }
   0x4   : > { %p191_p2 = pnand %p2511_p0, %p190_p1 }
   0x5   : > { %v3140_v0 = vld [vmem:[%s4291_s3 + $0x40] sm:$0xff] (!%p191_p2)   ;;  %v3221_v2 = vmov (!%p191_p2), 0.0   ;;  %v3142_v3 = vld [vmem:[%s4291_s3 + $0x48] sm:$0xff] (!%p191_p2)   ;;  %p222_p3 = scmp.lt.s32.totalorder (!%p191_p2), %s2507_s19, 1  ;;  %v3144_v5 = vld [vmem:[%s4291_s3 + $0x50] sm:$0xff] (!%p191_p2)   ;;  %v3222_v63 = vmov (!%p191_p2), 0.0|0.0  }
   0x6   : > { %194 = sbr.rel (%p191_p2) target bundleno = 562 (0x232), region = 36  ;;  %v3141_v1 = vld [vmem:[%s4291_s3] sm:$0xff] (!%p191_p2)   ;;  %379 = vst [vmem:[#allocation2] sm:$0xff] (!%p191_p2), %v3221_v2  ;;  %380 = vst [vmem:[#allocation2 + $0x8] sm:$0xff] (!%p191_p2), %v3221_v2  ;;  %2595 = vmatprep.subr.bf16.mxu0 (!%p191_p2), %v3140_v0  ;;  %3115 = vmatprep.subr.bf16.mxu1 (!%p191_p2), %v3140_v0  ;;  %v3143_v4 = vld [vmem:[%s4291_s3 + $0x8] sm:$0xff] (!%p191_p2)   ;;  %vm2418_vm0 = vcmask (!%p191_p2), 1040384  }
   0x7   : > { %381 = vst [vmem:[#allocation2 + $0x10] sm:$0x3] (!%p191_p2), %v3221_v2  ;;  %382 = vst [vmem:[#allocation2 + $0x18] sm:$0xff] (!%p191_p2), %v3221_v2  ;;  %2596 = vmatpush3.bf16.msra.mxu0 (!%p191_p2), %v3141_v1  ;;  %3123 = vmatpush3.bf16.msra.mxu1 (!%p191_p2), %v3141_v1  ;;  %v3145_v6 = vld [vmem:[%s4291_s3 + $0x10] sm:$0xff] (!%p191_p2)   ;;  %v3146_v7 = vld [vmem:[%s4291_s3 + $0x58] sm:$0xff] (!%p191_p2)  }
   0x8   : > { %383 = vst [vmem:[#allocation2 + $0x20] sm:$0xff] (!%p191_p2), %v3221_v2  ;;  %384 = vst [vmem:[#allocation2 + $0x28] sm:$0x3] (!%p191_p2), %v3221_v2  ;;  %2597 = vmatprep.subr.bf16.mxu0 (!%p191_p2), %v3142_v3  ;;  %3116 = vmatprep.subr.bf16.mxu1 (!%p191_p2), %v3142_v3  ;;  %v3147_v8 = vld [vmem:[%s4291_s3 + $0x18] sm:$0xff] (!%p191_p2)   ;;  %v3148_v9 = vld [vmem:[%s4291_s3 + $0x60] sm:$0xff] (!%p191_p2)  }
   0x9   : > { %385 = vst [vmem:[#allocation2 + $0x30] sm:$0xff] (!%p191_p2), %v3221_v2  ;;  %386 = vst [vmem:[#allocation2 + $0x38] sm:$0xff] (!%p191_p2), %v3221_v2  ;;  %v3149_v10 = vld [vmem:[%s4291_s3 + $0x20] sm:$0xff] (!%p191_p2)   ;;  %v3150_v11 = vld [vmem:[%s4291_s3 + $0x68] sm:$0xff] (!%p191_p2)  }
   0xa   : > { %387 = vst [vmem:[#allocation2 + $0x40] sm:$0x3] (!%p191_p2), %v3221_v2  ;;  %388 = vst [vmem:[#allocation2 + $0x48] sm:$0xff] (!%p191_p2), %v3221_v2  ;;  %v3313_v17 = vld [vmem:[%s4289_s1] ss:$0 sm:$0xff] (!%p191_p2)  ;;  %v3151_v21 = vld [vmem:[%s4291_s3 + $0x28] sm:$0xff] (!%p191_p2)  }
   0xb   : > { %389 = vst [vmem:[#allocation2 + $0x50] sm:$0xff] (!%p191_p2), %v3221_v2  ;;  %390 = vst [vmem:[#allocation2 + $0x58] sm:$0x3] (!%p191_p2), %v3221_v2  ;;  %2598 = vmatpush3.bf16.msra.mxu0 (!%p191_p2), %v3143_v4  ;;  %3124 = vmatpush3.bf16.msra.mxu1 (!%p191_p2), %v3143_v4  ;;  %v3318_v18 = vld [vmem:[%s4290_s2] ss:$0 sm:$0xff] (!%p191_p2)  ;;  %v3152_v22 = vld [vmem:[%s4291_s3 + $0x70] sm:$0xff] (!%p191_p2)  }
   0xc   : > { %391 = vst [vmem:[#allocation2 + $0x60] sm:$0xff] (!%p191_p2), %v3221_v2  ;;  %392 = vst [vmem:[#allocation2 + $0x68] sm:$0xff] (!%p191_p2), %v3221_v2  ;;  %2599 = vmatprep.subr.bf16.mxu0 (!%p191_p2), %v3144_v5  ;;  %3117 = vmatprep.subr.bf16.mxu1 (!%p191_p2), %v3144_v5  ;;  %v3153_v27 = vld [vmem:[%s4291_s3 + $0x30] sm:$0xff] (!%p191_p2)   ;;  %v3154_v28 = vld [vmem:[%s4291_s3 + $0x78] sm:$0xff] (!%p191_p2)  }
   0xd   : > { %393 = vst [vmem:[#allocation2 + $0x70] sm:$0x3] %v3221_v2  ;;  %394 = vst [vmem:[#allocation2 + $0x78] sm:$0xff] %v3221_v2  ;;  %s4295_s19 = smov (!%p222_p3, %s2507_s19), 1  ;;  %v498_v12 = vld [vmem:[#allocation2 + $0x1] sm:$0xff]  ;;  %v3155_v36 = vld [vmem:[%s4291_s3 + $0x38] sm:$0xff]  }
   0xe   : > { %395 = vst [vmem:[#allocation2 + $0x80] sm:$0xff] %v3221_v2  ;;  %396 = vst [vmem:[#allocation2 + $0x88] sm:$0x3] %v3221_v2  ;;  %s2593_s9 = sshll.u32 %s4295_s19, 8  ;;  %v499_v13 = vld [vmem:[#allocation2 + $0x9] sm:$0xff]  ;;  %v3156_v39 = vld [vmem:[%s4291_s3 + $0xc0] sm:$0xff]  }
   0xf   : > { %397 = vst [vmem:[#allocation2 + $0x90] sm:$0xff] %v3221_v2  ;;  %398 = vst [vmem:[#allocation2 + $0x98] sm:$0xff] %v3221_v2  ;;  %2600 = vmatpush3.bf16.msra.mxu0 %v3145_v6  ;;  %3125 = vmatpush3.bf16.msra.mxu1 %v3145_v6  ;;  %s3300_s16 = scalar_lea.vmem %s4288_s0, %s2593_s9  ;;  %v756_v15 = vpack.c.bf16 %v499_v13, %v498_v12  ;;  %v3157_v42 = vld [vmem:[%s4291_s3 + $0x140] sm:$0xff]   ;;  %v3160_v49 = vld [vmem:[%s4291_s3 + $0xc8] sm:$0xff]   ;;  %s4197_s24 = scalar_lea.vmem %s4292_s4, %s2593_s9 }
  0x10   : > { %399 = vst [vmem:[#allocation2 + $0xa0] sm:$0x3] %v3221_v2  ;;  %400 = vst [vmem:[#allocation2 + $0xa8] sm:$0xff] %v3221_v2  ;;  %2601 = vmatprep.subr.bf16.mxu0 %v3146_v7  ;;  %3118 = vmatprep.subr.bf16.mxu1 %v3146_v7  ;;  %v259_v14 = vld [vmem:[%s3300_s16 + $0xb0] sm:$0xff]  ;;  %v260_v16 = vld [vmem:[%s3300_s16 + $0xb8] sm:$0xff]  ;;  %s2516_s9 = sshll.u32 %s4295_s19, 1 }
  0x11   : > { %401 = vst [vmem:[#allocation2 + $0xb0] sm:$0xff] %v3221_v2  ;;  %402 = vst [vmem:[#allocation2 + $0xb8] sm:$0x3] %v3221_v2  ;;  %v298_v19 = vmul.f32 %v3313_v17, %v259_v14  ;;  %v299_v20 = vmul.f32 %v3313_v17, %v260_v16  ;;  %1507 = vmatprep.mubr.bf16.mxu0 %v756_v15  ;;  %v237_v30 = vld [vmem:[%s3300_s16] sm:$0xff]  ;;  %v238_v31 = vld [vmem:[%s3300_s16 + $0x8] sm:$0xff]  ;;  %s235_s27 = scalar_lea.vmem %s4293_s5, %s2516_s9 }
  0x12   : > { %403 = vst [vmem:[#allocation2 + $0xc0] sm:$0xff] %v3221_v2  ;;  %404 = vst [vmem:[#allocation2 + $0xc8] sm:$0xff] %v3221_v2  ;;  %v276_v32 = vmul.f32 %v3313_v17, %v237_v30  ;;  %v277_v33 = vmul.f32 %v3313_v17, %v238_v31  ;;  %v261_v34 = vld [vmem:[%s3300_s16 + $0xc0] sm:$0xff]  ;;  %v262_v35 = vld [vmem:[%s3300_s16 + $0xc8] sm:$0xff] }
  0x13   : > { %405 = vst [vmem:[#allocation2 + $0xd0] sm:$0x3] %v3221_v2  ;;  %406 = vst [vmem:[#allocation2 + $0xd8] sm:$0xff] %v3221_v2  ;;  %2602 = vmatpush3.bf16.msra.mxu0 %v3147_v8  ;;  %3126 = vmatpush3.bf16.msra.mxu1 %v3147_v8  ;;  %v337_v23 = vadd.f32 %v3318_v18, %v298_v19  ;;  %v338_v24 = vadd.f32 %v3318_v18, %v299_v20  ;;  %v3158_v45 = vld [vmem:[%s4291_s3 + $0x80] sm:$0xff]   ;;  %v3165_v56 = vld [vmem:[%s4291_s3 + $0x148] sm:$0xff]  }
  0x14   : > { %407 = vst [vmem:[#allocation2 + $0xe0] sm:$0xff] %v3221_v2  ;;  %408 = vst [vmem:[#allocation2 + $0xe8] sm:$0x3] %v3221_v2  ;;  %2603 = vmatprep.subr.bf16.mxu0 %v3148_v9  ;;  %3119 = vmatprep.subr.bf16.mxu1 %v3148_v9  ;;  %v300_v37 = vmul.f32 %v3313_v17, %v261_v34  ;;  %v301_v38 = vmul.f32 %v3313_v17, %v262_v35  ;;  %v3159_v46 = vld [vmem:[%s4291_s3 + $0x100] sm:$0xff]   ;;  %v239_v57 = vld [vmem:[%s3300_s16 + $0x10] sm:$0xff] }
  0x15   : > { %409 = vst [vmem:[#allocation2 + $0xf0] sm:$0xff] %v3221_v2  ;;  %410 = vst [vmem:[#allocation2 + $0xf8] sm:$0xff] %v3221_v2  ;;  %v369_v25 = vmax.f32 %v337_v23, 0.0  ;;  %v370_v26 = vmax.f32 %v338_v24, 0.0  ;;  %v315_v40 = vadd.f32 %v3318_v18, %v276_v32  ;;  %v316_v41 = vadd.f32 %v3318_v18, %v277_v33  ;;  %v240_v59 = vld [vmem:[%s3300_s16 + $0x18] sm:$0xff]  ;;  %v263_v61 = vld [vmem:[%s3300_s16 + $0xd0] sm:$0xff] }
  0x16   : > { %411 = vst [vmem:[#allocation2 + $0x100] sm:$0x3] %v3221_v2  ;;  %412 = vst [vmem:[#allocation2 + $0x108] sm:$0xff] %v3221_v2  ;;  %v339_v43 = vadd.f32 %v3318_v18, %v300_v37  ;;  %v340_v44 = vadd.f32 %v3318_v18, %v301_v38  ;;  %v278_v60 = vmul.f32 %v3313_v17, %v239_v57  ;;  %v264_v62 = vld [vmem:[%s3300_s16 + $0xd8] sm:$0xff]  ;;  %v3161_v0 = vld [vmem:[%s4291_s3 + $0x88] sm:$0xff]  }
  0x17   : > { %413 = vst [vmem:[#allocation2 + $0x110] sm:$0xff] %v3221_v2  ;;  %414 = vst [vmem:[#allocation2 + $0x118] sm:$0x3] %v3221_v2  ;;  %2604 = vmatpush3.bf16.msra.mxu0 %v3149_v10  ;;  %3127 = vmatpush3.bf16.msra.mxu1 %v3149_v10  ;;  %v864_v29 = vpack.c.bf16 %v370_v26, %v369_v25  ;;  %v347_v47 = vmax.f32 %v315_v40, 0.0  ;;  %v348_v48 = vmax.f32 %v316_v41, 0.0  ;;  %v3167_v4 = vld [vmem:[%s4291_s3 + $0x108] sm:$0xff]  }
  0x18   : > { %415 = vst [vmem:[#allocation2 + $0x120] sm:$0xff] %v3221_v2  ;;  %416 = vst [vmem:[#allocation2 + $0x128] sm:$0xff] %v3221_v2  ;;  %2605 = vmatprep.subr.bf16.mxu0 %v3150_v11  ;;  %3120 = vmatprep.subr.bf16.mxu1 %v3150_v11  ;;  %v371_v50 = vmax.f32 %v339_v43, 0.0  ;;  %v372_v51 = vmax.f32 %v340_v44, 0.0  ;;  %v279_v1 = vmul.f32 %v3313_v17, %v240_v59  ;;  %v3162_v6 = vld [vmem:[%s4291_s3 + $0xd0] sm:$0xff]   ;;  %v3164_v14 = vld [vmem:[%s4291_s3 + $0xd8] sm:$0xff]  }
  0x19   : > { %417 = vst [vmem:[#allocation2 + $0x130] sm:$0x3] %v3221_v2  ;;  %418 = vst [vmem:[#allocation2 + $0x138] sm:$0xff] %v3221_v2  ;;  %1603 = vmatprep.mubr.bf16.mxu1 %v864_v29  ;;  %v3366_v55 = vpack.c.bf16 %v348_v48, %v347_v47  ;;  %v303_v3 = vmul.f32 %v3313_v17, %v264_v62  ;;  %v317_v5 = vadd.f32 %v3318_v18, %v278_v60  ;;  %v3163_v10 = vld [vmem:[%s4291_s3 + $0x90] sm:$0xff]   ;;  %v241_v20 = vld [vmem:[%s3300_s16 + $0x20] sm:$0xff] }
  0x1a   : > { %419 = vst [vmem:[#allocation2 + $0x140] sm:$0xff] %v3221_v2  ;;  %420 = vst [vmem:[#allocation2 + $0x148] sm:$0x3] %v3221_v2  ;;  %v873_v58 = vpack.c.bf16 %v372_v51, %v371_v50  ;;  %v318_v7 = vadd.f32 %v3318_v18, %v279_v1  ;;  %v242_v24 = vld [vmem:[%s3300_s16 + $0x28] sm:$0xff]  ;;  %v265_v30 = vld [vmem:[%s3300_s16 + $0xe0] sm:$0xff] }
  0x1b   : > { %421 = vst [vmem:[#allocation2 + $0x150] sm:$0xff] %v3221_v2  ;;  %422 = vst [vmem:[#allocation2 + $0x158] sm:$0xff] %v3221_v2  ;;  %2606 = vmatpush3.bf16.msra.mxu0 %v3151_v21  ;;  %3128 = vmatpush3.bf16.msra.mxu1 %v3151_v21  ;;  %v342_v9 = vadd.f32 %v3318_v18, %v303_v3  ;;  %v349_v11 = vmax.f32 %v317_v5, 0.0  ;;  %v281_v29 = vmul.f32 %v3313_v17, %v242_v24  ;;  %v266_v31 = vld [vmem:[%s3300_s16 + $0xe8] sm:$0xff]  ;;  %v3166_v32 = vld [vmem:[%s4291_s3 + $0x98] sm:$0xff]  }
  0x1c   : > { %423 = vst [vmem:[#allocation2 + $0x160] sm:$0x3] %v3221_v2  ;;  %424 = vst [vmem:[#allocation2 + $0x168] sm:$0xff] %v3221_v2  ;;  %2607 = vmatprep.subr.bf16.mxu0 %v3152_v22  ;;  %3121 = vmatprep.subr.bf16.mxu1 %v3152_v22  ;;  %v350_v15 = vmax.f32 %v318_v7, 0.0  ;;  %v304_v34 = vmul.f32 %v3313_v17, %v265_v30  ;;  %v305_v35 = vmul.f32 %v3313_v17, %v266_v31  ;;  %v3173_v37 = vld [vmem:[%s4291_s3 + $0x150] sm:$0xff]   ;;  %v3168_v38 = vld [vmem:[%s4291_s3 + $0xe0] sm:$0xff]  }
  0x1d   : > { %425 = vst [vmem:[#allocation2 + $0x170] sm:$0xff] %v3221_v2  ;;  %426 = vst [vmem:[#allocation2 + $0x178] sm:$0x3] %v3221_v2  ;;  %v374_v19 = vmax.f32 %v342_v9, 0.0  ;;  %v3175_v43 = vld [vmem:[%s4291_s3 + $0x110] sm:$0xff]   ;;  %v3169_v44 = vld [vmem:[%s4291_s3 + $0xa0] sm:$0xff]  }
  0x1e   : > { %427 = vst [vmem:[#allocation2 + $0x180] sm:$0xff] %v3221_v2  ;;  %428 = vst [vmem:[#allocation2 + $0x188] sm:$0xff] %v3221_v2  ;;  %v343_v40 = vadd.f32 %v3318_v18, %v304_v34  ;;  %v344_v41 = vadd.f32 %v3318_v18, %v305_v35  ;;  %v243_v57 = vld [vmem:[%s3300_s16 + $0x30] sm:$0xff]  ;;  %v530_v24 = vld [vmem:[#allocation2 + $0x2] sm:$0xff] }
  0x1f   : > { %429 = vst [vmem:[#allocation2 + $0x190] sm:$0x3] %v3221_v2  ;;  %430 = vst [vmem:[#allocation2 + $0x198] sm:$0xff] %v3221_v2  ;;  %2608 = vmatpush3.bf16.msra.mxu0 %v3153_v27  ;;  %3129 = vmatpush3.bf16.msra.mxu1 %v3153_v27  ;;  %v3406_v27 = vpack.c.bf16 %v350_v15, %v349_v11  ;;  %v282_v59 = vmul.f32 %v3313_v17, %v243_v57  ;;  %v3172_v62 = vld [vmem:[%s4291_s3 + $0xf0] sm:$0xff]  }
  0x20   : > { %431 = vst [vmem:[#allocation2 + $0x1a0] sm:$0xff] %v3221_v2  ;;  %432 = vst [vmem:[#allocation2 + $0x1a8] sm:$0x3] %v3221_v2  ;;  %2609 = vmatprep.subr.bf16.mxu0 %v3154_v28  ;;  %3122 = vmatprep.subr.bf16.mxu1 %v3154_v28  ;;  %v302_v2 = vmul.f32 %v3313_v17, %v263_v61  ;;  %v3171_v61 = vld [vmem:[%s4291_s3 + $0xa8] sm:$0xff]  }
  0x21   : > { %456 = vst [vmem:[#allocation2 + $0x121] sm:$0xff] %v369_v25  ;;  %457 = vst [vmem:[#allocation2 + $0x129] sm:$0xff] %v370_v26  ;;  %v280_v25 = vmul.f32 %v3313_v17, %v241_v20  ;;  %v247_v20 = vld [vmem:[%s3300_s16 + $0x50] sm:$0xff] }
  0x22   : > { %434 = vst [vmem:[#allocation2 + $0x19] sm:$0xff] %v347_v47  ;;  %435 = vst [vmem:[#allocation2 + $0x21] sm:$0xff] %v348_v48  ;;  %v341_v8 = vadd.f32 %v3318_v18, %v302_v2  ;;  %v3180_v2 = vld [vmem:[%s4291_s3 + $0x158] sm:$0xff]  }
  0x23   : > { %2610 = vmatpush3.bf16.msra.mxu0 %v3155_v36  ;;  %3130 = vmatpush3.bf16.msra.mxu1 %v3155_v36  ;;  %458 = vst [vmem:[#allocation2 + $0x139] sm:$0xff] %v371_v50  ;;  %459 = vst [vmem:[#allocation2 + $0x141] sm:$0xff] %v372_v51  ;;  %v319_v33 = vadd.f32 %v3318_v18, %v280_v25  ;;  %v320_v36 = vadd.f32 %v3318_v18, %v281_v29  ;;  %v531_v25 = vld [vmem:[#allocation2 + $0xa] sm:$0xff] }
  0x24   : > { %2707 = vmatprep.subr.bf16.mxu1 %v3156_v39  ;;  %2819 = vmatprep.subr.bf16.mxu0 %v3157_v42  ;;  %v373_v16 = vmax.f32 %v341_v8, 0.0  ;;  %436 = vst [vmem:[#allocation2 + $0x31] sm:$0xff] %v349_v11  ;;  %437 = vst [vmem:[#allocation2 + $0x39] sm:$0xff] %v350_v15  ;;  %v286_v29 = vmul.f32 %v3313_v17, %v247_v20 }
  0x25   : > { %461 = vst [vmem:[#allocation2 + $0x159] sm:$0xff] %v374_v19  ;;  %v351_v39 = vmax.f32 %v319_v33, 0.0  ;;  %v352_v42 = vmax.f32 %v320_v36, 0.0  ;;  %v3178_v33 = vld [vmem:[%s4291_s3 + $0x1c0] sm:$0xff]  }
  0x26   : > { %1508 = vmatmul.mubr.bf16.vlgmr.msra.gmra.mrb[0].mxu0 %v3222_v63  ;;  %460 = vst [vmem:[#allocation2 + $0x151] sm:$0xff] %v373_v16  ;;  %v882_v28 = vpack.c.bf16 %v374_v19, %v373_v16  ;;  %v321_v63 = vadd.f32 %v3318_v18, %v282_v59  ;;  %v3176_v16 = vld [vmem:[%s4291_s3 + $0xf8] sm:$0xff]   ;;  %v3500_v35 = vadd.f32 %v3318_v18, %v286_v29  ;;  %v251_v59 = vld [vmem:[%s3300_s16 + $0x70] sm:$0xff] }
  0x27   : > { %2820 = vmatpush3.bf16.msra.mxu0 %v3159_v46  ;;  %1515 = vmatprep.mubr.bf16.mxu0 %v3366_v55  ;;  %438 = vst [vmem:[#allocation2 + $0x49] sm:$0xff] %v351_v39  ;;  %v376_v46 = vmax.f32 %v344_v41, 0.0  ;;  %439 = vst [vmem:[#allocation2 + $0x51] sm:$0xff] %v352_v42  ;;  %v3435_v51 = vpack.c.bf16 %v352_v42, %v351_v39  ;;  %v249_v41 = vld [vmem:[%s3300_s16 + $0x60] sm:$0xff]  ;;  %v250_v42 = vld [vmem:[%s3300_s16 + $0x68] sm:$0xff] }
  0x28   : > { %v490_v52 = vld [vmem:[#allocation2 + $0x120] sm:$0xff]  ;;  %v491_v53 = vld [vmem:[#allocation2 + $0x128] sm:$0xff]  ;;  %2821 = vmatprep.subr.bf16.mxu0 %v3165_v56  ;;  %v357_v39 = vmax.f32 %v3500_v35, 0.0  ;;  %v3191_v29 = vld [vmem:[%s4291_s3 + $0x130] sm:$0xff]  }
  0x29   : > { %v863_v54 = vpack.c.bf16 %v491_v53, %v490_v52  ;;  %v468_v12 = vld [vmem:[#allocation2 + $0x18] sm:$0xff]  ;;  %v469_v13 = vld [vmem:[#allocation2 + $0x20] sm:$0xff]  ;;  %463 = vst [vmem:[#allocation2 + $0x171] sm:$0xff] %v376_v46 }
  0x2a   : > { %v3400_v21 = vpack.c.bf16 %v469_v13, %v468_v12  ;;  %v492_v22 = vld [vmem:[#allocation2 + $0x138] sm:$0xff]  ;;  %v493_v23 = vld [vmem:[#allocation2 + $0x140] sm:$0xff]  ;;  %v3174_v12 = vld [vmem:[%s4291_s3 + $0xb0] sm:$0xff]   ;;  %444 = vst [vmem:[#allocation2 + $0x91] sm:$0xff] %v357_v39 }
  0x2b   : > { %1604 = vmatmul.mubr.bf16.vlgmr.msra.gmra.mrb[0].mxu1 %v863_v54  ;;  %2822 = vmatpush3.bf16.msra.mxu0 %v3167_v4  ;;  %v3404_v26 = vpack.c.bf16 %v493_v23, %v492_v22  ;;  %v470_v47 = vld [vmem:[#allocation2 + $0x30] sm:$0xff]  ;;  %v471_v48 = vld [vmem:[#allocation2 + $0x38] sm:$0xff]  ;;  %v3170_v54 = vld [vmem:[%s4291_s3 + $0xe8] sm:$0xff]   ;;  %v353_v4 = vmax.f32 %v321_v63, 0.0 }
  0x2c   : > { %2708 = vmatpush3.bf16.msra.mxu1 %v3158_v45  ;;  %1611 = vmatprep.mubr.bf16.mxu1 %v873_v58  ;;  %v375_v45 = vmax.f32 %v343_v40, 0.0  ;;  %v3437_v52 = vpack.c.bf16 %v471_v48, %v470_v47  ;;  %v244_v58 = vld [vmem:[%s3300_s16 + $0x38] sm:$0xff]  ;;  %v3179_v48 = vld [vmem:[%s4291_s3 + $0x180] sm:$0xff]  }
  0x2d   : > { %2709 = vmatprep.subr.bf16.mxu1 %v3160_v49  ;;  %2823 = vmatprep.subr.bf16.mxu0 %v3173_v37  ;;  %v494_v49 = vld [vmem:[#allocation2 + $0x150] sm:$0xff]  ;;  %v495_v50 = vld [vmem:[#allocation2 + $0x158] sm:$0xff]  ;;  %v283_v60 = vmul.f32 %v3313_v17, %v244_v58  ;;  %440 = vst [vmem:[#allocation2 + $0x61] sm:$0xff] %v353_v4  ;;  %v3186_v58 = vld [vmem:[%s4291_s3 + $0x168] sm:$0xff]  }
  0x2e   : > { %1516 = vmatmul.mubr.bf16.gmra.mrb[4].mxu0 %v3400_v21  ;;  %462 = vst [vmem:[#allocation2 + $0x169] sm:$0xff] %v375_v45  ;;  %v3439_v53 = vpack.c.bf16 %v495_v50, %v494_v49  ;;  %v891_v56 = vpack.c.bf16 %v376_v46, %v375_v45  ;;  %v472_v1 = vld [vmem:[#allocation2 + $0x48] sm:$0xff]  ;;  %v473_v3 = vld [vmem:[#allocation2 + $0x50] sm:$0xff]  ;;  %v248_v22 = vld [vmem:[%s3300_s16 + $0x58] sm:$0xff]  ;;  %v757_v45 = vpack.c.bf16 %v531_v25, %v530_v24 }
  0x2f   : > { %1523 = vmatprep.mubr.bf16.mxu0 %v3406_v27  ;;  %2824 = vmatpush3.bf16.msra.mxu0 %v3175_v43  ;;  %v3465_v7 = vpack.c.bf16 %v473_v3, %v472_v1  ;;  %v3177_v23 = vld [vmem:[%s4291_s3 + $0xb8] sm:$0xff]   ;;  %v287_v30 = vmul.f32 %v3313_v17, %v248_v22  ;;  %v289_v46 = vmul.f32 %v3313_v17, %v250_v42  ;;  %v3185_v3 = vld [vmem:[%s4291_s3 + $0x188] sm:$0xff]   ;;  %v3189_v22 = vld [vmem:[%s4291_s3 + $0x190] sm:$0xff]  }
  0x30   : > { %2710 = vmatpush3.bf16.msra.mxu1 %v3161_v0  ;;  %v322_v0 = vadd.f32 %v3318_v18, %v283_v60  ;;  %2825 = vmatprep.subr.bf16.mxu0 %v3180_v2  ;;  %v532_v50 = vld [vmem:[#allocation2 + $0x1a] sm:$0xff]  ;;  %v290_v1 = vmul.f32 %v3313_v17, %v251_v59  ;;  %v3190_v25 = vld [vmem:[%s4291_s3 + $0x170] sm:$0xff]  }
  0x31   : > { %2711 = vmatprep.subr.bf16.mxu1 %v3162_v6  ;;  %v3181_v6 = vld [vmem:[%s4291_s3 + $0x118] sm:$0xff]   ;;  %v326_v36 = vadd.f32 %v3318_v18, %v287_v30  ;;  %v3526_v57 = vadd.f32 %v3318_v18, %v289_v46  ;;  %v255_v30 = vld [vmem:[%s3300_s16 + $0x90] sm:$0xff] }
  0x32   : > { %v354_v5 = vmax.f32 %v322_v0, 0.0  ;;  %v252_v60 = vld [vmem:[%s3300_s16 + $0x78] sm:$0xff]  ;;  %v3187_v0 = vld [vmem:[%s4291_s3 + $0x128] sm:$0xff]   ;;  %v294_v35 = vmul.f32 %v3313_v17, %v255_v30 }
  0x33   : > { %1612 = vmatmul.mubr.bf16.gmra.mrb[4].mxu1 %v3404_v26  ;;  %2826 = vmatpush3.bf16.msra.mxu0 %v3181_v6  ;;  %v358_v40 = vmax.f32 %v326_v36, 0.0  ;;  %v360_v63 = vmax.f32 %v3526_v57, 0.0  ;;  %v291_v2 = vmul.f32 %v3313_v17, %v252_v60  ;;  %v3192_v42 = vld [vmem:[%s4291_s3 + $0x1d8] sm:$0xff]   ;;  %v536_v60 = vld [vmem:[#allocation2 + $0x4a] sm:$0xff] }
  0x34   : > { %2712 = vmatpush3.bf16.msra.mxu1 %v3163_v10  ;;  %1619 = vmatprep.mubr.bf16.mxu1 %v882_v28  ;;  %v245_v10 = vld [vmem:[%s3300_s16 + $0x40] sm:$0xff]  ;;  %441 = vst [vmem:[#allocation2 + $0x69] sm:$0xff] %v354_v5  ;;  %v3473_v13 = vpack.c.bf16 %v354_v5, %v353_v4  ;;  %v3551_v5 = vadd.f32 %v3318_v18, %v290_v1  ;;  %v3194_v46 = vld [vmem:[%s4291_s3 + $0x178] sm:$0xff]  }
  0x35   : > { %2713 = vmatprep.subr.bf16.mxu1 %v3164_v14  ;;  %v496_v8 = vld [vmem:[#allocation2 + $0x168] sm:$0xff]  ;;  %v497_v9 = vld [vmem:[#allocation2 + $0x170] sm:$0xff]  ;;  %v284_v15 = vmul.f32 %v3313_v17, %v245_v10  ;;  %v474_v43 = vld [vmem:[#allocation2 + $0x60] sm:$0xff]  ;;  %445 = vst [vmem:[#allocation2 + $0x99] sm:$0xff] %v358_v40  ;;  %v3554_v6 = vadd.f32 %v3318_v18, %v291_v2  ;;  %v3568_v20 = vpack.c.bf16 %v358_v40, %v357_v39 }
  0x36   : > { %1524 = vmatmul.mubr.bf16.gmra.mrb[8].mxu0 %v3437_v52  ;;  %v3468_v11 = vpack.c.bf16 %v497_v9, %v496_v8  ;;  %v246_v14 = vld [vmem:[%s3300_s16 + $0x48] sm:$0xff]  ;;  %447 = vst [vmem:[#allocation2 + $0xb1] sm:$0xff] %v360_v63  ;;  %v3188_v8 = vld [vmem:[%s4291_s3 + $0x1d0] sm:$0xff]   ;;  %v253_v10 = vld [vmem:[%s3300_s16 + $0x80] sm:$0xff]  ;;  %v3603_v40 = vadd.f32 %v3318_v18, %v294_v35 }
  0x37   : > { %1531 = vmatprep.mubr.bf16.mxu0 %v3435_v51  ;;  %v285_v19 = vmul.f32 %v3313_v17, %v246_v14  ;;  %v323_v28 = vadd.f32 %v3318_v18, %v284_v15  ;;  %v361_v15 = vmax.f32 %v3551_v5, 0.0  ;;  %v3658_v2 = vld [vmem:[%s4291_s3 + $0x200] sm:$0xff]  }
  0x38   : > { %2714 = vmatpush3.bf16.msra.mxu1 %v3166_v32  ;;  %v3182_v32 = vld [vmem:[%s4291_s3 + $0x160] sm:$0xff]  }
  0x39   : > { %2715 = vmatprep.subr.bf16.mxu1 %v3168_v38  ;;  %v324_v31 = vadd.f32 %v3318_v18, %v285_v19  ;;  %v355_v34 = vmax.f32 %v323_v28, 0.0  ;;  %v3184_v38 = vld [vmem:[%s4291_s3 + $0x120] sm:$0xff]   ;;  %2827 = vmatprep.subr.bf16.mxu0 %v3182_v32  ;;  %v292_v19 = vmul.f32 %v3313_v17, %v253_v10  ;;  %448 = vst [vmem:[#allocation2 + $0xc1] sm:$0xff] %v361_v15  ;;  %v534_v32 = vld [vmem:[#allocation2 + $0x32] sm:$0xff] }
  0x3a   : > { %2828 = vmatpush3.bf16.msra.mxu0 %v3184_v38 }
  0x3b   : > { %1620 = vmatmul.mubr.bf16.gmra.mrb[8].mxu1 %v3439_v53  ;;  %v356_v37 = vmax.f32 %v324_v31, 0.0  ;;  %442 = vst [vmem:[#allocation2 + $0x79] sm:$0xff] %v355_v34  ;;  %2829 = vmatprep.subr.bf16.mxu0 %v3186_v58  ;;  %v3579_v24 = vadd.f32 %v3318_v18, %v292_v19  ;;  %v256_v31 = vld [vmem:[%s3300_s16 + $0x98] sm:$0xff]  ;;  %v258_v58 = vld [vmem:[%s3300_s16 + $0xa8] sm:$0xff] }
  0x3c   : > { %2716 = vmatpush3.bf16.msra.mxu1 %v3169_v44  ;;  %1627 = vmatprep.mubr.bf16.mxu1 %v891_v56  ;;  %v475_v44 = vld [vmem:[#allocation2 + $0x68] sm:$0xff]  ;;  %v295_v36 = vmul.f32 %v3313_v17, %v256_v31  ;;  %v479_v38 = vld [vmem:[#allocation2 + $0x98] sm:$0xff]  ;;  %v297_v57 = vmul.f32 %v3313_v17, %v258_v58  ;;  %v3204_v31 = vld [vmem:[%s4291_s3 + $0x1b0] sm:$0xff]  }
  0x3d   : > { %2717 = vmatprep.subr.bf16.mxu1 %v3170_v54  ;;  %443 = vst [vmem:[#allocation2 + $0x81] sm:$0xff] %v356_v37  ;;  %v3512_v47 = vpack.c.bf16 %v475_v44, %v474_v43  ;;  %v3517_v49 = vpack.c.bf16 %v356_v37, %v355_v34  ;;  %v3183_v54 = vld [vmem:[%s4291_s3 + $0x1c8] sm:$0xff]   ;;  %v363_v34 = vmax.f32 %v3579_v24, 0.0  ;;  %v478_v37 = vld [vmem:[#allocation2 + $0x90] sm:$0xff]  ;;  %v3205_v24 = vld [vmem:[%s4291_s3 + $0x1f8] sm:$0xff]  }
  0x3e   : > { %1532 = vmatmul.mubr.bf16.gmra.mrb[12].mxu0 %v3465_v7  ;;  %v3616_v43 = vpack.c.bf16 %v479_v38, %v478_v37  ;;  %v3653_v1 = vadd.f32 %v3318_v18, %v297_v57  ;;  %v3199_v19 = vld [vmem:[%s4291_s3 + $0x1e8] sm:$0xff]   ;;  %v268_v37 = vld [vmem:[%s3300_s16 + $0xf8] sm:$0xff] }
  0x3f   : > { %1539 = vmatprep.mubr.bf16.mxu0 %v3473_v13  ;;  %2830 = vmatpush3.bf16.msra.mxu0 %v3187_v0  ;;  %450 = vst [vmem:[#allocation2 + $0xd9] sm:$0xff] %v363_v34  ;;  %v538_v5 = vld [vmem:[#allocation2 + $0x62] sm:$0xff] }
  0x40   : > { %2718 = vmatpush3.bf16.msra.mxu1 %v3171_v61  ;;  %v533_v61 = vld [vmem:[#allocation2 + $0x22] sm:$0xff]  ;;  %2831 = vmatprep.subr.bf16.mxu0 %v3190_v25 }
  0x41   : > { %2719 = vmatprep.subr.bf16.mxu1 %v3172_v62 }
  0x42   : > { %v476_v4 = vld [vmem:[#allocation2 + $0x78] sm:$0xff] }
  0x43   : > { %1628 = vmatmul.mubr.bf16.gmra.mrb[12].mxu1 %v3468_v11  ;;  %2832 = vmatpush3.bf16.msra.mxu0 %v3191_v29 }
  0x44   : > { %2720 = vmatpush3.bf16.msra.mxu1 %v3174_v12  ;;  %1668 = vmatprep.mubr.bf16.mxu1 %v3400_v21  ;;  %v288_v21 = vmul.f32 %v3313_v17, %v249_v41  ;;  %v477_v9 = vld [vmem:[#allocation2 + $0x80] sm:$0xff]  ;;  %v254_v12 = vld [vmem:[%s3300_s16 + $0x88] sm:$0xff]  ;;  %v3606_v41 = vadd.f32 %v3318_v18, %v295_v36  ;;  %v267_v36 = vld [vmem:[%s3300_s16 + $0xf0] sm:$0xff] }
  0x45   : > { %2721 = vmatprep.subr.bf16.mxu1 %v3176_v16  ;;  %v3563_v14 = vpack.c.bf16 %v477_v9, %v476_v4  ;;  %v362_v16 = vmax.f32 %v3554_v6, 0.0  ;;  %2833 = vmatprep.subr.bf16.mxu0 %v3194_v46  ;;  %v368_v4 = vmax.f32 %v3653_v1, 0.0  ;;  %v3201_v6 = vld [vmem:[%s4291_s3 + $0x1a8] sm:$0xff]   ;;  %v306_v38 = vmul.f32 %v3313_v17, %v267_v36 }
  0x46   : > { %v3523_v56 = vadd.f32 %v3318_v18, %v288_v21  ;;  %1540 = vmatmul.mubr.bf16.gmra.mrb[16].mxu0 %v3512_v47  ;;  %v366_v21 = vmax.f32 %v3606_v41, 0.0  ;;  %v541_v35 = vld [vmem:[#allocation2 + $0x82] sm:$0xff]  ;;  %v543_v41 = vld [vmem:[#allocation2 + $0x9a] sm:$0xff] }
  0x47   : > { %1547 = vmatprep.mubr.bf16.mxu0 %v3517_v49  ;;  %449 = vst [vmem:[#allocation2 + $0xc9] sm:$0xff] %v362_v16  ;;  %455 = vst [vmem:[#allocation2 + $0x111] sm:$0xff] %v368_v4 }
  0x48   : > { %2722 = vmatpush3.bf16.msra.mxu1 %v3177_v23  ;;  %v359_v62 = vmax.f32 %v3523_v56, 0.0  ;;  %v293_v23 = vmul.f32 %v3313_v17, %v254_v12  ;;  %453 = vst [vmem:[#allocation2 + $0xf9] sm:$0xff] %v366_v21  ;;  %v3674_v12 = vpack.c.bf16 %v362_v16, %v361_v15  ;;  %v482_v15 = vld [vmem:[#allocation2 + $0xc0] sm:$0xff] }
  0x49   : > { %2931 = vmatprep.subr.bf16.mxu1 %v3178_v33  ;;  %v535_v33 = vld [vmem:[#allocation2 + $0x3a] sm:$0xff] }
  0x4a   : > { %446 = vst [vmem:[#allocation2 + $0xa9] sm:$0xff] %v359_v62  ;;  %v3585_v28 = vadd.f32 %v3318_v18, %v293_v23  ;;  %v3618_v44 = vpack.c.bf16 %v535_v33, %v534_v32  ;;  %v3202_v23 = vld [vmem:[%s4291_s3 + $0x1f0] sm:$0xff]   ;;  %v484_v32 = vld [vmem:[#allocation2 + $0xd8] sm:$0xff] }
  0x4b   : > { %1669 = vmatmul.mubr.bf16.vlgmr.msra.gmra.mrb[16].mxu1 %v757_v45  ;;  %v365_v45 = vmax.f32 %v3603_v40, 0.0  ;;  %v540_v33 = vld [vmem:[#allocation2 + $0x7a] sm:$0xff] }
  0x4c   : > { %2932 = vmatpush3.bf16.msra.mxu1 %v3179_v48  ;;  %1676 = vmatprep.mubr.bf16.mxu1 %v3437_v52  ;;  %v3559_v52 = vpack.c.bf16 %v533_v61, %v532_v50  ;;  %v364_v39 = vmax.f32 %v3585_v28, 0.0  ;;  %v3195_v48 = vld [vmem:[%s4291_s3 + $0x138] sm:$0xff]   ;;  %v3632_v50 = vpack.c.bf16 %v360_v63, %v359_v62  ;;  %v3196_v62 = vld [vmem:[%s4291_s3 + $0x1e0] sm:$0xff]  }
  0x4d   : > { %2933 = vmatprep.subr.bf16.mxu1 %v3183_v54  ;;  %452 = vst [vmem:[#allocation2 + $0xf1] sm:$0xff] %v365_v45  ;;  %v257_v54 = vld [vmem:[%s3300_s16 + $0xa0] sm:$0xff]  ;;  %v537_v61 = vld [vmem:[#allocation2 + $0x52] sm:$0xff]  ;;  %2834 = vmatpush3.bf16.msra.mxu0 %v3195_v48  ;;  %v3728_v46 = vpack.c.bf16 %v366_v21, %v365_v45  ;;  %v345_v48 = vadd.f32 %v3318_v18, %v306_v38 }
  0x4e   : > { %1548 = vmatmul.mubr.bf16.gmra.mrb[20].mxu0 %v3563_v14  ;;  %451 = vst [vmem:[#allocation2 + $0xe1] sm:$0xff] %v364_v39  ;;  %v296_v56 = vmul.f32 %v3313_v17, %v257_v54  ;;  %v3667_v10 = vpack.c.bf16 %v537_v61, %v536_v60  ;;  %3067 = vmatprep.subr.bf16.mxu0 %v3658_v2  ;;  %v483_v16 = vld [vmem:[#allocation2 + $0xc8] sm:$0xff] }
  0x4f   : > { %1555 = vmatprep.mubr.bf16.mxu0 %v3568_v20  ;;  %v3693_v25 = vpack.c.bf16 %v483_v16, %v482_v15  ;;  %v3701_v30 = vpack.c.bf16 %v364_v39, %v363_v34  ;;  %v3207_v34 = vld [vmem:[%s4291_s3 + $0x1b8] sm:$0xff]   ;;  %v377_v58 = vmax.f32 %v345_v48, 0.0  ;;  %v546_v1 = vld [vmem:[#allocation2 + $0xc2] sm:$0xff] }
  0x50   : > { %2934 = vmatpush3.bf16.msra.mxu1 %v3185_v3  ;;  %v3650_v0 = vadd.f32 %v3318_v18, %v296_v56  ;;  %v584_v16 = vld [vmem:[#allocation2 + $0x120] sm:$0xff] }
  0x51   : > { %2935 = vmatprep.subr.bf16.mxu1 %v3188_v8  ;;  %v480_v59 = vld [vmem:[#allocation2 + $0xa8] sm:$0xff]  ;;  %v481_v63 = vld [vmem:[#allocation2 + $0xb0] sm:$0xff]  ;;  %v3198_v8 = vld [vmem:[%s4291_s3 + $0x1a0] sm:$0xff]   ;;  %464 = vst [vmem:[#allocation2 + $0x181] sm:$0xff] %v377_v58 }
  0x52   : > { %v367_v3 = vmax.f32 %v3650_v0, 0.0  ;;  %v3665_v9 = vpack.c.bf16 %v481_v63, %v480_v59  ;;  %v542_v59 = vld [vmem:[#allocation2 + $0x92] sm:$0xff]  ;;  %v544_v61 = vld [vmem:[#allocation2 + $0xaa] sm:$0xff]  ;;  %v557_v38 = vld [vmem:[#allocation2 + $0x142] sm:$0xff] }
  0x53   : > { %1677 = vmatmul.mubr.bf16.gmra.mrb[20].mxu1 %v3559_v52  ;;  %v3738_v21 = vpack.c.bf16 %v543_v41, %v542_v59  ;;  %v559_v48 = vld [vmem:[#allocation2 + $0x15a] sm:$0xff] }
  0x54   : > { %1684 = vmatprep.mubr.bf16.mxu1 %v3465_v7  ;;  %2936 = vmatpush3.bf16.msra.mxu1 %v3189_v22  ;;  %v3193_v7 = vld [vmem:[%s4291_s3 + $0x198] sm:$0xff]   ;;  %454 = vst [vmem:[#allocation2 + $0x109] sm:$0xff] %v367_v3  ;;  %v539_v22 = vld [vmem:[#allocation2 + $0x6a] sm:$0xff] }
  0x55   : > { %2937 = vmatprep.subr.bf16.mxu1 %v3192_v42  ;;  %v3695_v29 = vpack.c.bf16 %v539_v22, %v538_v5  ;;  %v485_v28 = vld [vmem:[#allocation2 + $0xe0] sm:$0xff]  ;;  %v3721_v42 = vpack.c.bf16 %v541_v35, %v540_v33  ;;  %v487_v40 = vld [vmem:[#allocation2 + $0xf8] sm:$0xff]  ;;  %v585_v22 = vld [vmem:[#allocation2 + $0x128] sm:$0xff] }
  0x56   : > { %1556 = vmatmul.mubr.bf16.gmra.mrb[24].mxu0 %v3616_v43  ;;  %v3719_v39 = vpack.c.bf16 %v485_v28, %v484_v32  ;;  %v548_v5 = vld [vmem:[#allocation2 + $0xda] sm:$0xff]  ;;  %v3787_v32 = vpack.c.bf16 %v585_v22, %v584_v16  ;;  %v553_v33 = vld [vmem:[#allocation2 + $0x112] sm:$0xff]  ;;  %v554_v28 = vld [vmem:[#allocation2 + $0x122] sm:$0xff] }
  0x57   : > { %1563 = vmatprep.mubr.bf16.mxu0 %v3632_v50  ;;  %v3210_v35 = vld [vmem:[%s4291_s3 + $0x230] sm:$0xff]   ;;  %v619_v16 = vld [vmem:[#allocation2 + $0x141] sm:$0xff] }
  0x58   : > { %2938 = vmatpush3.bf16.msra.mxu1 %v3193_v7  ;;  %v307_v7 = vmul.f32 %v3313_v17, %v268_v37  ;;  %v486_v17 = vld [vmem:[#allocation2 + $0xf0] sm:$0xff]  ;;  %v556_v37 = vld [vmem:[#allocation2 + $0x13a] sm:$0xff] }
  0x59   : > { %2939 = vmatprep.subr.bf16.mxu1 %v3196_v62  ;;  %v3736_v45 = vpack.c.bf16 %v487_v40, %v486_v17  ;;  %v545_v62 = vld [vmem:[#allocation2 + $0xb2] sm:$0xff] }
  0x5a   : > { %v346_v54 = vadd.f32 %v3318_v18, %v307_v7  ;;  %v3744_v18 = vpack.c.bf16 %v368_v4, %v367_v3  ;;  %v547_v3 = vld [vmem:[#allocation2 + $0xca] sm:$0xff]  ;;  %v558_v7 = vld [vmem:[#allocation2 + $0x152] sm:$0xff] }
  0x5b   : > { %1685 = vmatmul.mubr.bf16.gmra.mrb[24].mxu1 %v3618_v44  ;;  %v488_v56 = vld [vmem:[#allocation2 + $0x108] sm:$0xff]  ;;  %v489_v57 = vld [vmem:[#allocation2 + $0x110] sm:$0xff]  ;;  %v3760_v4 = vpack.c.bf16 %v547_v3, %v546_v1  ;;  %v3820_v59 = vpack.c.bf16 %v559_v48, %v558_v7  ;;  %v692_v40 = vld [vmem:[#allocation2 + $0x39] sm:$0xff] }
  0x5c   : > { %1692 = vmatprep.mubr.bf16.mxu1 %v3512_v47  ;;  %2940 = vmatpush3.bf16.msra.mxu1 %v3198_v8  ;;  %v378_v60 = vmax.f32 %v346_v54, 0.0  ;;  %v3750_v63 = vpack.c.bf16 %v489_v57, %v488_v56  ;;  %v3752_v8 = vpack.c.bf16 %v545_v62, %v544_v61  ;;  %v592_v54 = vld [vmem:[#allocation2 + $0x180] sm:$0xff]  ;;  %v691_v17 = vld [vmem:[#allocation2 + $0x31] sm:$0xff]  ;;  %v693_v62 = vld [vmem:[#allocation2 + $0x49] sm:$0xff] }
  0x5d   : > { %2941 = vmatprep.subr.bf16.mxu1 %v3199_v19  ;;  %v3200_v19 = vld [vmem:[%s4291_s3 + $0x208] sm:$0xff]   ;;  %v762_v61 = vpack.c.bf16 %v692_v40, %v691_v17  ;;  %v659_v56 = vld [vmem:[#allocation2 + $0x30] sm:$0xff]  ;;  %v660_v57 = vld [vmem:[#allocation2 + $0x38] sm:$0xff] }
  0x5e   : > { %1564 = vmatmul.mubr.bf16.gmra.mrb[28].mxu0 %v3665_v9  ;;  %465 = vst [vmem:[#allocation2 + $0x189] sm:$0xff] %v378_v60  ;;  %v3754_v0 = vpack.c.bf16 %v378_v60, %v377_v58  ;;  %v560_v60 = vld [vmem:[#allocation2 + $0x16a] sm:$0xff]  ;;  %v761_v3 = vpack.c.bf16 %v660_v57, %v659_v56 }
  0x5f   : > { %1571 = vmatprep.mubr.bf16.mxu0 %v3674_v12  ;;  %v694_v1 = vld [vmem:[#allocation2 + $0x51] sm:$0xff] }
  0x60   : > { %2942 = vmatpush3.bf16.msra.mxu1 %v3201_v6  ;;  %v549_v6 = vld [vmem:[#allocation2 + $0xe2] sm:$0xff] }
  0x61   : > { %2943 = vmatprep.subr.bf16.mxu1 %v3202_v23  ;;  %v3773_v15 = vpack.c.bf16 %v549_v6, %v548_v5  ;;  %v3208_v23 = vld [vmem:[%s4291_s3 + $0x220] sm:$0xff]   ;;  %v661_v5 = vld [vmem:[#allocation2 + $0x48] sm:$0xff]  ;;  %v662_v6 = vld [vmem:[#allocation2 + $0x50] sm:$0xff] }
  0x63   : > { %1693 = vmatmul.mubr.bf16.gmra.mrb[28].mxu1 %v3667_v10 }
  0x64   : > { %1700 = vmatprep.mubr.bf16.mxu1 %v3563_v14  ;;  %2944 = vmatpush3.bf16.msra.mxu1 %v3204_v31 }
  0x65   : > { %2945 = vmatprep.subr.bf16.mxu1 %v3205_v24  ;;  %v593_v58 = vld [vmem:[#allocation2 + $0x188] sm:$0xff] }
  0x66   : > { %1572 = vmatmul.mubr.bf16.gmra.mrb[32].mxu0 %v3693_v25 }
  0x67   : > { %1579 = vmatprep.mubr.bf16.mxu0 %v3701_v30 }
  0x68   : > { %2946 = vmatpush3.bf16.msra.mxu1 %v3207_v34  ;;  %v555_v34 = vld [vmem:[#allocation2 + $0x12a] sm:$0xff] }
  0x69   : > { %v3808_v36 = vpack.c.bf16 %v555_v34, %v554_v28 }
  0x6b   : > { %1701 = vmatmul.mubr.bf16.gmra.mrb[32].mxu1 %v3695_v29 }
  0x6c   : > { %1708 = vmatprep.mubr.bf16.mxu1 %v3616_v43 }
  0x6e   : > { %1580 = vmatmul.mubr.bf16.gmra.mrb[36].mxu0 %v3719_v39 }
  0x6f   : > { %1587 = vmatprep.mubr.bf16.mxu0 %v3728_v46 }
  0x73   : > { %1709 = vmatmul.mubr.bf16.gmra.mrb[36].mxu1 %v3721_v42 }
  0x74   : > { %1716 = vmatprep.mubr.bf16.mxu1 %v3665_v9 }
  0x76   : > { %1588 = vmatmul.mubr.bf16.gmra.mrb[40].mxu0 %v3736_v45 }
  0x77   : > { %1595 = vmatprep.mubr.bf16.mxu0 %v3744_v18 }
  0x7b   : > { %1717 = vmatmul.mubr.bf16.gmra.mrb[40].mxu1 %v3738_v21 }
  0x7c   : > { %1724 = vmatprep.mubr.bf16.mxu1 %v3693_v25 }
  0x7e   : > { %1596 = vmatmul.mubr.bf16.gmra.mrb[44].mxu0 %v3750_v63 }
  0x7f   : > { %1829 = vmatprep.mubr.bf16.mxu0 %v3559_v52  ;;  %v3203_v52 = vld [vmem:[%s4291_s3 + $0x210] sm:$0xff]  }
  0x83   : > { %1725 = vmatmul.mubr.bf16.gmra.mrb[44].mxu1 %v3752_v8 }
  0x84   : > { %1732 = vmatprep.mubr.bf16.mxu1 %v3719_v39 }
  0x86   : > { %1830 = vmatmul.mubr.bf16.vlgmr.msra.gmra.mrb[48].mxu0 %v3366_v55  ;;  %v3206_v55 = vld [vmem:[%s4291_s3 + $0x218] sm:$0xff]  }
  0x87   : > { %3068 = vmatpush3.bf16.msra.mxu0 %v3658_v2  ;;  %1837 = vmatprep.mubr.bf16.mxu0 %v3618_v44  ;;  %v550_v44 = vld [vmem:[#allocation2 + $0xf2] sm:$0xff]  ;;  %v551_v2 = vld [vmem:[#allocation2 + $0xfa] sm:$0xff] }
  0x88   : > { %3069 = vmatprep.subr.bf16.mxu0 %v3200_v19  ;;  %v3785_v31 = vpack.c.bf16 %v551_v2, %v550_v44  ;;  %v617_v44 = vld [vmem:[#allocation2 + $0x129] sm:$0xff] }
  0x8b   : > { %1733 = vmatmul.mubr.bf16.gmra.mrb[48].mxu1 %v3760_v4  ;;  %3070 = vmatpush3.bf16.msra.mxu0 %v3200_v19  ;;  %v771_v19 = vpack.c.bf16 %v694_v1, %v693_v62 }
  0x8c   : > { %1740 = vmatprep.mubr.bf16.mxu1 %v3736_v45  ;;  %3071 = vmatprep.subr.bf16.mxu0 %v3203_v52 }
  0x8e   : > { %1838 = vmatmul.mubr.bf16.gmra.mrb[52].mxu0 %v3406_v27  ;;  %v3209_v27 = vld [vmem:[%s4291_s3 + $0x228] sm:$0xff]  }
  0x8f   : > { %1845 = vmatprep.mubr.bf16.mxu0 %v3667_v10  ;;  %3072 = vmatpush3.bf16.msra.mxu0 %v3203_v52  ;;  %v552_v10 = vld [vmem:[#allocation2 + $0x10a] sm:$0xff]  ;;  %v770_v52 = vpack.c.bf16 %v662_v6, %v661_v5 }
  0x90   : > { %3073 = vmatprep.subr.bf16.mxu0 %v3206_v55  ;;  %v3799_v24 = vpack.c.bf16 %v553_v33, %v552_v10 }
  0x93   : > { %1741 = vmatmul.mubr.bf16.gmra.mrb[52].mxu1 %v3773_v15  ;;  %3074 = vmatpush3.bf16.msra.mxu0 %v3206_v55  ;;  %v616_v55 = vld [vmem:[#allocation2 + $0x121] sm:$0xff] }
  0x94   : > { %1748 = vmatprep.mubr.bf16.mxu1 %v3750_v63  ;;  %3075 = vmatprep.subr.bf16.mxu0 %v3208_v23  ;;  %v3842_v2 = vpack.c.bf16 %v617_v44, %v616_v55 }
  0x96   : > { %1846 = vmatmul.mubr.bf16.gmra.mrb[56].mxu0 %v3435_v51  ;;  %v3211_v51 = vld [vmem:[%s4291_s3 + $0x238] sm:$0xff]  }
  0x97   : > { %1853 = vmatprep.mubr.bf16.mxu0 %v3695_v29  ;;  %3076 = vmatpush3.bf16.msra.mxu0 %v3208_v23 }
  0x98   : > { %3077 = vmatprep.subr.bf16.mxu0 %v3209_v27 }
  0x9b   : > { %1749 = vmatmul.mubr.bf16.gmra.mrb[56].mxu1 %v3785_v31  ;;  %3078 = vmatpush3.bf16.msra.mxu0 %v3209_v27  ;;  %v656_v27 = vld [vmem:[#allocation2 + $0x182] sm:$0xff] }
  0x9c   : > { %1756 = vmatprep.mubr.bf16.mxu1 %v3787_v32  ;;  %3079 = vmatprep.subr.bf16.mxu0 %v3210_v35 }
  0x9e   : > { %1854 = vmatmul.mubr.bf16.gmra.mrb[60].mxu0 %v3473_v13 }
  0x9f   : > { %1861 = vmatprep.mubr.bf16.mxu0 %v3721_v42  ;;  %3080 = vmatpush3.bf16.msra.mxu0 %v3210_v35 }
  0xa0   : > { %3081 = vmatprep.subr.bf16.mxu0 %v3211_v51 }
  0xa3   : > { %1757 = vmatmul.mubr.bf16.gmra.mrb[60].mxu1 %v3799_v24  ;;  %3082 = vmatpush3.bf16.msra.mxu0 %v3211_v51 }
  0xa4   : > { %1764 = vmatprep.mubr.bf16.mxu1 %v3404_v26  ;;  %v3814_v26 = vpack.c.bf16 %v557_v38, %v556_v37 }
  0xa6   : > { %1862 = vmatmul.mubr.bf16.gmra.mrb[64].mxu0 %v3517_v49 }
  0xa7   : > { %1869 = vmatprep.mubr.bf16.mxu0 %v3738_v21 }
  0xab   : > { %1765 = vmatmul.mubr.bf16.gmra.mrb[64].mxu1 %v3808_v36 }
  0xac   : > { %1772 = vmatprep.mubr.bf16.mxu1 %v3439_v53  ;;  %v3822_v53 = vpack.c.bf16 %v593_v58, %v592_v54 }
  0xae   : > { %1870 = vmatmul.mubr.bf16.gmra.mrb[68].mxu0 %v3568_v20 }
  0xaf   : > { %1877 = vmatprep.mubr.bf16.mxu0 %v3752_v8 }
  0xb3   : > { %1773 = vmatmul.mubr.bf16.gmra.mrb[68].mxu1 %v3814_v26 }
  0xb4   : > { %1780 = vmatprep.mubr.bf16.mxu1 %v3468_v11  ;;  %v561_v11 = vld [vmem:[#allocation2 + $0x172] sm:$0xff] }
  0xb5   : > { %v3828_v41 = vpack.c.bf16 %v561_v11, %v560_v60  ;;  %v726_v11 = vld [vmem:[#allocation2 + $0x52] sm:$0xff] }
  0xb6   : > { %1878 = vmatmul.mubr.bf16.gmra.mrb[72].mxu0 %v3632_v50 }
  0xb7   : > { %1885 = vmatprep.mubr.bf16.mxu0 %v3760_v4 }
  0xbb   : > { %1781 = vmatmul.mubr.bf16.gmra.mrb[72].mxu1 %v3820_v59 }
  0xbc   : > { %1788 = vmatprep.mubr.bf16.mxu1 %v3822_v53 }
  0xbe   : > { %1886 = vmatmul.mubr.bf16.gmra.mrb[76].mxu0 %v3674_v12 }
  0xbf   : > { %1893 = vmatprep.mubr.bf16.mxu0 %v3773_v15 }
  0xc3   : > { %1789 = vmatmul.mubr.bf16.gmra.mrb[76].mxu1 %v3828_v41 }
  0xc4   : > { %1990 = vmatprep.mubr.bf16.mxu1 %v762_v61 }
  0xc6   : > { %1894 = vmatmul.mubr.bf16.gmra.mrb[80].mxu0 %v3701_v30 }
  0xc7   : > { %1901 = vmatprep.mubr.bf16.mxu0 %v3785_v31 }
  0xcb   : > { %1991 = vmatmul.mubr.bf16.vlgmr.msra.gmra.mrb[80].mxu1 %v761_v3 }
  0xcc   : > { %1998 = vmatprep.mubr.bf16.mxu1 %v771_v19 }
  0xce   : > { %1902 = vmatmul.mubr.bf16.gmra.mrb[84].mxu0 %v3728_v46 }
  0xcf   : > { %1909 = vmatprep.mubr.bf16.mxu0 %v3799_v24 }
  0xd3   : > { %1999 = vmatmul.mubr.bf16.gmra.mrb[84].mxu1 %v770_v52 }
  0xd4   : > { %2006 = vmatprep.mubr.bf16.mxu1 %v3473_v13  ;;  %v618_v13 = vld [vmem:[#allocation2 + $0x139] sm:$0xff] }
  0xd5   : > { %v3848_v22 = vpack.c.bf16 %v619_v16, %v618_v13 }
  0xd6   : > { %1910 = vmatmul.mubr.bf16.gmra.mrb[88].mxu0 %v3744_v18 }
  0xd7   : > { %1917 = vmatprep.mubr.bf16.mxu0 %v3808_v36 }
  0xdb   : > { %2007 = vmatmul.mubr.bf16.gmra.mrb[88].mxu1 %v3512_v47  ;;  %v620_v47 = vld [vmem:[#allocation2 + $0x151] sm:$0xff] }
  0xdc   : > { %2014 = vmatprep.mubr.bf16.mxu1 %v3517_v49  ;;  %v621_v49 = vld [vmem:[#allocation2 + $0x159] sm:$0xff] }
  0xdd   : > { %v3854_v23 = vpack.c.bf16 %v621_v49, %v620_v47 }
  0xde   : > { %1918 = vmatmul.mubr.bf16.gmra.mrb[92].mxu0 %v3842_v2 }
  0xdf   : > { %1925 = vmatprep.mubr.bf16.mxu0 %v3814_v26 }
  0xe3   : > { %2015 = vmatmul.mubr.bf16.gmra.mrb[92].mxu1 %v3563_v14  ;;  %v622_v14 = vld [vmem:[#allocation2 + $0x169] sm:$0xff] }
  0xe4   : > { %2022 = vmatprep.mubr.bf16.mxu1 %v3568_v20  ;;  %v623_v20 = vld [vmem:[#allocation2 + $0x171] sm:$0xff] }
  0xe5   : > { %v3860_v10 = vpack.c.bf16 %v623_v20, %v622_v14 }
  0xe6   : > { %1926 = vmatmul.mubr.bf16.gmra.mrb[96].mxu0 %v3848_v22 }
  0xe7   : > { %1933 = vmatprep.mubr.bf16.mxu0 %v3820_v59 }
  0xeb   : > { %2023 = vmatmul.mubr.bf16.gmra.mrb[96].mxu1 %v3616_v43  ;;  %v657_v43 = vld [vmem:[#allocation2 + $0x18a] sm:$0xff] }
  0xec   : > { %2030 = vmatprep.mubr.bf16.mxu1 %v3632_v50  ;;  %v3862_v33 = vpack.c.bf16 %v657_v43, %v656_v27  ;;  %v723_v50 = vld [vmem:[#allocation2 + $0x32] sm:$0xff] }
  0xee   : > { %1934 = vmatmul.mubr.bf16.gmra.mrb[100].mxu0 %v3854_v23 }
  0xef   : > { %1941 = vmatprep.mubr.bf16.mxu0 %v3828_v41 }
  0xf3   : > { %2031 = vmatmul.mubr.bf16.gmra.mrb[100].mxu1 %v3665_v9  ;;  %v724_v9 = vld [vmem:[#allocation2 + $0x3a] sm:$0xff] }
  0xf4   : > { %2038 = vmatprep.mubr.bf16.mxu1 %v3674_v12  ;;  %v763_v48 = vpack.c.bf16 %v724_v9, %v723_v50 }
  0xf6   : > { %1942 = vmatmul.mubr.bf16.gmra.mrb[104].mxu0 %v3860_v10 }
  0xf7   : > { %1949 = vmatprep.mubr.bf16.mxu0 %v3862_v33 }
  0xf9   : > { %v2611_v35 = vpop.f32.mrb[0].mxu0 }
  0xfa   : > { %v2612_v51 = vpop.f32.mrb[1].mxu0 }
  0xfb   : > { %2039 = vmatmul.mubr.bf16.gmra.mrb[104].mxu1 %v3693_v25  ;;  %v3868_v34 = vadd.f32 %v2612_v51, %v2611_v35  ;;  %v2614_v38 = vpop.f32.mrb[2].mxu0 }
  0xfc   : > { %2046 = vmatprep.mubr.bf16.mxu1 %v3701_v30  ;;  %v2615_v54 = vpop.f32.mrb[3].mxu0  ;;  %v725_v30 = vld [vmem:[#allocation2 + $0x4a] sm:$0xff] }
  0xfd   : > { %v3872_v25 = vadd.f32 %v2615_v54, %v2614_v38  ;;  %v772_v57 = vpack.c.bf16 %v726_v11, %v725_v30 }
  0xfe   : > { %v2683_v12 = vpop.f32.mrb[0].mxu1  ;;  %1950 = vmatmul.mubr.bf16.gmra.mrb[108].mxu0 %v3754_v0 }
  0xff   : > { %v2684_v28 = vpop.f32.mrb[1].mxu1  ;;  %3083 = vmatprep.mubr.bf16.mxu0 %v763_v48 }
 0x100   : > { %v3870_v37 = vadd.f32 %v2684_v28, %v2683_v12  ;;  %v2686_v7 = vpop.f32.mrb[2].mxu1 }
 0x101   : > { %v2687_v58 = vpop.f32.mrb[3].mxu1  ;;  %v2617_v17 = vpop.f32.mrb[4].mxu0 }
 0x102   : > { %v3874_v60 = vadd.f32 %v2687_v58, %v2686_v7  ;;  %v2618_v61 = vpop.f32.mrb[5].mxu0 }
 0x103   : > { %2047 = vmatmul.mubr.bf16.gmra.mrb[108].mxu1 %v3719_v39  ;;  %v3879_v62 = vadd.f32 %v2618_v61, %v2617_v17  ;;  %v2620_v3 = vpop.f32.mrb[6].mxu0 }
 0x104   : > { %2054 = vmatprep.mubr.bf16.mxu1 %v3728_v46  ;;  %v2621_v5 = vpop.f32.mrb[7].mxu0 }
 0x105   : > { %v3883_v52 = vadd.f32 %v2621_v5, %v2620_v3  ;;  %v684_v5 = vld [vmem:[#allocation2 + $0x158] sm:$0xff] }
 0x106   : > { %v2689_v40 = vpop.f32.mrb[4].mxu1  ;;  %3084 = vmatmul.mubr.bf16.vlgmr.msra.gmra.mrb[112].mxu0 %v772_v57 }
 0x107   : > { %v2690_v56 = vpop.f32.mrb[5].mxu1  ;;  %3087 = vmatprep.mubr.bf16.mxu0 %v3695_v29 }
 0x108   : > { %v3881_v1 = vadd.f32 %v2690_v56, %v2689_v40  ;;  %v2692_v19 = vpop.f32.mrb[6].mxu1 }
 0x109   : > { %v2693_v6 = vpop.f32.mrb[7].mxu1  ;;  %v2623_v46 = vpop.f32.mrb[8].mxu0 }
 0x10a   : > { %v3885_v39 = vadd.f32 %v2693_v6, %v2692_v19  ;;  %v2624_v44 = vpop.f32.mrb[9].mxu0  ;;  %v683_v19 = vld [vmem:[#allocation2 + $0x150] sm:$0xff] }
 0x10b   : > { %2055 = vmatmul.mubr.bf16.gmra.mrb[112].mxu1 %v3736_v45  ;;  %v3890_v16 = vadd.f32 %v2624_v44, %v2623_v46  ;;  %v2626_v49 = vpop.f32.mrb[10].mxu0  ;;  %v869_v44 = vpack.c.bf16 %v684_v5, %v683_v19 }
 0x10c   : > { %2062 = vmatprep.mubr.bf16.mxu1 %v3744_v18  ;;  %v2627_v20 = vpop.f32.mrb[11].mxu0 }
 0x10d   : > { %v3894_v43 = vadd.f32 %v2627_v20, %v2626_v49 }
 0x10e   : > { %v2695_v55 = vpop.f32.mrb[8].mxu1  ;;  %3088 = vmatmul.mubr.bf16.gmra.mrb[116].mxu0 %v3721_v42  ;;  %v681_v42 = vld [vmem:[#allocation2 + $0x138] sm:$0xff] }
 0x10f   : > { %v2696_v13 = vpop.f32.mrb[9].mxu1  ;;  %3091 = vmatprep.mubr.bf16.mxu0 %v3738_v21  ;;  %v682_v21 = vld [vmem:[#allocation2 + $0x140] sm:$0xff] }
 0x110   : > { %v3892_v47 = vadd.f32 %v2696_v13, %v2695_v55  ;;  %v2698_v14 = vpop.f32.mrb[10].mxu1  ;;  %v860_v11 = vpack.c.bf16 %v682_v21, %v681_v42 }
 0x111   : > { %v2699_v27 = vpop.f32.mrb[11].mxu1  ;;  %v2629_v29 = vpop.f32.mrb[12].mxu0 }
 0x112   : > { %v3896_v45 = vadd.f32 %v2699_v27, %v2698_v14  ;;  %v2630_v50 = vpop.f32.mrb[13].mxu0 }
 0x113   : > { %2063 = vmatmul.mubr.bf16.gmra.mrb[116].mxu1 %v3750_v63  ;;  %v3902_v35 = vadd.f32 %v2630_v50, %v2629_v29  ;;  %v2632_v51 = vpop.f32.mrb[14].mxu0  ;;  %v686_v50 = vld [vmem:[#allocation2 + $0x170] sm:$0xff] }
 0x114   : > { %2070 = vmatprep.mubr.bf16.mxu1 %v3842_v2  ;;  %v2633_v38 = vpop.f32.mrb[15].mxu0 }
 0x115   : > { %v3906_v48 = vadd.f32 %v2633_v38, %v2632_v51 }
 0x116   : > { %v2701_v18 = vpop.f32.mrb[12].mxu1  ;;  %3092 = vmatmul.mubr.bf16.gmra.mrb[120].mxu0 %v3752_v8 }
 0x117   : > { %v2702_v9 = vpop.f32.mrb[13].mxu1  ;;  %3095 = vmatprep.mubr.bf16.mxu0 %v3760_v4 }
 0x118   : > { %v3904_v12 = vadd.f32 %v2702_v9, %v2701_v18  ;;  %v2704_v28 = vpop.f32.mrb[14].mxu1  ;;  %v685_v18 = vld [vmem:[#allocation2 + $0x168] sm:$0xff] }
 0x119   : > { %v2705_v7 = vpop.f32.mrb[15].mxu1  ;;  %v2635_v2 = vpop.f32.mrb[16].mxu0  ;;  %v878_v38 = vpack.c.bf16 %v686_v50, %v685_v18 }
 0x11a   : > { %v3908_v63 = vadd.f32 %v2705_v7, %v2704_v28  ;;  %v2636_v58 = vpop.f32.mrb[17].mxu0 }
 0x11b   : > { %2071 = vmatmul.mubr.bf16.gmra.mrb[120].mxu1 %v3787_v32  ;;  %v3914_v17 = vadd.f32 %v2636_v58, %v2635_v2  ;;  %v2638_v61 = vpop.f32.mrb[18].mxu0 }
 0x11c   : > { %2078 = vmatprep.mubr.bf16.mxu1 %v3848_v22  ;;  %v2639_v57 = vpop.f32.mrb[19].mxu0 }
 0x11d   : > { %v3919_v22 = vadd.f32 %v2639_v57, %v2638_v61 }
 0x11e   : > { %v2723_v54 = vpop.f32.mrb[16].mxu1  ;;  %3096 = vmatmul.mubr.bf16.gmra.mrb[124].mxu0 %v3773_v15 }
 0x11f   : > { %v2724_v30 = vpop.f32.mrb[17].mxu1  ;;  %3099 = vmatprep.mubr.bf16.mxu0 %v3785_v31 }
 0x120   : > { %v2725_v40 = vadd.f32 %v2724_v30, %v2723_v54  ;;  %v2726_v56 = vpop.f32.mrb[18].mxu1  ;;  %v721_v30 = vld [vmem:[#allocation2 + $0x199] sm:$0xff] }
 0x121   : > { %v2727_v32 = vpop.f32.mrb[19].mxu1  ;;  %v2641_v6 = vpop.f32.mrb[20].mxu0 }
 0x122   : > { %v3917_v8 = vadd.f32 %v2725_v40, %v3868_v34  ;;  %v2728_v4 = vadd.f32 %v2727_v32, %v2726_v56  ;;  %v2642_v55 = vpop.f32.mrb[21].mxu0 }
 0x123   : > { %2079 = vmatmul.mubr.bf16.gmra.mrb[124].mxu1 %v860_v11  ;;  %v3927_v13 = vadd.f32 %v2642_v55, %v2641_v6  ;;  %v2644_v14 = vpop.f32.mrb[22].mxu0  ;;  %v722_v11 = vld [vmem:[#allocation2 + $0x1a1] sm:$0xff] }
 0x124   : > { %v3923_v3 = vadd.f32 %v2728_v4, %v3872_v25  ;;  %2086 = vmatprep.mubr.bf16.mxu1 %v3854_v23  ;;  %v2645_v15 = vpop.f32.mrb[23].mxu0  ;;  %v897_v5 = vpack.c.bf16 %v722_v11, %v721_v30  ;;  %v753_v55 = vld [vmem:[#allocation2 + $0x19a] sm:$0xff] }
 0x125   : > { %v3932_v23 = vadd.f32 %v2645_v15, %v2644_v14 }
 0x126   : > { %v2729_v46 = vpop.f32.mrb[20].mxu1  ;;  %3100 = vmatmul.mubr.bf16.gmra.mrb[128].mxu0 %v3799_v24 }
 0x127   : > { %v2730_v34 = vpop.f32.mrb[21].mxu1  ;;  %3103 = vmatprep.mubr.bf16.mxu0 %v3808_v36 }
 0x128   : > { %v2731_v49 = vadd.f32 %v2730_v34, %v2729_v46  ;;  %v2732_v20 = vpop.f32.mrb[22].mxu1  ;;  %v754_v34 = vld [vmem:[#allocation2 + $0x1a2] sm:$0xff] }
 0x129   : > { %v2733_v27 = vpop.f32.mrb[23].mxu1  ;;  %v2647_v9 = vpop.f32.mrb[24].mxu0 }
 0x12a   : > { %v3930_v25 = vadd.f32 %v2731_v49, %v3879_v62  ;;  %v2734_v31 = vadd.f32 %v2733_v27, %v2732_v20  ;;  %v2648_v28 = vpop.f32.mrb[25].mxu0  ;;  %v3212_v20 = vld [vmem:[#allocation2] sm:$0xff]  ;;  %v898_v27 = vpack.c.bf16 %v754_v34, %v753_v55 }
 0x12b   : > { %2087 = vmatmul.mubr.bf16.gmra.mrb[128].mxu1 %v869_v44  ;;  %v3940_v7 = vadd.f32 %v2648_v28, %v2647_v9  ;;  %v2650_v21 = vpop.f32.mrb[26].mxu0  ;;  %v896_v15 = vpack.c.bf16 %v3212_v20, %v3212_v20 }
 0x12c   : > { %v3936_v29 = vadd.f32 %v2734_v31, %v3883_v52  ;;  %2094 = vmatprep.mubr.bf16.mxu1 %v3860_v10  ;;  %v2651_v24 = vpop.f32.mrb[27].mxu0 }
 0x12d   : > { %v3945_v10 = vadd.f32 %v2651_v24, %v2650_v21 }
 0x12e   : > { %v2735_v51 = vpop.f32.mrb[24].mxu1  ;;  %3104 = vmatmul.mubr.bf16.gmra.mrb[132].mxu0 %v3814_v26 }
 0x12f   : > { %v2736_v62 = vpop.f32.mrb[25].mxu1  ;;  %3107 = vmatprep.mubr.bf16.mxu0 %v3820_v59 }
 0x130   : > { %v2737_v42 = vadd.f32 %v2736_v62, %v2735_v51  ;;  %v2738_v2 = vpop.f32.mrb[26].mxu1 }
 0x131   : > { %v2739_v54 = vpop.f32.mrb[27].mxu1  ;;  %v2653_v40 = vpop.f32.mrb[28].mxu0 }
 0x132   : > { %v3943_v52 = vadd.f32 %v2737_v42, %v3890_v16  ;;  %v2740_v36 = vadd.f32 %v2739_v54, %v2738_v2  ;;  %v2654_v56 = vpop.f32.mrb[29].mxu0 }
 0x133   : > { %2095 = vmatmul.mubr.bf16.gmra.mrb[132].mxu1 %v878_v38  ;;  %v3953_v57 = vadd.f32 %v2654_v56, %v2653_v40  ;;  %v2656_v4 = vpop.f32.mrb[30].mxu0 }
 0x134   : > { %v3949_v58 = vadd.f32 %v2740_v36, %v3894_v43  ;;  %2102 = vmatprep.mubr.bf16.mxu1 %v3754_v0  ;;  %v2657_v26 = vpop.f32.mrb[31].mxu0 }
 0x135   : > { %v3958_v0 = vadd.f32 %v2657_v26, %v2656_v4 }
 0x136   : > { %v2741_v61 = vpop.f32.mrb[28].mxu1  ;;  %3108 = vmatmul.mubr.bf16.gmra.mrb[136].mxu0 %v3828_v41 }
 0x137   : > { %v2742_v16 = vpop.f32.mrb[29].mxu1  ;;  %3111 = vmatprep.mubr.bf16.mxu0 %v3862_v33 }
 0x138   : > { %v2743_v32 = vadd.f32 %v2742_v16, %v2741_v61  ;;  %v2744_v19 = vpop.f32.mrb[30].mxu1 }
 0x139   : > { %v2745_v6 = vpop.f32.mrb[31].mxu1  ;;  %v2659_v44 = vpop.f32.mrb[32].mxu0 }
 0x13a   : > { %v3956_v43 = vadd.f32 %v2743_v32, %v3902_v35  ;;  %v2746_v59 = vadd.f32 %v2745_v6, %v2744_v19  ;;  %v2660_v14 = vpop.f32.mrb[33].mxu0 }
 0x13b   : > { %2103 = vmatmul.mubr.bf16.gmra.mrb[136].mxu1 %v3822_v53  ;;  %v3966_v31 = vadd.f32 %v2660_v14, %v2659_v44  ;;  %v2662_v18 = vpop.f32.mrb[34].mxu0 }
 0x13c   : > { %v3963_v46 = vadd.f32 %v2746_v59, %v3906_v48  ;;  %2110 = vmatprep.mubr.bf16.mxu1 %v897_v5  ;;  %v2663_v50 = vpop.f32.mrb[35].mxu0 }
 0x13d   : > { %v2664_v33 = vadd.f32 %v2663_v50, %v2662_v18 }
 0x13e   : > { %v2747_v49 = vpop.f32.mrb[32].mxu1  ;;  %3112 = vmatmul.mubr.bf16.gmra.mrb[140].mxu0 %v898_v27 }
 0x13f   : > { %v2748_v35 = vpop.f32.mrb[33].mxu1 }
 0x140   : > { %v2749_v53 = vadd.f32 %v2748_v35, %v2747_v49  ;;  %v2750_v41 = vpop.f32.mrb[34].mxu1 }
 0x141   : > { %v2751_v48 = vpop.f32.mrb[35].mxu1  ;;  %v2665_v62 = vpop.f32.mrb[36].mxu0 }
 0x142   : > { %v3969_v9 = vadd.f32 %v2749_v53, %v3914_v17  ;;  %v2752_v51 = vadd.f32 %v2751_v48, %v2750_v41  ;;  %v2666_v42 = vpop.f32.mrb[37].mxu0 }
 0x143   : > { %2111 = vmatmul.mubr.bf16.gmra.mrb[140].mxu1 %v896_v15  ;;  %v3974_v2 = vadd.f32 %v2666_v42, %v2665_v62  ;;  %v2668_v54 = vpop.f32.mrb[38].mxu0 }
 0x144   : > { %v3972_v28 = vadd.f32 %v2752_v51, %v3919_v22  ;;  %v2669_v30 = vpop.f32.mrb[39].mxu0 }
 0x145   : > { %v2670_v40 = vadd.f32 %v2669_v30, %v2668_v54 }
 0x146   : > { %v2753_v38 = vpop.f32.mrb[36].mxu1 }
 0x147   : > { %v2754_v21 = vpop.f32.mrb[37].mxu1 }
 0x148   : > { %v2755_v24 = vadd.f32 %v2754_v21, %v2753_v38  ;;  %v2756_v36 = vpop.f32.mrb[38].mxu1 }
 0x149   : > { %v2757_v11 = vpop.f32.mrb[39].mxu1  ;;  %v2671_v22 = vpop.f32.mrb[40].mxu0 }
 0x14a   : > { %v3977_v17 = vadd.f32 %v2755_v24, %v3927_v13  ;;  %v2758_v61 = vadd.f32 %v2757_v11, %v2756_v36  ;;  %v2672_v32 = vpop.f32.mrb[41].mxu0 }
 0x14b   : > { %v3982_v19 = vadd.f32 %v2672_v32, %v2671_v22  ;;  %v2674_v26 = vpop.f32.mrb[42].mxu0 }
 0x14c   : > { %v3980_v56 = vadd.f32 %v2758_v61, %v3932_v23  ;;  %v2675_v59 = vpop.f32.mrb[43].mxu0 }
 0x14d   : > { %v3987_v13 = vadd.f32 %v2675_v59, %v2674_v26 }
 0x14e   : > { %v2759_v16 = vpop.f32.mrb[40].mxu1 }
 0x14f   : > { %v2760_v4 = vpop.f32.mrb[41].mxu1 }
 0x150   : > { %v2761_v5 = vadd.f32 %v2760_v4, %v2759_v16  ;;  %v2762_v6 = vpop.f32.mrb[42].mxu1 }
 0x151   : > { %v2763_v55 = vpop.f32.mrb[43].mxu1  ;;  %v2677_v49 = vpop.f32.mrb[44].mxu0 }
 0x152   : > { %v3985_v34 = vadd.f32 %v2761_v5, %v3940_v7  ;;  %v2764_v44 = vadd.f32 %v2763_v55, %v2762_v6  ;;  %v2678_v35 = vpop.f32.mrb[45].mxu0 }
 0x153   : > { %v3992_v15 = vadd.f32 %v2678_v35, %v2677_v49  ;;  %v2680_v53 = vpop.f32.mrb[46].mxu0 }
 0x154   : > { %v3990_v23 = vadd.f32 %v2764_v44, %v3945_v10  ;;  %v2681_v41 = vpop.f32.mrb[47].mxu0 }
 0x155   : > { %v3997_v48 = vadd.f32 %v2681_v41, %v2680_v53 }
 0x156   : > { %v2765_v14 = vpop.f32.mrb[44].mxu1 }
 0x157   : > { %v2766_v20 = vpop.f32.mrb[45].mxu1 }
 0x158   : > { %v2767_v27 = vadd.f32 %v2766_v20, %v2765_v14  ;;  %v2768_v18 = vpop.f32.mrb[46].mxu1 }
 0x159   : > { %v2769_v50 = vpop.f32.mrb[47].mxu1  ;;  %v2835_v38 = vpop.f32.mrb[48].mxu0 }
 0x15a   : > { %v3995_v7 = vadd.f32 %v2767_v27, %v3953_v57  ;;  %v2770_v51 = vadd.f32 %v2769_v50, %v2768_v18  ;;  %v2836_v21 = vpop.f32.mrb[49].mxu0 }
 0x15b   : > { %v2837_v54 = vadd.f32 %v2836_v21, %v2835_v38  ;;  %v2838_v30 = vpop.f32.mrb[50].mxu0 }
 0x15c   : > { %v4000_v10 = vadd.f32 %v2770_v51, %v3958_v0  ;;  %v2839_v61 = vpop.f32.mrb[51].mxu0 }
 0x15d   : > { %v4006_v57 = vadd.f32 %v2837_v54, %v3917_v8  ;;  %v2840_v32 = vadd.f32 %v2839_v61, %v2838_v30 }
 0x15e   : > { %v2771_v62 = vpop.f32.mrb[48].mxu1 }
 0x15f   : > { %v2772_v42 = vpop.f32.mrb[49].mxu1  ;;  %v4011_v4 = vadd.f32 %v2840_v32, %v3923_v3 }
 0x160   : > { %v2773_v24 = vadd.f32 %v2772_v42, %v2771_v62  ;;  %v2774_v36 = vpop.f32.mrb[50].mxu1 }
 0x161   : > { %v2775_v11 = vpop.f32.mrb[51].mxu1  ;;  %v2841_v26 = vpop.f32.mrb[52].mxu0 }
 0x162   : > { %v4003_v22 = vadd.f32 %v2773_v24, %v3966_v31  ;;  %v2776_v16 = vadd.f32 %v2775_v11, %v2774_v36  ;;  %v2842_v59 = vpop.f32.mrb[53].mxu0 }
 0x163   : > { %v2843_v44 = vadd.f32 %v2842_v59, %v2841_v26  ;;  %v2844_v14 = vpop.f32.mrb[54].mxu0 }
 0x164   : > { %v4008_v0 = vadd.f32 %v2776_v16, %v2664_v33  ;;  %v2845_v35 = vpop.f32.mrb[55].mxu0 }
 0x165   : > { %v4017_v20 = vadd.f32 %v2843_v44, %v3930_v25  ;;  %v2846_v27 = vadd.f32 %v2845_v35, %v2844_v14 }
 0x166   : > { %v2777_v5 = vpop.f32.mrb[52].mxu1 }
 0x167   : > { %v2778_v6 = vpop.f32.mrb[53].mxu1  ;;  %v4022_v53 = vadd.f32 %v2846_v27, %v3936_v29 }
 0x168   : > { %v2779_v55 = vadd.f32 %v2778_v6, %v2777_v5  ;;  %v2780_v49 = vpop.f32.mrb[54].mxu1 }
 0x169   : > { %v2781_v31 = vpop.f32.mrb[55].mxu1  ;;  %v2847_v41 = vpop.f32.mrb[56].mxu0 }
 0x16a   : > { %v4014_v8 = vadd.f32 %v2779_v55, %v3974_v2  ;;  %v2782_v33 = vadd.f32 %v2781_v31, %v2780_v49  ;;  %v2848_v51 = vpop.f32.mrb[57].mxu0 }
 0x16b   : > { %v2849_v38 = vadd.f32 %v2848_v51, %v2847_v41  ;;  %v2850_v21 = vpop.f32.mrb[58].mxu0 }
 0x16c   : > { %v4019_v3 = vadd.f32 %v2782_v33, %v2670_v40  ;;  %v2851_v24 = vpop.f32.mrb[59].mxu0 }
 0x16d   : > { %v4028_v54 = vadd.f32 %v2849_v38, %v3943_v52  ;;  %v2852_v36 = vadd.f32 %v2851_v24, %v2850_v21 }
 0x16e   : > { %v2783_v18 = vpop.f32.mrb[56].mxu1 }
 0x16f   : > { %v2784_v50 = vpop.f32.mrb[57].mxu1  ;;  %v4034_v30 = vadd.f32 %v2852_v36, %v3949_v58 }
 0x170   : > { %v2785_v62 = vadd.f32 %v2784_v50, %v2783_v18  ;;  %v2786_v42 = vpop.f32.mrb[58].mxu1 }
 0x171   : > { %v2787_v2 = vpop.f32.mrb[59].mxu1  ;;  %v2853_v61 = vpop.f32.mrb[60].mxu0 }
 0x172   : > { %v4025_v25 = vadd.f32 %v2785_v62, %v3982_v19  ;;  %v2788_v40 = vadd.f32 %v2787_v2, %v2786_v42  ;;  %v2854_v32 = vpop.f32.mrb[61].mxu0 }
 0x173   : > { %v2855_v26 = vadd.f32 %v2854_v32, %v2853_v61  ;;  %v2856_v19 = vpop.f32.mrb[62].mxu0 }
 0x174   : > { %v4031_v29 = vadd.f32 %v2788_v40, %v3987_v13  ;;  %v2857_v55 = vpop.f32.mrb[63].mxu0 }
 0x175   : > { %v4040_v44 = vadd.f32 %v2855_v26, %v3956_v43  ;;  %v2858_v49 = vadd.f32 %v2857_v55, %v2856_v19 }
 0x176   : > { %v2789_v11 = vpop.f32.mrb[60].mxu1 }
 0x177   : > { %v2790_v16 = vpop.f32.mrb[61].mxu1  ;;  %v4046_v14 = vadd.f32 %v2858_v49, %v3963_v46 }
 0x178   : > { %v2791_v5 = vadd.f32 %v2790_v16, %v2789_v11  ;;  %v2792_v6 = vpop.f32.mrb[62].mxu1 }
 0x179   : > { %v2793_v59 = vpop.f32.mrb[63].mxu1  ;;  %v2859_v35 = vpop.f32.mrb[64].mxu0 }
 0x17a   : > { %v4037_v52 = vadd.f32 %v2791_v5, %v3992_v15  ;;  %v2794_v13 = vadd.f32 %v2793_v59, %v2792_v6  ;;  %v2860_v27 = vpop.f32.mrb[65].mxu0 }
 0x17b   : > { %v2861_v41 = vadd.f32 %v2860_v27, %v2859_v35  ;;  %v2862_v15 = vpop.f32.mrb[66].mxu0 }
 0x17c   : > { %v4043_v58 = vadd.f32 %v2794_v13, %v3997_v48  ;;  %v2863_v62 = vpop.f32.mrb[67].mxu0 }
 0x17d   : > { %v4052_v38 = vadd.f32 %v2861_v41, %v3969_v9  ;;  %v2864_v42 = vadd.f32 %v2863_v62, %v2862_v15 }
 0x17e   : > { %v2795_v31 = vpop.f32.mrb[64].mxu1 }
 0x17f   : > { %v2796_v33 = vpop.f32.mrb[65].mxu1  ;;  %v4058_v21 = vadd.f32 %v2864_v42, %v3972_v28 }
 0x180   : > { %v2797_v18 = vadd.f32 %v2796_v33, %v2795_v31  ;;  %v2798_v50 = vpop.f32.mrb[66].mxu1 }
 0x181   : > { %v2799_v51 = vpop.f32.mrb[67].mxu1  ;;  %v2865_v24 = vpop.f32.mrb[68].mxu0 }
 0x182   : > { %v4049_v43 = vadd.f32 %v2797_v18, %v3870_v37  ;;  %v2800_v48 = vadd.f32 %v2799_v51, %v2798_v50  ;;  %v2866_v36 = vpop.f32.mrb[69].mxu0 }
 0x183   : > { %v2867_v61 = vadd.f32 %v2866_v36, %v2865_v24  ;;  %v2868_v37 = vpop.f32.mrb[70].mxu0 }
 0x184   : > { %v4055_v46 = vadd.f32 %v2800_v48, %v3874_v60  ;;  %v2869_v5 = vpop.f32.mrb[71].mxu0 }
 0x185   : > { %v4064_v26 = vadd.f32 %v2867_v61, %v3977_v17  ;;  %v2870_v6 = vadd.f32 %v2869_v5, %v2868_v37 }
 0x186   : > { %v2801_v2 = vpop.f32.mrb[68].mxu1 }
 0x187   : > { %v2802_v40 = vpop.f32.mrb[69].mxu1  ;;  %v4070_v19 = vadd.f32 %v2870_v6, %v3980_v56 }
 0x188   : > { %v2803_v11 = vadd.f32 %v2802_v40, %v2801_v2  ;;  %v2804_v16 = vpop.f32.mrb[70].mxu1 }
 0x189   : > { %v2805_v32 = vpop.f32.mrb[71].mxu1  ;;  %v2871_v55 = vpop.f32.mrb[72].mxu0 }
 0x18a   : > { %v4061_v9 = vadd.f32 %v2803_v11, %v3881_v1  ;;  %v2806_v60 = vadd.f32 %v2805_v32, %v2804_v16  ;;  %v2872_v49 = vpop.f32.mrb[73].mxu0 }
 0x18b   : > { %v2873_v35 = vadd.f32 %v2872_v49, %v2871_v55  ;;  %v2874_v1 = vpop.f32.mrb[74].mxu0 }
 0x18c   : > { %v4067_v28 = vadd.f32 %v2806_v60, %v3885_v39  ;;  %v2875_v18 = vpop.f32.mrb[75].mxu0 }
 0x18d   : > { %v4076_v41 = vadd.f32 %v2873_v35, %v3985_v34  ;;  %v2876_v50 = vadd.f32 %v2875_v18, %v2874_v1 }
 0x18e   : > { %v2807_v59 = vpop.f32.mrb[72].mxu1 }
 0x18f   : > { %v2808_v13 = vpop.f32.mrb[73].mxu1  ;;  %v4082_v15 = vadd.f32 %v2876_v50, %v3990_v23 }
 0x190   : > { %v2809_v31 = vadd.f32 %v2808_v13, %v2807_v59  ;;  %v2810_v33 = vpop.f32.mrb[74].mxu1 }
 0x191   : > { %v2811_v27 = vpop.f32.mrb[75].mxu1  ;;  %v2877_v62 = vpop.f32.mrb[76].mxu0 }
 0x192   : > { %v4073_v17 = vadd.f32 %v2809_v31, %v3892_v47  ;;  %v2812_v39 = vadd.f32 %v2811_v27, %v2810_v33  ;;  %v2878_v42 = vpop.f32.mrb[77].mxu0 }
 0x193   : > { %v2879_v24 = vadd.f32 %v2878_v42, %v2877_v62  ;;  %v2880_v47 = vpop.f32.mrb[78].mxu0 }
 0x194   : > { %v4079_v56 = vadd.f32 %v2812_v39, %v3896_v45  ;;  %v2881_v11 = vpop.f32.mrb[79].mxu0 }
 0x195   : > { %v4088_v61 = vadd.f32 %v2879_v24, %v3995_v7  ;;  %v2882_v16 = vadd.f32 %v2881_v11, %v2880_v47 }
 0x196   : > { %v2813_v51 = vpop.f32.mrb[76].mxu1 }
 0x197   : > { %v2814_v48 = vpop.f32.mrb[77].mxu1  ;;  %v4094_v37 = vadd.f32 %v2882_v16, %v4000_v10 }
 0x198   : > { %v2815_v2 = vadd.f32 %v2814_v48, %v2813_v51  ;;  %v2816_v40 = vpop.f32.mrb[78].mxu1 }
 0x199   : > { %v2817_v36 = vpop.f32.mrb[79].mxu1  ;;  %v2883_v32 = vpop.f32.mrb[80].mxu0 }
 0x19a   : > { %v4085_v34 = vadd.f32 %v2815_v2, %v3904_v12  ;;  %v2818_v45 = vadd.f32 %v2817_v36, %v2816_v40  ;;  %v2884_v60 = vpop.f32.mrb[81].mxu0 }
 0x19b   : > { %v2885_v59 = vadd.f32 %v2884_v60, %v2883_v32  ;;  %v2886_v13 = vpop.f32.mrb[82].mxu0 }
 0x19c   : > { %v4091_v23 = vadd.f32 %v2818_v45, %v3908_v63  ;;  %v2887_v49 = vpop.f32.mrb[83].mxu0 }
 0x19d   : > { %v4097_v7 = vadd.f32 %v2885_v59, %v4003_v22  ;;  %v2888_v35 = vadd.f32 %v2887_v49, %v2886_v13 }
 0x19e   : > { %v2947_v5 = vpop.f32.mrb[80].mxu1 }
 0x19f   : > { %v2948_v6 = vpop.f32.mrb[81].mxu1  ;;  %v4103_v10 = vadd.f32 %v2888_v35, %v4008_v0 }
 0x1a0   : > { %v2949_v55 = vadd.f32 %v2948_v6, %v2947_v5  ;;  %v2950_v12 = vpop.f32.mrb[82].mxu1 }
 0x1a1   : > { %v2951_v31 = vpop.f32.mrb[83].mxu1  ;;  %v2889_v27 = vpop.f32.mrb[84].mxu0 }
 0x1a2   : > { %v2952_v33 = vadd.f32 %v2951_v31, %v2950_v12  ;;  %v4100_v63 = vadd.f32 %v2949_v55, %v4006_v57  ;;  %v2890_v39 = vpop.f32.mrb[85].mxu0 }
 0x1a3   : > { %v2891_v51 = vadd.f32 %v2890_v39, %v2889_v27  ;;  %v2892_v48 = vpop.f32.mrb[86].mxu0 }
 0x1a4   : > { %v4106_v1 = vadd.f32 %v2952_v33, %v4011_v4  ;;  %v2893_v42 = vpop.f32.mrb[87].mxu0 }
 0x1a5   : > { %v4109_v24 = vadd.f32 %v2891_v51, %v4014_v8  ;;  %v2894_v57 = vadd.f32 %v2893_v42, %v2892_v48 }
 0x1a6   : > { %v2953_v18 = vpop.f32.mrb[84].mxu1 }
 0x1a7   : > { %v2954_v50 = vpop.f32.mrb[85].mxu1  ;;  %v4115_v4 = vadd.f32 %v2894_v57, %v4019_v3 }
 0x1a8   : > { %v2955_v62 = vadd.f32 %v2954_v50, %v2953_v18  ;;  %v2956_v22 = vpop.f32.mrb[86].mxu1 }
 0x1a9   : > { %v2957_v2 = vpop.f32.mrb[87].mxu1  ;;  %v2895_v36 = vpop.f32.mrb[88].mxu0 }
 0x1aa   : > { %v2958_v40 = vadd.f32 %v2957_v2, %v2956_v22  ;;  %v4112_v0 = vadd.f32 %v2955_v62, %v4017_v20  ;;  %v2896_v45 = vpop.f32.mrb[89].mxu0 }
 0x1ab   : > { %v2897_v32 = vadd.f32 %v2896_v45, %v2895_v36  ;;  %v2898_v60 = vpop.f32.mrb[90].mxu0 }
 0x1ac   : > { %v4118_v47 = vadd.f32 %v2958_v40, %v4022_v53  ;;  %v2899_v6 = vpop.f32.mrb[91].mxu0 }
 0x1ad   : > { %v4121_v55 = vadd.f32 %v2897_v32, %v4025_v25  ;;  %v2900_v20 = vadd.f32 %v2899_v6, %v2898_v60 }
 0x1ae   : > { %v2959_v11 = vpop.f32.mrb[88].mxu1 }
 0x1af   : > { %v2960_v16 = vpop.f32.mrb[89].mxu1  ;;  %v4127_v53 = vadd.f32 %v2900_v20, %v4031_v29 }
 0x1b0   : > { %v2961_v5 = vadd.f32 %v2960_v16, %v2959_v11  ;;  %v2962_v8 = vpop.f32.mrb[90].mxu1 }
 0x1b1   : > { %v2963_v59 = vpop.f32.mrb[91].mxu1  ;;  %v2901_v49 = vpop.f32.mrb[92].mxu0 }
 0x1b2   : > { %v2964_v13 = vadd.f32 %v2963_v59, %v2962_v8  ;;  %v4124_v3 = vadd.f32 %v2961_v5, %v4028_v54  ;;  %v2902_v35 = vpop.f32.mrb[93].mxu0 }
 0x1b3   : > { %v2903_v27 = vadd.f32 %v2902_v35, %v2901_v49  ;;  %v2904_v39 = vpop.f32.mrb[94].mxu0 }
 0x1b4   : > { %v4130_v12 = vadd.f32 %v2964_v13, %v4034_v30  ;;  %v2905_v50 = vpop.f32.mrb[95].mxu0 }
 0x1b5   : > { %v4133_v62 = vadd.f32 %v2903_v27, %v4037_v52  ;;  %v2906_v54 = vadd.f32 %v2905_v50, %v2904_v39 }
 0x1b6   : > { %v2965_v31 = vpop.f32.mrb[92].mxu1 }
 0x1b7   : > { %v2966_v33 = vpop.f32.mrb[93].mxu1  ;;  %v4139_v30 = vadd.f32 %v2906_v54, %v4043_v58 }
 0x1b8   : > { %v2967_v18 = vadd.f32 %v2966_v33, %v2965_v31  ;;  %v2968_v25 = vpop.f32.mrb[94].mxu1 }
 0x1b9   : > { %v2969_v51 = vpop.f32.mrb[95].mxu1  ;;  %v2907_v42 = vpop.f32.mrb[96].mxu0 }
 0x1ba   : > { %v2970_v48 = vadd.f32 %v2969_v51, %v2968_v25  ;;  %v4136_v29 = vadd.f32 %v2967_v18, %v4040_v44  ;;  %v2908_v57 = vpop.f32.mrb[97].mxu0 }
 0x1bb   : > { %v2909_v36 = vadd.f32 %v2908_v57, %v2907_v42  ;;  %v2910_v45 = vpop.f32.mrb[98].mxu0 }
 0x1bc   : > { %v4142_v22 = vadd.f32 %v2970_v48, %v4046_v14  ;;  %v2911_v16 = vpop.f32.mrb[99].mxu0 }
 0x1bd   : > { %v4145_v5 = vadd.f32 %v2909_v36, %v4049_v43  ;;  %v2912_v44 = vadd.f32 %v2911_v16, %v2910_v45 }
 0x1be   : > { %v2971_v2 = vpop.f32.mrb[96].mxu1 }
 0x1bf   : > { %v2972_v40 = vpop.f32.mrb[97].mxu1  ;;  %v4151_v14 = vadd.f32 %v2912_v44, %v4055_v46 }
 0x1c0   : > { %v2973_v11 = vadd.f32 %v2972_v40, %v2971_v2  ;;  %v2974_v52 = vpop.f32.mrb[98].mxu1 }
 0x1c1   : > { %v2975_v32 = vpop.f32.mrb[99].mxu1  ;;  %v2913_v6 = vpop.f32.mrb[100].mxu0 }
 0x1c2   : > { %v2976_v60 = vadd.f32 %v2975_v32, %v2974_v52  ;;  %v4148_v58 = vadd.f32 %v2973_v11, %v4052_v38  ;;  %v2914_v20 = vpop.f32.mrb[101].mxu0 }
 0x1c3   : > { %v2915_v49 = vadd.f32 %v2914_v20, %v2913_v6  ;;  %v2916_v35 = vpop.f32.mrb[102].mxu0 }
 0x1c4   : > { %v4154_v8 = vadd.f32 %v2976_v60, %v4058_v21  ;;  %v2917_v33 = vpop.f32.mrb[103].mxu0 }
 0x1c5   : > { %v4157_v18 = vadd.f32 %v2915_v49, %v4061_v9  ;;  %v2918_v38 = vadd.f32 %v2917_v33, %v2916_v35 }
 0x1c6   : > { %v2977_v59 = vpop.f32.mrb[100].mxu1 }
 0x1c7   : > { %v2978_v13 = vpop.f32.mrb[101].mxu1  ;;  %v4163_v21 = vadd.f32 %v2918_v38, %v4067_v28 }
 0x1c8   : > { %v2979_v31 = vadd.f32 %v2978_v13, %v2977_v59  ;;  %v2980_v43 = vpop.f32.mrb[102].mxu1 }
 0x1c9   : > { %v2981_v27 = vpop.f32.mrb[103].mxu1  ;;  %v2919_v50 = vpop.f32.mrb[104].mxu0 }
 0x1ca   : > { %v2982_v39 = vadd.f32 %v2981_v27, %v2980_v43  ;;  %v4160_v46 = vadd.f32 %v2979_v31, %v4064_v26  ;;  %v2920_v54 = vpop.f32.mrb[105].mxu0 }
 0x1cb   : > { %v2921_v42 = vadd.f32 %v2920_v54, %v2919_v50  ;;  %v2922_v57 = vpop.f32.mrb[106].mxu0 }
 0x1cc   : > { %v4166_v25 = vadd.f32 %v2982_v39, %v4070_v19  ;;  %v2923_v40 = vpop.f32.mrb[107].mxu0 }
 0x1cd   : > { %v4169_v11 = vadd.f32 %v2921_v42, %v4073_v17  ;;  %v2924_v26 = vadd.f32 %v2923_v40, %v2922_v57 }
 0x1ce   : > { %v2983_v51 = vpop.f32.mrb[104].mxu1 }
 0x1cf   : > { %v2984_v48 = vpop.f32.mrb[105].mxu1  ;;  %v4175_v19 = vadd.f32 %v2924_v26, %v4079_v56 }
 0x1d0   : > { %v2985_v2 = vadd.f32 %v2984_v48, %v2983_v51  ;;  %v2986_v9 = vpop.f32.mrb[106].mxu1 }
 0x1d1   : > { %v2987_v36 = vpop.f32.mrb[107].mxu1  ;;  %v2925_v16 = vpop.f32.mrb[108].mxu0 }
 0x1d2   : > { %v2988_v45 = vadd.f32 %v2987_v36, %v2986_v9  ;;  %v4172_v28 = vadd.f32 %v2985_v2, %v4076_v41  ;;  %v2926_v44 = vpop.f32.mrb[109].mxu0 }
 0x1d3   : > { %v2927_v6 = vadd.f32 %v2926_v44, %v2925_v16  ;;  %v2928_v17 = vpop.f32.mrb[110].mxu0 }
 0x1d4   : > { %v4178_v52 = vadd.f32 %v2988_v45, %v4082_v15  ;;  %v2929_v13 = vpop.f32.mrb[111].mxu0 }
 0x1d5   : > { %v4181_v41 = vadd.f32 %v2927_v6, %v4085_v34  ;;  %v2930_v31 = vadd.f32 %v2929_v13, %v2928_v17 }
 0x1d6   : > { %v2989_v32 = vpop.f32.mrb[108].mxu1 }
 0x1d7   : > { %v2990_v60 = vpop.f32.mrb[109].mxu1  ;;  %v4187_v15 = vadd.f32 %v2930_v31, %v4091_v23 }
 0x1d8   : > { %v2991_v59 = vadd.f32 %v2990_v60, %v2989_v32  ;;  %v2992_v20 = vpop.f32.mrb[110].mxu1 }
 0x1d9   : > { %v2993_v49 = vpop.f32.mrb[111].mxu1  ;;  %v3085_v34 = vpop.f32.mrb[112].mxu0 }
 0x1da   : > { %v2994_v56 = vadd.f32 %v2993_v49, %v2992_v20  ;;  %v4184_v35 = vadd.f32 %v2991_v59, %v4088_v61  ;;  %v2162_v61 = vadd.f32 %v3085_v34, %v4112_v0  ;;  %v2153_v23 = vpop.f32.mrb[113].mxu0 }
 0x1db   : > { %v3086_v50 = vpop.f32.mrb[114].mxu0 }
 0x1dc   : > { %v4190_v43 = vadd.f32 %v2994_v56, %v4094_v37  ;;  %v2154_v37 = vadd.f32 %v2153_v23, %v4100_v63  ;;  %2282 = vst [vmem:[%s4197_s24 + $0x10] sm:$0xff] %v2162_v61  ;;  %v2165_v51 = vadd.f32 %v3086_v50, %v4118_v47  ;;  %v2156_v48 = vpop.f32.mrb[115].mxu0  ;;  %v2351_v36 = vmul.f32 %v2162_v61, %v2162_v61 }
 0x1dd   : > { %v2157_v2 = vadd.f32 %v2156_v48, %v4106_v1 }
 0x1de   : > { %v2995_v33 = vpop.f32.mrb[112].mxu1  ;;  %2280 = vst [vmem:[%s4197_s24] sm:$0xff] %v2154_v37  ;;  %2283 = vst [vmem:[%s4197_s24 + $0x18] sm:$0xff] %v2165_v51  ;;  %v2349_v0 = vmul.f32 %v2154_v37, %v2154_v37  ;;  %v2352_v32 = vmul.f32 %v2165_v51, %v2165_v51 }
 0x1df   : > { %v2996_v27 = vpop.f32.mrb[113].mxu1  ;;  %2281 = vst [vmem:[%s4197_s24 + $0x8] sm:$0xff] %v2157_v2  ;;  %v2312_v9 = vadd.f32 %v2157_v2, %v2154_v37  ;;  %v2350_v40 = vmul.f32 %v2157_v2, %v2157_v2 }
 0x1e0   : > { %v2997_v38 = vadd.f32 %v2996_v27, %v2995_v33  ;;  %v2998_v39 = vpop.f32.mrb[114].mxu1 }
 0x1e1   : > { %v2999_v54 = vpop.f32.mrb[115].mxu1  ;;  %v2313_v47 = vadd.f32 %v2312_v9, %v2162_v61  ;;  %v2381_v26 = vadd.f32 %v2350_v40, %v2349_v0  ;;  %v3089_v16 = vpop.f32.mrb[116].mxu0 }
 0x1e2   : > { %v3000_v42 = vadd.f32 %v2999_v54, %v2998_v39  ;;  %v4206_v57 = vadd.f32 %v2997_v38, %v4097_v7  ;;  %v2178_v1 = vadd.f32 %v3089_v16, %v4136_v29  ;;  %v2169_v44 = vpop.f32.mrb[117].mxu0 }
 0x1e3   : > { %v2382_v60 = vadd.f32 %v2381_v26, %v2351_v36  ;;  %v2170_v59 = vadd.f32 %v2169_v44, %v4124_v3  ;;  %v2314_v17 = vadd.f32 %v2313_v47, %v2165_v51  ;;  %v3090_v20 = vpop.f32.mrb[118].mxu0 }
 0x1e4   : > { %v4211_v63 = vadd.f32 %v3000_v42, %v4103_v10  ;;  %2286 = vst [vmem:[%s4197_s24 + $0x30] sm:$0xff] %v2178_v1  ;;  %v2181_v13 = vadd.f32 %v3090_v20, %v4142_v22  ;;  %v2172_v31 = vpop.f32.mrb[119].mxu0  ;;  %v2355_v50 = vmul.f32 %v2178_v1, %v2178_v1 }
 0x1e5   : > { %2284 = vst [vmem:[%s4197_s24 + $0x20] sm:$0xff] %v2170_v59  ;;  %v2315_v56 = vadd.f32 %v2314_v17, %v2170_v59  ;;  %v2353_v33 = vmul.f32 %v2170_v59, %v2170_v59  ;;  %v2383_v29 = vadd.f32 %v2382_v60, %v2352_v32  ;;  %v2173_v61 = vadd.f32 %v2172_v31, %v4130_v12 }
 0x1e6   : > { %v3001_v45 = vpop.f32.mrb[116].mxu1  ;;  %2287 = vst [vmem:[%s4197_s24 + $0x38] sm:$0xff] %v2181_v13  ;;  %v2356_v9 = vmul.f32 %v2181_v13, %v2181_v13 }
 0x1e7   : > { %v3002_v7 = vpop.f32.mrb[117].mxu1  ;;  %v2384_v3 = vadd.f32 %v2383_v29, %v2353_v33  ;;  %2285 = vst [vmem:[%s4197_s24 + $0x28] sm:$0xff] %v2173_v61  ;;  %v2316_v38 = vadd.f32 %v2315_v56, %v2173_v61  ;;  %v2354_v22 = vmul.f32 %v2173_v61, %v2173_v61 }
 0x1e8   : > { %v3003_v6 = vadd.f32 %v3002_v7, %v3001_v45  ;;  %v3004_v10 = vpop.f32.mrb[118].mxu1 }
 0x1e9   : > { %v3005_v49 = vpop.f32.mrb[119].mxu1  ;;  %v3093_v39 = vpop.f32.mrb[120].mxu0  ;;  %v2317_v51 = vadd.f32 %v2316_v38, %v2178_v1  ;;  %v2385_v54 = vadd.f32 %v2384_v3, %v2354_v22 }
 0x1ea   : > { %v3006_v34 = vadd.f32 %v3005_v49, %v3004_v10  ;;  %v4221_v27 = vadd.f32 %v3003_v6, %v4109_v24  ;;  %v2194_v48 = vadd.f32 %v3093_v39, %v4160_v46  ;;  %v2185_v42 = vpop.f32.mrb[121].mxu0 }
 0x1eb   : > { %v2186_v2 = vadd.f32 %v2185_v42, %v4148_v58  ;;  %v2386_v40 = vadd.f32 %v2385_v54, %v2355_v50  ;;  %v2318_v36 = vadd.f32 %v2317_v51, %v2181_v13 }
 0x1ec   : > { %v4224_v23 = vadd.f32 %v3006_v34, %v4115_v4  ;;  %v3094_v4 = vpop.f32.mrb[122].mxu0  ;;  %2290 = vst [vmem:[%s4197_s24 + $0x50] sm:$0xff] %v2194_v48  ;;  %v2359_v10 = vmul.f32 %v2194_v48, %v2194_v48 }
 0x1ed   : > { %v2197_v47 = vadd.f32 %v3094_v4, %v4166_v25  ;;  %v2188_v45 = vpop.f32.mrb[123].mxu0  ;;  %2288 = vst [vmem:[%s4197_s24 + $0x40] sm:$0xff] %v2186_v2  ;;  %v2357_v16 = vmul.f32 %v2186_v2, %v2186_v2  ;;  %v2319_v58 = vadd.f32 %v2318_v36, %v2186_v2  ;;  %v2387_v7 = vadd.f32 %v2386_v40, %v2356_v9 }
 0x1ee   : > { %v3007_v37 = vpop.f32.mrb[120].mxu1  ;;  %v2189_v32 = vadd.f32 %v2188_v45, %v4154_v8 }
 0x1ef   : > { %v3008_v12 = vpop.f32.mrb[121].mxu1  ;;  %2291 = vst [vmem:[%s4197_s24 + $0x58] sm:$0xff] %v2197_v47  ;;  %v2388_v6 = vadd.f32 %v2387_v7, %v2357_v16  ;;  %v2360_v29 = vmul.f32 %v2197_v47, %v2197_v47 }
 0x1f0   : > { %v3009_v24 = vadd.f32 %v3008_v12, %v3007_v37  ;;  %v3010_v0 = vpop.f32.mrb[122].mxu1  ;;  %2289 = vst [vmem:[%s4197_s24 + $0x48] sm:$0xff] %v2189_v32  ;;  %v2358_v44 = vmul.f32 %v2189_v32, %v2189_v32  ;;  %v2320_v25 = vadd.f32 %v2319_v58, %v2189_v32 }
 0x1f1   : > { %v3011_v26 = vpop.f32.mrb[123].mxu1  ;;  %v3097_v17 = vpop.f32.mrb[124].mxu0 }
 0x1f2   : > { %v3012_v46 = vadd.f32 %v3011_v26, %v3010_v0  ;;  %v4234_v1 = vadd.f32 %v3009_v24, %v4121_v55  ;;  %v2321_v20 = vadd.f32 %v2320_v25, %v2194_v48  ;;  %v2389_v8 = vadd.f32 %v2388_v6, %v2358_v44  ;;  %v2201_v49 = vpop.f32.mrb[125].mxu0 }
 0x1f3   : > { %v2210_v55 = vadd.f32 %v3097_v17, %v4184_v35  ;;  %v2202_v56 = vadd.f32 %v2201_v49, %v4172_v28 }
 0x1f4   : > { %v4239_v60 = vadd.f32 %v3012_v46, %v4127_v53  ;;  %v3098_v53 = vpop.f32.mrb[126].mxu0  ;;  %v2390_v34 = vadd.f32 %v2389_v8, %v2359_v10  ;;  %v2322_v61 = vadd.f32 %v2321_v20, %v2197_v47 }
 0x1f5   : > { %2294 = vst [vmem:[%s4197_s24 + $0x70] sm:$0xff] %v2210_v55  ;;  %v2213_v3 = vadd.f32 %v3098_v53, %v4190_v43  ;;  %v2204_v22 = vpop.f32.mrb[127].mxu0  ;;  %2292 = vst [vmem:[%s4197_s24 + $0x60] sm:$0xff] %v2202_v56  ;;  %v2361_v37 = vmul.f32 %v2202_v56, %v2202_v56  ;;  %v2363_v2 = vmul.f32 %v2210_v55, %v2210_v55 }
 0x1f6   : > { %v3013_v59 = vpop.f32.mrb[124].mxu1  ;;  %v2205_v39 = vadd.f32 %v2204_v22, %v4178_v52  ;;  %v2323_v28 = vadd.f32 %v2322_v61, %v2202_v56  ;;  %v2391_v51 = vadd.f32 %v2390_v34, %v2360_v29 }
 0x1f7   : > { %v3014_v13 = vpop.f32.mrb[125].mxu1  ;;  %2295 = vst [vmem:[%s4197_s24 + $0x78] sm:$0xff] %v2213_v3 }
 0x1f8   : > { %v3015_v31 = vadd.f32 %v3014_v13, %v3013_v59  ;;  %v3016_v33 = vpop.f32.mrb[126].mxu1  ;;  %2293 = vst [vmem:[%s4197_s24 + $0x68] sm:$0xff] %v2205_v39  ;;  %v2362_v54 = vmul.f32 %v2205_v39, %v2205_v39  ;;  %v2392_v12 = vadd.f32 %v2391_v51, %v2361_v37  ;;  %v2324_v42 = vadd.f32 %v2323_v28, %v2205_v39 }
 0x1f9   : > { %v3017_v38 = vpop.f32.mrb[127].mxu1  ;;  %v3101_v24 = vpop.f32.mrb[128].mxu0 }
 0x1fa   : > { %v3018_v35 = vadd.f32 %v3017_v38, %v3016_v33  ;;  %v2081_v50 = vadd.f32 %v3015_v31, %v4133_v62  ;;  %v2325_v0 = vadd.f32 %v2324_v42, %v2210_v55  ;;  %v2393_v4 = vadd.f32 %v2392_v12, %v2362_v54  ;;  %v2217_v62 = vpop.f32.mrb[129].mxu0 }
 0x1fb   : > { %v2226_v52 = vadd.f32 %v3101_v24, %v4221_v27  ;;  %v2218_v36 = vadd.f32 %v2217_v62, %v4206_v57  ;;  %v3102_v26 = vpop.f32.mrb[130].mxu0 }
 0x1fc   : > { %v2084_v48 = vadd.f32 %v3018_v35, %v4139_v30  ;;  %v2364_v30 = vmul.f32 %v2213_v3, %v2213_v3  ;;  %v2394_v45 = vadd.f32 %v2393_v4, %v2363_v2  ;;  %v2326_v16 = vadd.f32 %v2325_v0, %v2213_v3  ;;  %v2220_v58 = vpop.f32.mrb[131].mxu0 }
 0x1fd   : > { %2298 = vst [vmem:[%s4197_s24 + $0x90] sm:$0xff] %v2226_v52  ;;  %v2229_v46 = vadd.f32 %v3102_v26, %v4224_v23  ;;  %2296 = vst [vmem:[%s4197_s24 + $0x80] sm:$0xff] %v2218_v36  ;;  %v2365_v7 = vmul.f32 %v2218_v36, %v2218_v36  ;;  %v2221_v44 = vadd.f32 %v2220_v58, %v4211_v63 }
 0x1fe   : > { %v3019_v43 = vpop.f32.mrb[128].mxu1  ;;  %v2327_v57 = vadd.f32 %v2326_v16, %v2218_v36  ;;  %v2395_v25 = vadd.f32 %v2394_v45, %v2364_v30  ;;  %v2367_v55 = vmul.f32 %v2226_v52, %v2226_v52 }
 0x1ff   : > { %v3020_v9 = vpop.f32.mrb[129].mxu1  ;;  %2299 = vst [vmem:[%s4197_s24 + $0x98] sm:$0xff] %v2229_v46  ;;  %2297 = vst [vmem:[%s4197_s24 + $0x88] sm:$0xff] %v2221_v44  ;;  %v2366_v59 = vmul.f32 %v2221_v44, %v2221_v44 }
 0x200   : > { %v3021_v40 = vadd.f32 %v3020_v9, %v3019_v43  ;;  %v3022_v47 = vpop.f32.mrb[130].mxu1  ;;  %v2396_v10 = vadd.f32 %v2395_v25, %v2365_v7  ;;  %v2328_v20 = vadd.f32 %v2327_v57, %v2221_v44 }
 0x201   : > { %v3023_v32 = vpop.f32.mrb[131].mxu1  ;;  %v3105_v8 = vpop.f32.mrb[132].mxu0 }
 0x202   : > { %v3024_v27 = vadd.f32 %v3023_v32, %v3022_v47  ;;  %v2089_v6 = vadd.f32 %v3021_v40, %v4145_v5  ;;  %v2329_v13 = vadd.f32 %v2328_v20, %v2226_v52  ;;  %v2397_v49 = vadd.f32 %v2396_v10, %v2366_v59  ;;  %v2233_v56 = vpop.f32.mrb[133].mxu0 }
 0x203   : > { %v2242_v31 = vadd.f32 %v3105_v8, %v2081_v50  ;;  %v2234_v33 = vadd.f32 %v2233_v56, %v4234_v1  ;;  %v3106_v29 = vpop.f32.mrb[134].mxu0 }
 0x204   : > { %v2092_v17 = vadd.f32 %v3024_v27, %v4151_v14  ;;  %v2368_v14 = vmul.f32 %v2229_v46, %v2229_v46  ;;  %v2398_v34 = vadd.f32 %v2397_v49, %v2367_v55  ;;  %v2330_v61 = vadd.f32 %v2329_v13, %v2229_v46  ;;  %v2236_v22 = vpop.f32.mrb[135].mxu0 }
 0x205   : > { %2302 = vst [vmem:[%s4197_s24 + $0xb0] sm:$0xff] %v2242_v31  ;;  %v2245_v3 = vadd.f32 %v3106_v29, %v2084_v48  ;;  %2300 = vst [vmem:[%s4197_s24 + $0xa0] sm:$0xff] %v2234_v33  ;;  %v2369_v37 = vmul.f32 %v2234_v33, %v2234_v33  ;;  %v2237_v39 = vadd.f32 %v2236_v22, %v4239_v60 }
 0x206   : > { %v3025_v23 = vpop.f32.mrb[132].mxu1  ;;  %v2331_v28 = vadd.f32 %v2330_v61, %v2234_v33  ;;  %v2399_v1 = vadd.f32 %v2398_v34, %v2368_v14  ;;  %v2371_v24 = vmul.f32 %v2242_v31, %v2242_v31 }
 0x207   : > { %v3026_v63 = vpop.f32.mrb[133].mxu1  ;;  %2303 = vst [vmem:[%s4197_s24 + $0xb8] sm:$0xff] %v2245_v3  ;;  %2301 = vst [vmem:[%s4197_s24 + $0xa8] sm:$0xff] %v2237_v39  ;;  %v2370_v51 = vmul.f32 %v2237_v39, %v2237_v39  ;;  %v2372_v36 = vmul.f32 %v2245_v3, %v2245_v3 }
 0x208   : > { %v3027_v5 = vadd.f32 %v3026_v63, %v3025_v23  ;;  %v3028_v53 = vpop.f32.mrb[134].mxu1  ;;  %v2400_v12 = vadd.f32 %v2399_v1, %v2369_v37  ;;  %v2332_v42 = vadd.f32 %v2331_v28, %v2237_v39 }
 0x209   : > { %v3029_v38 = vpop.f32.mrb[135].mxu1  ;;  %v3109_v43 = vpop.f32.mrb[136].mxu0 }
 0x20a   : > { %v3030_v35 = vadd.f32 %v3029_v38, %v3028_v53  ;;  %v2097_v50 = vadd.f32 %v3027_v5, %v4157_v18  ;;  %v2333_v2 = vadd.f32 %v2332_v42, %v2242_v31  ;;  %v2401_v0 = vadd.f32 %v2400_v12, %v2370_v51  ;;  %v2249_v52 = vpop.f32.mrb[137].mxu0 }
 0x20b   : > { %v2250_v9 = vadd.f32 %v2249_v52, %v2089_v6  ;;  %v3110_v40 = vpop.f32.mrb[138].mxu0 }
 0x20c   : > { %v2100_v54 = vadd.f32 %v3030_v35, %v4163_v21  ;;  %v2258_v4 = vadd.f32 %v3109_v43, %v2097_v50  ;;  %v2402_v21 = vadd.f32 %v2401_v0, %v2371_v24  ;;  %v2334_v47 = vadd.f32 %v2333_v2, %v2245_v3  ;;  %v2252_v45 = vpop.f32.mrb[139].mxu0 }
 0x20d   : > { %2304 = vst [vmem:[%s4197_s24 + $0xc0] sm:$0xff] %v2250_v9  ;;  %v2373_v16 = vmul.f32 %v2250_v9, %v2250_v9  ;;  %v2253_v32 = vadd.f32 %v2252_v45, %v2092_v17 }
 0x20e   : > { %v3031_v48 = vpop.f32.mrb[136].mxu1  ;;  %2306 = vst [vmem:[%s4197_s24 + $0xd0] sm:$0xff] %v2258_v4  ;;  %v2261_v26 = vadd.f32 %v3110_v40, %v2100_v54  ;;  %v2335_v7 = vadd.f32 %v2334_v47, %v2250_v9  ;;  %v2403_v27 = vadd.f32 %v2402_v21, %v2372_v36  ;;  %v2375_v20 = vmul.f32 %v2258_v4, %v2258_v4 }
 0x20f   : > { %v3032_v60 = vpop.f32.mrb[137].mxu1  ;;  %2305 = vst [vmem:[%s4197_s24 + $0xc8] sm:$0xff] %v2253_v32  ;;  %v2374_v44 = vmul.f32 %v2253_v32, %v2253_v32 }
 0x210   : > { %v3033_v18 = vadd.f32 %v3032_v60, %v3031_v48  ;;  %v3034_v62 = vpop.f32.mrb[138].mxu1  ;;  %2307 = vst [vmem:[%s4197_s24 + $0xd8] sm:$0xff] %v2261_v26  ;;  %v2404_v57 = vadd.f32 %v2403_v27, %v2373_v16  ;;  %v2336_v25 = vadd.f32 %v2335_v7, %v2253_v32  ;;  %v2376_v63 = vmul.f32 %v2261_v26, %v2261_v26 }
 0x211   : > { %v3035_v30 = vpop.f32.mrb[139].mxu1  ;;  %v3113_v10 = vpop.f32.mrb[140].mxu0 }
 0x212   : > { %v3036_v46 = vadd.f32 %v3035_v30, %v3034_v62  ;;  %v2105_v58 = vadd.f32 %v3033_v18, %v4169_v11  ;;  %v2337_v23 = vadd.f32 %v2336_v25, %v2258_v4  ;;  %v2405_v8 = vadd.f32 %v2404_v57, %v2374_v44  ;;  %v2265_v13 = vpop.f32.mrb[141].mxu0 }
 0x213   : > { %v3114_v31 = vpop.f32.mrb[142].mxu0 }
 0x214   : > { %v2108_v6 = vadd.f32 %v3036_v46, %v4175_v19  ;;  %v2266_v49 = vadd.f32 %v2265_v13, %v2105_v58  ;;  %v2406_v56 = vadd.f32 %v2405_v8, %v2375_v20  ;;  %v2338_v5 = vadd.f32 %v2337_v23, %v2261_v26  ;;  %v2268_v33 = vpop.f32.mrb[143].mxu0 }
 0x216   : > { %v3037_v59 = vpop.f32.mrb[140].mxu1  ;;  %2308 = vst [vmem:[%s4197_s24 + $0xe0] sm:$0xff] %v2266_v49  ;;  %v2377_v29 = vmul.f32 %v2266_v49, %v2266_v49  ;;  %v2269_v34 = vadd.f32 %v2268_v33, %v2108_v6  ;;  %v2339_v61 = vadd.f32 %v2338_v5, %v2266_v49  ;;  %v2407_v3 = vadd.f32 %v2406_v56, %v2376_v63 }
 0x217   : > { %v3038_v55 = vpop.f32.mrb[141].mxu1 }
 0x218   : > { %v3039_v17 = vadd.f32 %v3038_v55, %v3037_v59  ;;  %v3040_v11 = vpop.f32.mrb[142].mxu1  ;;  %2309 = vst [vmem:[%s4197_s24 + $0xe8] sm:$0xff] %v2269_v34  ;;  %v2378_v37 = vmul.f32 %v2269_v34, %v2269_v34  ;;  %v2408_v35 = vadd.f32 %v2407_v3, %v2377_v29  ;;  %v2340_v39 = vadd.f32 %v2339_v61, %v2269_v34 }
 0x219   : > { %v3041_v19 = vpop.f32.mrb[143].mxu1 }
 0x21a   : > { %v2113_v53 = vadd.f32 %v3039_v17, %v4181_v41  ;;  %v3042_v14 = vadd.f32 %v3041_v19, %v3040_v11  ;;  %v2409_v41 = vadd.f32 %v2408_v35, %v2378_v37 }
 0x21c   : > { %v2274_v38 = vadd.f32 %v3113_v10, %v2113_v53  ;;  %v2116_v22 = vadd.f32 %v3042_v14, %v4187_v15 }
 0x21e   : > { %2310 = vst [vmem:[%s4197_s24 + $0xf0] sm:$0xff] %v2274_v38  ;;  %v2379_v50 = vmul.f32 %v2274_v38, %v2274_v38  ;;  %v2277_v28 = vadd.f32 %v3114_v31, %v2116_v22  ;;  %v2341_v1 = vadd.f32 %v2340_v39, %v2274_v38 }
 0x220   : > { %2311 = vst [vmem:[%s4197_s24 + $0xf8] sm:$0xff] %v2277_v28  ;;  %v2380_v51 = vmul.f32 %v2277_v28, %v2277_v28  ;;  %v2342_v54 = vadd.f32 %v2341_v1, %v2277_v28  ;;  %v2410_v12 = vadd.f32 %v2409_v41, %v2379_v50 }
 0x222   : > { %v2343_v42 = vrot.slane %v2342_v54, 4  ;;  %v2411_v48 = vadd.f32 %v2410_v12, %v2380_v51 }
 0x224   : > { %v2344_v43 = vadd.f32 %v2343_v42, %v2342_v54  ;;  %v2412_v24 = vrot.slane %v2411_v48, 4 }
 0x226   : > { %v2345_v2 = vrot.slane %v2344_v43, 2  ;;  %v2413_v15 = vadd.f32 %v2412_v24, %v2411_v48 }
 0x228   : > { %v2346_v0 = vadd.f32 %v2345_v2, %v2344_v43  ;;  %v2414_v4 = vrot.slane %v2413_v15, 2 }
 0x22a   : > { %v2347_v60 = vrot.slane %v2346_v0, 1  ;;  %v2415_v52 = vadd.f32 %v2414_v4, %v2413_v15 }
 0x22c   : > { %v2416_v18 = vrot.slane %v2415_v52, 1  ;;  %v2348_v9 = vadd.f32 %v2347_v60, %v2346_v0 }
 0x22e   : > { %v2417_v62 = vadd.f32 %v2416_v18, %v2415_v52 }
 0x230   : > { %v2419_v40 = vsel %vm2418_vm0, %v2348_v9, %v2417_v62 }
 0x231   : > { %2420 = vst [vmem:[%s235_s27] sm:$0x3] %v2419_v40 }
 0x232 PF: > { %s16_s18 = sadd.s32 1, %s3219_s18  }
 0x233   : > { %p13_p4 = scmp.ge.s32.totalorder %s16_s18, 4  }
 0x235   :  { %15 = sbr.rel (!%p13_p4) target bundleno = 1 (0x1), region = 80 }

// kernel: basic_block_forward.3
= control target key start
LH: loop header
LB: loop body
LE: loop exit
PB: predicated region body
PF: predicated region fallthrough
CT: control target
= control target key end

     0   :  { %s3077_s12 = smov 0   ;;  %s4014_s0 = inlined_call_operand.vmem [shape: f32[2,16,16,128], index: 0, kind: input, shape index: {}]   ;;  %s4015_s1 = inlined_call_operand.vmem [shape: bf16[1152,128], index: 1, kind: input, shape index: {}]   ;;  %s4016_s2 = inlined_call_operand.vmem [shape: f32[2,16,16,128], index: 2, kind: output, shape index: {0}]   ;;  %s4017_s3 = inlined_call_operand.vmem [shape: f32[2,2,128], index: 3, kind: output, shape index: {1}]  }
   0x1 LB: > { %s2343_s13 = sadd.s32 4294967295, %s3053_s12   ;;  %p2347_p0 = scmp.ge.s32.totalorder %s3053_s12, 1  ;;  %s3053_s12 = sphi %s3077_s12, %s14_s12  }
   0x2   : > { %p140_p1 = scmp.lt.s32.totalorder %s3053_s12, 3 }
   0x4   : > { %p141_p2 = pnand %p2347_p0, %p140_p1 }
   0x5   : > { %v2974_v0 = vld [vmem:[%s4015_s1 + $0x40] sm:$0xff] (!%p141_p2)   ;;  %v3055_v2 = vmov (!%p141_p2), 0.0   ;;  %v2976_v3 = vld [vmem:[%s4015_s1 + $0x48] sm:$0xff] (!%p141_p2)   ;;  %p168_p3 = scmp.lt.s32.totalorder (!%p141_p2), %s2343_s13, 1  ;;  %v2978_v5 = vld [vmem:[%s4015_s1 + $0x50] sm:$0xff] (!%p141_p2)   ;;  %v3056_v46 = vmov (!%p141_p2), 0.0|0.0  }
   0x6   : > { %144 = sbr.rel (%p141_p2) target bundleno = 562 (0x232), region = 28  ;;  %v2975_v1 = vld [vmem:[%s4015_s1] sm:$0xff] (!%p141_p2)   ;;  %183 = vst [vmem:[#allocation2] sm:$0xff] (!%p141_p2), %v3055_v2  ;;  %184 = vst [vmem:[#allocation2 + $0x8] sm:$0xff] (!%p141_p2), %v3055_v2  ;;  %2429 = vmatprep.subr.bf16.mxu0 (!%p141_p2), %v2974_v0  ;;  %2949 = vmatprep.subr.bf16.mxu1 (!%p141_p2), %v2974_v0  ;;  %v2977_v4 = vld [vmem:[%s4015_s1 + $0x8] sm:$0xff] (!%p141_p2)   ;;  %vm2254_vm0 = vcmask (!%p141_p2), 1040384  }
   0x7   : > { %185 = vst [vmem:[#allocation2 + $0x10] sm:$0x3] (!%p141_p2), %v3055_v2  ;;  %186 = vst [vmem:[#allocation2 + $0x18] sm:$0xff] (!%p141_p2), %v3055_v2  ;;  %2430 = vmatpush3.bf16.msra.mxu0 (!%p141_p2), %v2975_v1  ;;  %2957 = vmatpush3.bf16.msra.mxu1 (!%p141_p2), %v2975_v1  ;;  %v2979_v6 = vld [vmem:[%s4015_s1 + $0x10] sm:$0xff] (!%p141_p2)   ;;  %v2980_v7 = vld [vmem:[%s4015_s1 + $0x58] sm:$0xff] (!%p141_p2)  }
   0x8   : > { %187 = vst [vmem:[#allocation2 + $0x20] sm:$0xff] (!%p141_p2), %v3055_v2  ;;  %188 = vst [vmem:[#allocation2 + $0x28] sm:$0x3] (!%p141_p2), %v3055_v2  ;;  %2431 = vmatprep.subr.bf16.mxu0 (!%p141_p2), %v2976_v3  ;;  %2950 = vmatprep.subr.bf16.mxu1 (!%p141_p2), %v2976_v3  ;;  %v2981_v8 = vld [vmem:[%s4015_s1 + $0x18] sm:$0xff] (!%p141_p2)   ;;  %v2982_v9 = vld [vmem:[%s4015_s1 + $0x60] sm:$0xff] (!%p141_p2)  }
   0x9   : > { %189 = vst [vmem:[#allocation2 + $0x30] sm:$0xff] (!%p141_p2), %v3055_v2  ;;  %190 = vst [vmem:[#allocation2 + $0x38] sm:$0xff] (!%p141_p2), %v3055_v2  ;;  %v2983_v10 = vld [vmem:[%s4015_s1 + $0x20] sm:$0xff] (!%p141_p2)   ;;  %v2984_v11 = vld [vmem:[%s4015_s1 + $0x68] sm:$0xff] (!%p141_p2)  }
   0xa   : > { %191 = vst [vmem:[#allocation2 + $0x40] sm:$0x3] (!%p141_p2), %v3055_v2  ;;  %192 = vst [vmem:[#allocation2 + $0x48] sm:$0xff] (!%p141_p2), %v3055_v2  ;;  %v2985_v18 = vld [vmem:[%s4015_s1 + $0x28] sm:$0xff] (!%p141_p2)   ;;  %v2986_v19 = vld [vmem:[%s4015_s1 + $0x70] sm:$0xff] (!%p141_p2)  }
   0xb   : > { %193 = vst [vmem:[#allocation2 + $0x50] sm:$0xff] (!%p141_p2), %v3055_v2  ;;  %194 = vst [vmem:[#allocation2 + $0x58] sm:$0x3] (!%p141_p2), %v3055_v2  ;;  %2432 = vmatpush3.bf16.msra.mxu0 (!%p141_p2), %v2977_v4  ;;  %2958 = vmatpush3.bf16.msra.mxu1 (!%p141_p2), %v2977_v4  ;;  %v2987_v20 = vld [vmem:[%s4015_s1 + $0x30] sm:$0xff] (!%p141_p2)   ;;  %v2988_v23 = vld [vmem:[%s4015_s1 + $0x78] sm:$0xff] (!%p141_p2)  }
   0xc   : > { %195 = vst [vmem:[#allocation2 + $0x60] sm:$0xff] (!%p141_p2), %v3055_v2  ;;  %196 = vst [vmem:[#allocation2 + $0x68] sm:$0xff] (!%p141_p2), %v3055_v2  ;;  %2433 = vmatprep.subr.bf16.mxu0 (!%p141_p2), %v2978_v5  ;;  %2951 = vmatprep.subr.bf16.mxu1 (!%p141_p2), %v2978_v5  ;;  %v2989_v26 = vld [vmem:[%s4015_s1 + $0x38] sm:$0xff] (!%p141_p2)   ;;  %v2990_v28 = vld [vmem:[%s4015_s1 + $0xc0] sm:$0xff] (!%p141_p2)  }
   0xd   : > { %197 = vst [vmem:[#allocation2 + $0x70] sm:$0x3] %v3055_v2  ;;  %198 = vst [vmem:[#allocation2 + $0x78] sm:$0xff] %v3055_v2  ;;  %s4019_s13 = smov (!%p168_p3, %s2343_s13), 1  ;;  %v334_v12 = vld [vmem:[#allocation2 + $0x1] sm:$0xff]  ;;  %v2996_v49 = vld [vmem:[%s4015_s1 + $0xd0] sm:$0xff]  }
   0xe   : > { %199 = vst [vmem:[#allocation2 + $0x80] sm:$0xff] %v3055_v2  ;;  %200 = vst [vmem:[#allocation2 + $0x88] sm:$0x3] %v3055_v2  ;;  %s2427_s28 = sshll.u32 %s4019_s13, 8  ;;  %v335_v13 = vld [vmem:[#allocation2 + $0x9] sm:$0xff]  ;;  %v2991_v30 = vld [vmem:[%s4015_s1 + $0x140] sm:$0xff]  }
   0xf   : > { %201 = vst [vmem:[#allocation2 + $0x90] sm:$0xff] %v3055_v2  ;;  %202 = vst [vmem:[#allocation2 + $0x98] sm:$0xff] %v3055_v2  ;;  %2434 = vmatpush3.bf16.msra.mxu0 %v2979_v6  ;;  %2959 = vmatpush3.bf16.msra.mxu1 %v2979_v6  ;;  %s3124_s8 = scalar_lea.vmem %s4014_s0, %s2427_s28  ;;  %v592_v15 = vpack.c.bf16 %v335_v13, %v334_v12  ;;  %v2992_v32 = vld [vmem:[%s4015_s1 + $0x80] sm:$0xff]   ;;  %v2994_v34 = vld [vmem:[%s4015_s1 + $0xc8] sm:$0xff]   ;;  %s3923_s23 = scalar_lea.vmem %s4016_s2, %s2427_s28 }
  0x10   : > { %203 = vst [vmem:[#allocation2 + $0xa0] sm:$0x3] %v3055_v2  ;;  %204 = vst [vmem:[#allocation2 + $0xa8] sm:$0xff] %v3055_v2  ;;  %2435 = vmatprep.subr.bf16.mxu0 %v2980_v7  ;;  %2952 = vmatprep.subr.bf16.mxu1 %v2980_v7  ;;  %v259_v14 = vld [vmem:[%s3124_s8 + $0xb0] sm:$0xff]  ;;  %v260_v16 = vld [vmem:[%s3124_s8 + $0xb8] sm:$0xff]  ;;  %s2352_s28 = sshll.u32 %s4019_s13, 1 }
  0x11   : > { %205 = vst [vmem:[#allocation2 + $0xb0] sm:$0xff] %v3055_v2  ;;  %206 = vst [vmem:[#allocation2 + $0xb8] sm:$0x3] %v3055_v2  ;;  %v700_v17 = vpack.c.bf16 %v260_v16, %v259_v14  ;;  %1343 = vmatprep.mubr.bf16.mxu0 %v592_v15  ;;  %v237_v21 = vld [vmem:[%s3124_s8] sm:$0xff]  ;;  %v238_v22 = vld [vmem:[%s3124_s8 + $0x8] sm:$0xff]  ;;  %s181_s26 = scalar_lea.vmem %s4017_s3, %s2352_s28 }
  0x12   : > { %207 = vst [vmem:[#allocation2 + $0xc0] sm:$0xff] %v3055_v2  ;;  %208 = vst [vmem:[#allocation2 + $0xc8] sm:$0xff] %v3055_v2  ;;  %v261_v24 = vld [vmem:[%s3124_s8 + $0xc0] sm:$0xff]  ;;  %v262_v25 = vld [vmem:[%s3124_s8 + $0xc8] sm:$0xff]  ;;  %v3170_v35 = vpack.c.bf16 %v238_v22, %v237_v21 }
  0x13   : > { %209 = vst [vmem:[#allocation2 + $0xd0] sm:$0x3] %v3055_v2  ;;  %210 = vst [vmem:[#allocation2 + $0xd8] sm:$0xff] %v3055_v2  ;;  %2436 = vmatpush3.bf16.msra.mxu0 %v2981_v8  ;;  %2960 = vmatpush3.bf16.msra.mxu1 %v2981_v8  ;;  %v2993_v33 = vld [vmem:[%s4015_s1 + $0x100] sm:$0xff]   ;;  %v2999_v36 = vld [vmem:[%s4015_s1 + $0x148] sm:$0xff]   ;;  %v709_v39 = vpack.c.bf16 %v262_v25, %v261_v24 }
  0x14   : > { %211 = vst [vmem:[#allocation2 + $0xe0] sm:$0xff] %v3055_v2  ;;  %212 = vst [vmem:[#allocation2 + $0xe8] sm:$0x3] %v3055_v2  ;;  %2437 = vmatprep.subr.bf16.mxu0 %v2982_v9  ;;  %2953 = vmatprep.subr.bf16.mxu1 %v2982_v9  ;;  %v239_v37 = vld [vmem:[%s3124_s8 + $0x10] sm:$0xff]  ;;  %v2995_v38 = vld [vmem:[%s4015_s1 + $0x88] sm:$0xff]  }
  0x15   : > { %213 = vst [vmem:[#allocation2 + $0xf0] sm:$0xff] %v3055_v2  ;;  %214 = vst [vmem:[#allocation2 + $0xf8] sm:$0xff] %v3055_v2  ;;  %1439 = vmatprep.mubr.bf16.mxu1 %v700_v17  ;;  %v3001_v42 = vld [vmem:[%s4015_s1 + $0x108] sm:$0xff]   ;;  %v240_v43 = vld [vmem:[%s3124_s8 + $0x18] sm:$0xff] }
  0x16   : > { %215 = vst [vmem:[#allocation2 + $0x100] sm:$0x3] %v3055_v2  ;;  %216 = vst [vmem:[#allocation2 + $0x108] sm:$0xff] %v3055_v2  ;;  %v263_v44 = vld [vmem:[%s3124_s8 + $0xd0] sm:$0xff]  ;;  %v264_v45 = vld [vmem:[%s3124_s8 + $0xd8] sm:$0xff]  ;;  %v3200_v56 = vpack.c.bf16 %v240_v43, %v239_v37 }
  0x17   : > { %217 = vst [vmem:[#allocation2 + $0x110] sm:$0xff] %v3055_v2  ;;  %218 = vst [vmem:[#allocation2 + $0x118] sm:$0x3] %v3055_v2  ;;  %2438 = vmatpush3.bf16.msra.mxu0 %v2983_v10  ;;  %2961 = vmatpush3.bf16.msra.mxu1 %v2983_v10  ;;  %v2997_v50 = vld [vmem:[%s4015_s1 + $0x90] sm:$0xff]   ;;  %v241_v53 = vld [vmem:[%s3124_s8 + $0x20] sm:$0xff]  ;;  %v718_v59 = vpack.c.bf16 %v264_v45, %v263_v44 }
  0x18   : > { %219 = vst [vmem:[#allocation2 + $0x120] sm:$0xff] %v3055_v2  ;;  %220 = vst [vmem:[#allocation2 + $0x128] sm:$0xff] %v3055_v2  ;;  %2439 = vmatprep.subr.bf16.mxu0 %v2984_v11  ;;  %2954 = vmatprep.subr.bf16.mxu1 %v2984_v11  ;;  %v242_v54 = vld [vmem:[%s3124_s8 + $0x28] sm:$0xff]  ;;  %v265_v55 = vld [vmem:[%s3124_s8 + $0xe0] sm:$0xff] }
  0x19   : > { %221 = vst [vmem:[#allocation2 + $0x130] sm:$0x3] %v3055_v2  ;;  %222 = vst [vmem:[#allocation2 + $0x138] sm:$0xff] %v3055_v2  ;;  %v266_v57 = vld [vmem:[%s3124_s8 + $0xe8] sm:$0xff]  ;;  %v2998_v58 = vld [vmem:[%s4015_s1 + $0xd8] sm:$0xff]   ;;  %v3228_v7 = vpack.c.bf16 %v242_v54, %v241_v53 }
  0x1a   : > { %223 = vst [vmem:[#allocation2 + $0x140] sm:$0xff] %v3055_v2  ;;  %224 = vst [vmem:[#allocation2 + $0x148] sm:$0x3] %v3055_v2  ;;  %v3000_v60 = vld [vmem:[%s4015_s1 + $0x98] sm:$0xff]   ;;  %v3002_v0 = vld [vmem:[%s4015_s1 + $0xe0] sm:$0xff]   ;;  %v727_v9 = vpack.c.bf16 %v266_v57, %v265_v55 }
  0x1b   : > { %225 = vst [vmem:[#allocation2 + $0x150] sm:$0xff] %v3055_v2  ;;  %226 = vst [vmem:[#allocation2 + $0x158] sm:$0xff] %v3055_v2  ;;  %2440 = vmatpush3.bf16.msra.mxu0 %v2985_v18  ;;  %2962 = vmatpush3.bf16.msra.mxu1 %v2985_v18  ;;  %v3007_v1 = vld [vmem:[%s4015_s1 + $0x150] sm:$0xff]   ;;  %v3003_v6 = vld [vmem:[%s4015_s1 + $0xa0] sm:$0xff]  }
  0x1c   : > { %227 = vst [vmem:[#allocation2 + $0x160] sm:$0x3] %v3055_v2  ;;  %228 = vst [vmem:[#allocation2 + $0x168] sm:$0xff] %v3055_v2  ;;  %2441 = vmatprep.subr.bf16.mxu0 %v2986_v19  ;;  %2955 = vmatprep.subr.bf16.mxu1 %v2986_v19  ;;  %v3009_v3 = vld [vmem:[%s4015_s1 + $0x110] sm:$0xff]   ;;  %v3004_v8 = vld [vmem:[%s4015_s1 + $0xe8] sm:$0xff]  }
  0x1d   : > { %229 = vst [vmem:[#allocation2 + $0x170] sm:$0xff] %v3055_v2  ;;  %230 = vst [vmem:[#allocation2 + $0x178] sm:$0x3] %v3055_v2  ;;  %v243_v10 = vld [vmem:[%s3124_s8 + $0x30] sm:$0xff]  ;;  %v244_v11 = vld [vmem:[%s3124_s8 + $0x38] sm:$0xff] }
  0x1e   : > { %231 = vst [vmem:[#allocation2 + $0x180] sm:$0xff] %v3055_v2  ;;  %232 = vst [vmem:[#allocation2 + $0x188] sm:$0xff] %v3055_v2  ;;  %v3005_v12 = vld [vmem:[%s4015_s1 + $0xa8] sm:$0xff]   ;;  %v3014_v18 = vld [vmem:[%s4015_s1 + $0x158] sm:$0xff]  }
  0x1f   : > { %233 = vst [vmem:[#allocation2 + $0x190] sm:$0x3] %v3055_v2  ;;  %234 = vst [vmem:[#allocation2 + $0x198] sm:$0xff] %v3055_v2  ;;  %2442 = vmatpush3.bf16.msra.mxu0 %v2987_v20  ;;  %2963 = vmatpush3.bf16.msra.mxu1 %v2987_v20  ;;  %v3015_v19 = vld [vmem:[%s4015_s1 + $0x118] sm:$0xff]   ;;  %v245_v20 = vld [vmem:[%s3124_s8 + $0x40] sm:$0xff] }
  0x20   : > { %235 = vst [vmem:[#allocation2 + $0x1a0] sm:$0xff] %v3055_v2  ;;  %236 = vst [vmem:[#allocation2 + $0x1a8] sm:$0x3] %v3055_v2  ;;  %2443 = vmatprep.subr.bf16.mxu0 %v2988_v23  ;;  %2956 = vmatprep.subr.bf16.mxu1 %v2988_v23 }
  0x21   : > { %292 = vst [vmem:[#allocation2 + $0x121] sm:$0xff] %v259_v14  ;;  %293 = vst [vmem:[#allocation2 + $0x129] sm:$0xff] %v260_v16  ;;  %v3006_v16 = vld [vmem:[%s4015_s1 + $0xf0] sm:$0xff]  }
  0x22   : > { %270 = vst [vmem:[#allocation2 + $0x19] sm:$0xff] %v237_v21  ;;  %271 = vst [vmem:[#allocation2 + $0x21] sm:$0xff] %v238_v22  ;;  %v246_v21 = vld [vmem:[%s3124_s8 + $0x48] sm:$0xff] }
  0x23   : > { %294 = vst [vmem:[#allocation2 + $0x139] sm:$0xff] %v261_v24  ;;  %295 = vst [vmem:[#allocation2 + $0x141] sm:$0xff] %v262_v25  ;;  %2444 = vmatpush3.bf16.msra.mxu0 %v2989_v26  ;;  %2964 = vmatpush3.bf16.msra.mxu1 %v2989_v26  ;;  %v3257_v24 = vld [vmem:[%s3124_s8 + $0x50] sm:$0xff]  ;;  %v3262_v26 = vpack.c.bf16 %v244_v11, %v243_v10 }
  0x24   : > { %2541 = vmatprep.subr.bf16.mxu1 %v2990_v28  ;;  %2653 = vmatprep.subr.bf16.mxu0 %v2991_v30  ;;  %272 = vst [vmem:[#allocation2 + $0x31] sm:$0xff] %v239_v37  ;;  %273 = vst [vmem:[#allocation2 + $0x39] sm:$0xff] %v240_v43  ;;  %v3008_v25 = vld [vmem:[%s4015_s1 + $0xb0] sm:$0xff]   ;;  %v3010_v28 = vld [vmem:[%s4015_s1 + $0xf8] sm:$0xff]  }
  0x25   : > { %296 = vst [vmem:[#allocation2 + $0x151] sm:$0xff] %v263_v44  ;;  %297 = vst [vmem:[#allocation2 + $0x159] sm:$0xff] %v264_v45  ;;  %v3018_v37 = vld [vmem:[%s4015_s1 + $0x120] sm:$0xff]   ;;  %v3298_v44 = vpack.c.bf16 %v246_v21, %v245_v20  ;;  %v3017_v45 = vld [vmem:[%s4015_s1 + $0x1c8] sm:$0xff]  }
  0x26   : > { %1344 = vmatmul.mubr.bf16.vlgmr.msra.gmra.mrb[0].mxu0 %v3056_v46  ;;  %274 = vst [vmem:[#allocation2 + $0x49] sm:$0xff] %v241_v53  ;;  %275 = vst [vmem:[#allocation2 + $0x51] sm:$0xff] %v242_v54  ;;  %v3013_v43 = vld [vmem:[%s4015_s1 + $0x180] sm:$0xff]   ;;  %v3021_v54 = vld [vmem:[%s4015_s1 + $0x128] sm:$0xff]  }
  0x27   : > { %2654 = vmatpush3.bf16.msra.mxu0 %v2993_v33  ;;  %1351 = vmatprep.mubr.bf16.mxu0 %v3170_v35  ;;  %298 = vst [vmem:[#allocation2 + $0x169] sm:$0xff] %v265_v55  ;;  %299 = vst [vmem:[#allocation2 + $0x171] sm:$0xff] %v266_v57  ;;  %v367_v33 = vld [vmem:[#allocation2 + $0xa] sm:$0xff] }
  0x28   : > { %v326_v27 = vld [vmem:[#allocation2 + $0x120] sm:$0xff]  ;;  %v327_v29 = vld [vmem:[#allocation2 + $0x128] sm:$0xff]  ;;  %2655 = vmatprep.subr.bf16.mxu0 %v2999_v36  ;;  %276 = vst [vmem:[#allocation2 + $0x61] sm:$0xff] %v243_v10  ;;  %277 = vst [vmem:[#allocation2 + $0x69] sm:$0xff] %v244_v11 }
  0x29   : > { %v3159_v31 = vpack.c.bf16 %v327_v29, %v326_v27  ;;  %v304_v40 = vld [vmem:[#allocation2 + $0x18] sm:$0xff]  ;;  %v305_v41 = vld [vmem:[#allocation2 + $0x20] sm:$0xff]  ;;  %278 = vst [vmem:[#allocation2 + $0x79] sm:$0xff] %v245_v20  ;;  %279 = vst [vmem:[#allocation2 + $0x81] sm:$0xff] %v246_v21 }
  0x2a   : > { %v328_v47 = vld [vmem:[#allocation2 + $0x138] sm:$0xff]  ;;  %v329_v48 = vld [vmem:[#allocation2 + $0x140] sm:$0xff]  ;;  %v3193_v51 = vpack.c.bf16 %v305_v41, %v304_v40  ;;  %280 = vst [vmem:[#allocation2 + $0x91] sm:$0xff] %v3257_v24  ;;  %v3289_v40 = vld [vmem:[%s3124_s8 + $0x68] sm:$0xff] }
  0x2b   : > { %1440 = vmatmul.mubr.bf16.vlgmr.msra.gmra.mrb[0].mxu1 %v3159_v31  ;;  %v3195_v52 = vpack.c.bf16 %v329_v48, %v328_v47  ;;  %2656 = vmatpush3.bf16.msra.mxu0 %v3001_v42  ;;  %v306_v61 = vld [vmem:[#allocation2 + $0x30] sm:$0xff]  ;;  %v307_v62 = vld [vmem:[#allocation2 + $0x38] sm:$0xff]  ;;  %283 = vst [vmem:[#allocation2 + $0xb1] sm:$0xff] %v3289_v40  ;;  %v369_v47 = vld [vmem:[#allocation2 + $0x22] sm:$0xff] }
  0x2c   : > { %2542 = vmatpush3.bf16.msra.mxu1 %v2992_v32  ;;  %1447 = vmatprep.mubr.bf16.mxu1 %v709_v39  ;;  %v330_v63 = vld [vmem:[#allocation2 + $0x150] sm:$0xff]  ;;  %v331_v2 = vld [vmem:[#allocation2 + $0x158] sm:$0xff]  ;;  %v3221_v4 = vpack.c.bf16 %v307_v62, %v306_v61  ;;  %v366_v32 = vld [vmem:[#allocation2 + $0x2] sm:$0xff] }
  0x2d   : > { %2543 = vmatprep.subr.bf16.mxu1 %v2994_v34  ;;  %2657 = vmatprep.subr.bf16.mxu0 %v3007_v1  ;;  %v3223_v5 = vpack.c.bf16 %v331_v2, %v330_v63  ;;  %v308_v13 = vld [vmem:[#allocation2 + $0x48] sm:$0xff]  ;;  %v309_v14 = vld [vmem:[#allocation2 + $0x50] sm:$0xff]  ;;  %v248_v27 = vld [vmem:[%s3124_s8 + $0x58] sm:$0xff]  ;;  %v593_v42 = vpack.c.bf16 %v367_v33, %v366_v32 }
  0x2e   : > { %1352 = vmatmul.mubr.bf16.gmra.mrb[4].mxu0 %v3193_v51  ;;  %v332_v15 = vld [vmem:[#allocation2 + $0x168] sm:$0xff]  ;;  %v333_v17 = vld [vmem:[#allocation2 + $0x170] sm:$0xff]  ;;  %v3252_v22 = vpack.c.bf16 %v309_v14, %v308_v13  ;;  %281 = vst [vmem:[#allocation2 + $0x99] sm:$0xff] %v248_v27  ;;  %v3011_v29 = vld [vmem:[%s4015_s1 + $0xb8] sm:$0xff]   ;;  %v3342_v63 = vpack.c.bf16 %v248_v27, %v3257_v24 }
  0x2f   : > { %1359 = vmatprep.mubr.bf16.mxu0 %v3200_v56  ;;  %2658 = vmatpush3.bf16.msra.mxu0 %v3009_v3  ;;  %v3254_v23 = vpack.c.bf16 %v333_v17, %v332_v15  ;;  %v310_v30 = vld [vmem:[#allocation2 + $0x60] sm:$0xff]  ;;  %v311_v36 = vld [vmem:[#allocation2 + $0x68] sm:$0xff]  ;;  %v3022_v57 = vld [vmem:[%s4015_s1 + $0x1d0] sm:$0xff]  }
  0x30   : > { %2544 = vmatpush3.bf16.msra.mxu1 %v2995_v38  ;;  %2659 = vmatprep.subr.bf16.mxu0 %v3014_v18  ;;  %v3016_v34 = vld [vmem:[%s4015_s1 + $0x160] sm:$0xff]   ;;  %v3292_v41 = vpack.c.bf16 %v311_v36, %v310_v30  ;;  %v3019_v48 = vld [vmem:[%s4015_s1 + $0x188] sm:$0xff]   ;;  %v312_v53 = vld [vmem:[#allocation2 + $0x78] sm:$0xff] }
  0x31   : > { %2545 = vmatprep.subr.bf16.mxu1 %v2996_v49  ;;  %v3012_v38 = vld [vmem:[%s4015_s1 + $0x1c0] sm:$0xff]   ;;  %v3020_v49 = vld [vmem:[%s4015_s1 + $0x168] sm:$0xff]   ;;  %v3023_v62 = vld [vmem:[%s4015_s1 + $0x190] sm:$0xff]  }
  0x32   : > { %v3286_v39 = vld [vmem:[%s3124_s8 + $0x60] sm:$0xff]  ;;  %v3025_v1 = vld [vmem:[%s4015_s1 + $0x130] sm:$0xff]   ;;  %v3026_v11 = vld [vmem:[%s4015_s1 + $0x1d8] sm:$0xff]  }
  0x33   : > { %1448 = vmatmul.mubr.bf16.gmra.mrb[4].mxu1 %v3195_v52  ;;  %2660 = vmatpush3.bf16.msra.mxu0 %v3015_v19  ;;  %282 = vst [vmem:[#allocation2 + $0xa9] sm:$0xff] %v3286_v39  ;;  %v368_v46 = vld [vmem:[#allocation2 + $0x1a] sm:$0xff]  ;;  %v3351_v2 = vld [vmem:[%s3124_s8 + $0x90] sm:$0xff]  ;;  %v3386_v19 = vld [vmem:[%s3124_s8 + $0xa8] sm:$0xff] }
  0x34   : > { %2546 = vmatpush3.bf16.msra.mxu1 %v2997_v50  ;;  %1455 = vmatprep.mubr.bf16.mxu1 %v718_v59  ;;  %v3310_v50 = vld [vmem:[%s3124_s8 + $0x70] sm:$0xff]  ;;  %v313_v55 = vld [vmem:[#allocation2 + $0x80] sm:$0xff]  ;;  %v3330_v59 = vld [vmem:[%s3124_s8 + $0x88] sm:$0xff]  ;;  %v3334_v61 = vpack.c.bf16 %v369_v47, %v368_v46  ;;  %288 = vst [vmem:[#allocation2 + $0xf1] sm:$0xff] %v3351_v2 }
  0x35   : > { %2547 = vmatprep.subr.bf16.mxu1 %v2998_v58  ;;  %2661 = vmatprep.subr.bf16.mxu0 %v3016_v34  ;;  %284 = vst [vmem:[#allocation2 + $0xc1] sm:$0xff] %v3310_v50  ;;  %v3327_v58 = vld [vmem:[%s3124_s8 + $0x80] sm:$0xff]  ;;  %287 = vst [vmem:[#allocation2 + $0xe1] sm:$0xff] %v3330_v59  ;;  %v370_v3 = vld [vmem:[#allocation2 + $0x32] sm:$0xff] }
  0x36   : > { %1360 = vmatmul.mubr.bf16.gmra.mrb[8].mxu0 %v3221_v4  ;;  %286 = vst [vmem:[#allocation2 + $0xd9] sm:$0xff] %v3327_v58  ;;  %v315_v10 = vld [vmem:[#allocation2 + $0x98] sm:$0xff]  ;;  %v3383_v18 = vld [vmem:[%s3124_s8 + $0xa0] sm:$0xff]  ;;  %291 = vst [vmem:[#allocation2 + $0x111] sm:$0xff] %v3386_v19  ;;  %v3436_v47 = vpack.c.bf16 %v3330_v59, %v3327_v58 }
  0x37   : > { %1367 = vmatprep.mubr.bf16.mxu0 %v3228_v7  ;;  %2662 = vmatpush3.bf16.msra.mxu0 %v3018_v37  ;;  %v3028_v15 = vld [vmem:[%s4015_s1 + $0x178] sm:$0xff]   ;;  %290 = vst [vmem:[#allocation2 + $0x109] sm:$0xff] %v3383_v18  ;;  %v372_v24 = vld [vmem:[#allocation2 + $0x4a] sm:$0xff]  ;;  %v3030_v27 = vld [vmem:[%s4015_s1 + $0x1e0] sm:$0xff]  }
  0x38   : > { %2548 = vmatpush3.bf16.msra.mxu1 %v3000_v60  ;;  %2663 = vmatprep.subr.bf16.mxu0 %v3020_v49  ;;  %v3332_v60 = vpack.c.bf16 %v313_v55, %v312_v53  ;;  %v3029_v17 = vld [vmem:[%s4015_s1 + $0x138] sm:$0xff]   ;;  %v3033_v34 = vld [vmem:[%s4015_s1 + $0x1e8] sm:$0xff]   ;;  %v3038_v46 = vld [vmem:[%s4015_s1 + $0x1b0] sm:$0xff]  }
  0x39   : > { %2549 = vmatprep.subr.bf16.mxu1 %v3002_v0  ;;  %v3024_v0 = vld [vmem:[%s4015_s1 + $0x170] sm:$0xff]   ;;  %v3035_v36 = vld [vmem:[%s4015_s1 + $0x1a8] sm:$0xff]   ;;  %v376_v49 = vld [vmem:[#allocation2 + $0x7a] sm:$0xff] }
  0x3a   : > { %v316_v20 = vld [vmem:[#allocation2 + $0xa8] sm:$0xff]  ;;  %v317_v21 = vld [vmem:[#allocation2 + $0xb0] sm:$0xff] }
  0x3b   : > { %1456 = vmatmul.mubr.bf16.gmra.mrb[8].mxu1 %v3223_v5  ;;  %2664 = vmatpush3.bf16.msra.mxu0 %v3021_v54  ;;  %v3406_v30 = vpack.c.bf16 %v317_v21, %v316_v20  ;;  %v267_v53 = vld [vmem:[%s3124_s8 + $0xf0] sm:$0xff] }
  0x3c   : > { %2550 = vmatpush3.bf16.msra.mxu1 %v3003_v6  ;;  %1463 = vmatprep.mubr.bf16.mxu1 %v727_v9  ;;  %v371_v6 = vld [vmem:[#allocation2 + $0x3a] sm:$0xff]  ;;  %v314_v9 = vld [vmem:[#allocation2 + $0x90] sm:$0xff]  ;;  %300 = vst [vmem:[#allocation2 + $0x181] sm:$0xff] %v267_v53 }
  0x3d   : > { %2551 = vmatprep.subr.bf16.mxu1 %v3004_v8  ;;  %2665 = vmatprep.subr.bf16.mxu0 %v3024_v0  ;;  %v3354_v8 = vld [vmem:[%s3124_s8 + $0x98] sm:$0xff]  ;;  %v3368_v13 = vpack.c.bf16 %v315_v10, %v314_v9  ;;  %v3370_v14 = vpack.c.bf16 %v371_v6, %v370_v3  ;;  %v318_v37 = vld [vmem:[#allocation2 + $0xc0] sm:$0xff] }
  0x3e   : > { %1368 = vmatmul.mubr.bf16.gmra.mrb[12].mxu0 %v3252_v22  ;;  %289 = vst [vmem:[#allocation2 + $0xf9] sm:$0xff] %v3354_v8  ;;  %v320_v54 = vld [vmem:[#allocation2 + $0xd8] sm:$0xff]  ;;  %v321_v55 = vld [vmem:[#allocation2 + $0xe0] sm:$0xff] }
  0x3f   : > { %1375 = vmatprep.mubr.bf16.mxu0 %v3262_v26  ;;  %2666 = vmatpush3.bf16.msra.mxu0 %v3025_v1  ;;  %v3450_v58 = vpack.c.bf16 %v321_v55, %v320_v54  ;;  %v378_v0 = vld [vmem:[#allocation2 + $0x92] sm:$0xff]  ;;  %v379_v6 = vld [vmem:[#allocation2 + $0x9a] sm:$0xff] }
  0x40   : > { %2552 = vmatpush3.bf16.msra.mxu1 %v3005_v12  ;;  %v3027_v12 = vld [vmem:[%s4015_s1 + $0x198] sm:$0xff]   ;;  %2667 = vmatprep.subr.bf16.mxu0 %v3028_v15  ;;  %v322_v1 = vld [vmem:[#allocation2 + $0xf0] sm:$0xff]  ;;  %v3464_v10 = vpack.c.bf16 %v379_v6, %v378_v0 }
  0x41   : > { %2553 = vmatprep.subr.bf16.mxu1 %v3006_v16  ;;  %v3377_v16 = vpack.c.bf16 %v3289_v40, %v3286_v39  ;;  %v375_v39 = vld [vmem:[#allocation2 + $0x6a] sm:$0xff]  ;;  %v381_v15 = vld [vmem:[#allocation2 + $0xb2] sm:$0xff]  ;;  %v395_v55 = vld [vmem:[#allocation2 + $0x15a] sm:$0xff] }
  0x42   : > { %v394_v54 = vld [vmem:[#allocation2 + $0x152] sm:$0xff] }
  0x43   : > { %1464 = vmatmul.mubr.bf16.gmra.mrb[12].mxu1 %v3254_v23  ;;  %2668 = vmatpush3.bf16.msra.mxu0 %v3029_v17 }
  0x44   : > { %2554 = vmatpush3.bf16.msra.mxu1 %v3008_v25  ;;  %1504 = vmatprep.mubr.bf16.mxu1 %v3193_v51  ;;  %v3313_v51 = vld [vmem:[%s3124_s8 + $0x78] sm:$0xff] }
  0x45   : > { %2555 = vmatprep.subr.bf16.mxu1 %v3010_v28  ;;  %285 = vst [vmem:[#allocation2 + $0xc9] sm:$0xff] %v3313_v51  ;;  %v373_v25 = vld [vmem:[#allocation2 + $0x52] sm:$0xff]  ;;  %v3400_v28 = vld [vmem:[%s4015_s1 + $0x200] sm:$0xff]   ;;  %v3412_v33 = vpack.c.bf16 %v3313_v51, %v3310_v50 }
  0x46   : > { %1376 = vmatmul.mubr.bf16.gmra.mrb[16].mxu0 %v3292_v41  ;;  %2901 = vmatprep.subr.bf16.mxu0 %v3400_v28  ;;  %v3408_v32 = vpack.c.bf16 %v373_v25, %v372_v24  ;;  %v377_v50 = vld [vmem:[#allocation2 + $0x82] sm:$0xff]  ;;  %v3041_v51 = vld [vmem:[%s4015_s1 + $0x1b8] sm:$0xff]  }
  0x47   : > { %1383 = vmatprep.mubr.bf16.mxu0 %v3298_v44  ;;  %v3452_v59 = vpack.c.bf16 %v377_v50, %v376_v49  ;;  %v323_v3 = vld [vmem:[#allocation2 + $0xf8] sm:$0xff]  ;;  %v3034_v25 = vld [vmem:[%s4015_s1 + $0x208] sm:$0xff]  }
  0x48   : > { %2556 = vmatpush3.bf16.msra.mxu1 %v3011_v29  ;;  %v3032_v29 = vld [vmem:[%s4015_s1 + $0x1a0] sm:$0xff]   ;;  %v3462_v9 = vpack.c.bf16 %v323_v3, %v322_v1  ;;  %v391_v49 = vld [vmem:[#allocation2 + $0x12a] sm:$0xff]  ;;  %v3542_v1 = vpack.c.bf16 %v395_v55, %v394_v54 }
  0x49   : > { %2765 = vmatprep.subr.bf16.mxu1 %v3012_v38  ;;  %v374_v38 = vld [vmem:[#allocation2 + $0x62] sm:$0xff]  ;;  %v396_v3 = vld [vmem:[#allocation2 + $0x16a] sm:$0xff] }
  0x4b   : > { %1505 = vmatmul.mubr.bf16.vlgmr.msra.gmra.mrb[16].mxu1 %v593_v42  ;;  %v3036_v42 = vld [vmem:[%s4015_s1 + $0x1f0] sm:$0xff]  }
  0x4c   : > { %2766 = vmatpush3.bf16.msra.mxu1 %v3013_v43  ;;  %1512 = vmatprep.mubr.bf16.mxu1 %v3221_v4  ;;  %v319_v40 = vld [vmem:[#allocation2 + $0xc8] sm:$0xff] }
  0x4d   : > { %2767 = vmatprep.subr.bf16.mxu1 %v3017_v45  ;;  %v3427_v43 = vpack.c.bf16 %v319_v40, %v318_v37  ;;  %v3429_v45 = vpack.c.bf16 %v375_v39, %v374_v38  ;;  %v3043_v38 = vld [vmem:[%s4015_s1 + $0x228] sm:$0xff]   ;;  %v389_v40 = vld [vmem:[#allocation2 + $0x112] sm:$0xff] }
  0x4e   : > { %1384 = vmatmul.mubr.bf16.gmra.mrb[20].mxu0 %v3332_v60  ;;  %v388_v39 = vld [vmem:[#allocation2 + $0x10a] sm:$0xff] }
  0x4f   : > { %1391 = vmatprep.mubr.bf16.mxu0 %v3342_v63 }
  0x50   : > { %2768 = vmatpush3.bf16.msra.mxu1 %v3019_v48  ;;  %v3039_v48 = vld [vmem:[%s4015_s1 + $0x1f8] sm:$0xff]  }
  0x51   : > { %2769 = vmatprep.subr.bf16.mxu1 %v3022_v57  ;;  %v268_v57 = vld [vmem:[%s3124_s8 + $0xf8] sm:$0xff] }
  0x52   : > { %301 = vst [vmem:[#allocation2 + $0x189] sm:$0xff] %v268_v57  ;;  %v3478_v21 = vpack.c.bf16 %v268_v57, %v267_v53  ;;  %v393_v53 = vld [vmem:[#allocation2 + $0x142] sm:$0xff] }
  0x53   : > { %1513 = vmatmul.mubr.bf16.gmra.mrb[20].mxu1 %v3334_v61  ;;  %v428_v57 = vld [vmem:[#allocation2 + $0x180] sm:$0xff] }
  0x54   : > { %1520 = vmatprep.mubr.bf16.mxu1 %v3252_v22  ;;  %2770 = vmatpush3.bf16.msra.mxu1 %v3023_v62  ;;  %v3456_v62 = vpack.c.bf16 %v3354_v8, %v3351_v2  ;;  %v3468_v2 = vpack.c.bf16 %v3386_v19, %v3383_v18  ;;  %v380_v8 = vld [vmem:[#allocation2 + $0xaa] sm:$0xff]  ;;  %v382_v18 = vld [vmem:[#allocation2 + $0xc2] sm:$0xff] }
  0x55   : > { %2771 = vmatprep.subr.bf16.mxu1 %v3026_v11  ;;  %v324_v11 = vld [vmem:[#allocation2 + $0x108] sm:$0xff]  ;;  %v3476_v20 = vpack.c.bf16 %v381_v15, %v380_v8 }
  0x56   : > { %1392 = vmatmul.mubr.bf16.gmra.mrb[24].mxu0 %v3368_v13  ;;  %v383_v19 = vld [vmem:[#allocation2 + $0xca] sm:$0xff] }
  0x57   : > { %1399 = vmatprep.mubr.bf16.mxu0 %v3377_v16  ;;  %v3484_v24 = vpack.c.bf16 %v383_v19, %v382_v18 }
  0x58   : > { %2772 = vmatpush3.bf16.msra.mxu1 %v3027_v12  ;;  %v325_v12 = vld [vmem:[#allocation2 + $0x110] sm:$0xff] }
  0x59   : > { %2773 = vmatprep.subr.bf16.mxu1 %v3030_v27  ;;  %v3474_v17 = vpack.c.bf16 %v325_v12, %v324_v11  ;;  %v384_v27 = vld [vmem:[#allocation2 + $0xda] sm:$0xff]  ;;  %v429_v0 = vld [vmem:[#allocation2 + $0x188] sm:$0xff] }
  0x5a   : > { %v492_v12 = vld [vmem:[#allocation2 + $0x182] sm:$0xff] }
  0x5b   : > { %1521 = vmatmul.mubr.bf16.gmra.mrb[24].mxu1 %v3370_v14 }
  0x5c   : > { %1528 = vmatprep.mubr.bf16.mxu1 %v3292_v41  ;;  %2774 = vmatpush3.bf16.msra.mxu1 %v3032_v29  ;;  %v385_v29 = vld [vmem:[#allocation2 + $0xe2] sm:$0xff] }
  0x5d   : > { %2775 = vmatprep.subr.bf16.mxu1 %v3033_v34  ;;  %v3497_v34 = vpack.c.bf16 %v385_v29, %v384_v27 }
  0x5e   : > { %1400 = vmatmul.mubr.bf16.gmra.mrb[28].mxu0 %v3406_v30 }
  0x5f   : > { %1407 = vmatprep.mubr.bf16.mxu0 %v3412_v33 }
  0x60   : > { %2776 = vmatpush3.bf16.msra.mxu1 %v3035_v36  ;;  %v3042_v36 = vld [vmem:[%s4015_s1 + $0x220] sm:$0xff]  }
  0x61   : > { %2777 = vmatprep.subr.bf16.mxu1 %v3036_v42  ;;  %v3044_v42 = vld [vmem:[%s4015_s1 + $0x230] sm:$0xff]  }
  0x63   : > { %1529 = vmatmul.mubr.bf16.gmra.mrb[28].mxu1 %v3408_v32 }
  0x64   : > { %1536 = vmatprep.mubr.bf16.mxu1 %v3332_v60  ;;  %2778 = vmatpush3.bf16.msra.mxu1 %v3038_v46  ;;  %v3521_v46 = vpack.c.bf16 %v389_v40, %v388_v39 }
  0x65   : > { %2779 = vmatprep.subr.bf16.mxu1 %v3039_v48  ;;  %v3045_v48 = vld [vmem:[%s4015_s1 + $0x238] sm:$0xff]  }
  0x66   : > { %1408 = vmatmul.mubr.bf16.gmra.mrb[32].mxu0 %v3427_v43 }
  0x67   : > { %1415 = vmatprep.mubr.bf16.mxu0 %v3436_v47 }
  0x68   : > { %2780 = vmatpush3.bf16.msra.mxu1 %v3041_v51  ;;  %v392_v51 = vld [vmem:[#allocation2 + $0x13a] sm:$0xff] }
  0x6b   : > { %1537 = vmatmul.mubr.bf16.gmra.mrb[32].mxu1 %v3429_v45 }
  0x6c   : > { %1544 = vmatprep.mubr.bf16.mxu1 %v3368_v13 }
  0x6e   : > { %1416 = vmatmul.mubr.bf16.gmra.mrb[36].mxu0 %v3450_v58 }
  0x6f   : > { %1423 = vmatprep.mubr.bf16.mxu0 %v3456_v62 }
  0x73   : > { %1545 = vmatmul.mubr.bf16.gmra.mrb[36].mxu1 %v3452_v59 }
  0x74   : > { %1552 = vmatprep.mubr.bf16.mxu1 %v3406_v30 }
  0x76   : > { %1424 = vmatmul.mubr.bf16.gmra.mrb[40].mxu0 %v3462_v9 }
  0x77   : > { %1431 = vmatprep.mubr.bf16.mxu0 %v3468_v2 }
  0x7b   : > { %1553 = vmatmul.mubr.bf16.gmra.mrb[40].mxu1 %v3464_v10 }
  0x7c   : > { %1560 = vmatprep.mubr.bf16.mxu1 %v3427_v43 }
  0x7e   : > { %1432 = vmatmul.mubr.bf16.gmra.mrb[44].mxu0 %v3474_v17 }
  0x7f   : > { %1665 = vmatprep.mubr.bf16.mxu0 %v3334_v61  ;;  %v3037_v61 = vld [vmem:[%s4015_s1 + $0x210] sm:$0xff]  }
  0x83   : > { %1561 = vmatmul.mubr.bf16.gmra.mrb[44].mxu1 %v3476_v20 }
  0x84   : > { %1568 = vmatprep.mubr.bf16.mxu1 %v3450_v58 }
  0x86   : > { %1666 = vmatmul.mubr.bf16.vlgmr.msra.gmra.mrb[48].mxu0 %v3170_v35  ;;  %v3040_v35 = vld [vmem:[%s4015_s1 + $0x218] sm:$0xff]  }
  0x87   : > { %2902 = vmatpush3.bf16.msra.mxu0 %v3400_v28  ;;  %1673 = vmatprep.mubr.bf16.mxu0 %v3370_v14  ;;  %v386_v14 = vld [vmem:[#allocation2 + $0xf2] sm:$0xff]  ;;  %v387_v28 = vld [vmem:[#allocation2 + $0xfa] sm:$0xff] }
  0x88   : > { %2903 = vmatprep.subr.bf16.mxu0 %v3034_v25  ;;  %v3509_v37 = vpack.c.bf16 %v387_v28, %v386_v14 }
  0x8b   : > { %1569 = vmatmul.mubr.bf16.gmra.mrb[48].mxu1 %v3484_v24  ;;  %2904 = vmatpush3.bf16.msra.mxu0 %v3034_v25 }
  0x8c   : > { %1576 = vmatprep.mubr.bf16.mxu1 %v3462_v9  ;;  %2905 = vmatprep.subr.bf16.mxu0 %v3037_v61 }
  0x8e   : > { %1674 = vmatmul.mubr.bf16.gmra.mrb[52].mxu0 %v3200_v56 }
  0x8f   : > { %1681 = vmatprep.mubr.bf16.mxu0 %v3408_v32  ;;  %2906 = vmatpush3.bf16.msra.mxu0 %v3037_v61 }
  0x90   : > { %2907 = vmatprep.subr.bf16.mxu0 %v3040_v35 }
  0x93   : > { %1577 = vmatmul.mubr.bf16.gmra.mrb[52].mxu1 %v3497_v34  ;;  %2908 = vmatpush3.bf16.msra.mxu0 %v3040_v35 }
  0x94   : > { %1584 = vmatprep.mubr.bf16.mxu1 %v3474_v17  ;;  %2909 = vmatprep.subr.bf16.mxu0 %v3042_v36 }
  0x96   : > { %1682 = vmatmul.mubr.bf16.gmra.mrb[56].mxu0 %v3228_v7 }
  0x97   : > { %1689 = vmatprep.mubr.bf16.mxu0 %v3429_v45  ;;  %2910 = vmatpush3.bf16.msra.mxu0 %v3042_v36 }
  0x98   : > { %2911 = vmatprep.subr.bf16.mxu0 %v3043_v38 }
  0x9b   : > { %1585 = vmatmul.mubr.bf16.gmra.mrb[56].mxu1 %v3509_v37  ;;  %2912 = vmatpush3.bf16.msra.mxu0 %v3043_v38 }
  0x9c   : > { %1592 = vmatprep.mubr.bf16.mxu1 %v3159_v31  ;;  %2913 = vmatprep.subr.bf16.mxu0 %v3044_v42  ;;  %v390_v31 = vld [vmem:[#allocation2 + $0x122] sm:$0xff] }
  0x9d   : > { %v3530_v50 = vpack.c.bf16 %v391_v49, %v390_v31 }
  0x9e   : > { %1690 = vmatmul.mubr.bf16.gmra.mrb[60].mxu0 %v3262_v26 }
  0x9f   : > { %1697 = vmatprep.mubr.bf16.mxu0 %v3452_v59  ;;  %2914 = vmatpush3.bf16.msra.mxu0 %v3044_v42 }
  0xa0   : > { %2915 = vmatprep.subr.bf16.mxu0 %v3045_v48 }
  0xa3   : > { %1593 = vmatmul.mubr.bf16.gmra.mrb[60].mxu1 %v3521_v46  ;;  %2916 = vmatpush3.bf16.msra.mxu0 %v3045_v48 }
  0xa4   : > { %1600 = vmatprep.mubr.bf16.mxu1 %v3195_v52  ;;  %v3536_v52 = vpack.c.bf16 %v393_v53, %v392_v51 }
  0xa6   : > { %1698 = vmatmul.mubr.bf16.gmra.mrb[64].mxu0 %v3298_v44 }
  0xa7   : > { %1705 = vmatprep.mubr.bf16.mxu0 %v3464_v10 }
  0xab   : > { %1601 = vmatmul.mubr.bf16.gmra.mrb[64].mxu1 %v3530_v50 }
  0xac   : > { %1608 = vmatprep.mubr.bf16.mxu1 %v3223_v5  ;;  %v3544_v5 = vpack.c.bf16 %v429_v0, %v428_v57 }
  0xae   : > { %1706 = vmatmul.mubr.bf16.gmra.mrb[68].mxu0 %v3342_v63 }
  0xaf   : > { %1713 = vmatprep.mubr.bf16.mxu0 %v3476_v20 }
  0xb3   : > { %1609 = vmatmul.mubr.bf16.gmra.mrb[68].mxu1 %v3536_v52 }
  0xb4   : > { %1616 = vmatprep.mubr.bf16.mxu1 %v3254_v23  ;;  %v397_v23 = vld [vmem:[#allocation2 + $0x172] sm:$0xff] }
  0xb5   : > { %v3550_v6 = vpack.c.bf16 %v397_v23, %v396_v3 }
  0xb6   : > { %1714 = vmatmul.mubr.bf16.gmra.mrb[72].mxu0 %v3377_v16 }
  0xb7   : > { %1721 = vmatprep.mubr.bf16.mxu0 %v3484_v24 }
  0xbb   : > { %1617 = vmatmul.mubr.bf16.gmra.mrb[72].mxu1 %v3542_v1 }
  0xbc   : > { %1624 = vmatprep.mubr.bf16.mxu1 %v3544_v5 }
  0xbe   : > { %1722 = vmatmul.mubr.bf16.gmra.mrb[76].mxu0 %v3412_v33 }
  0xbf   : > { %1729 = vmatprep.mubr.bf16.mxu0 %v3497_v34 }
  0xc3   : > { %1625 = vmatmul.mubr.bf16.gmra.mrb[76].mxu1 %v3550_v6 }
  0xc4   : > { %1826 = vmatprep.mubr.bf16.mxu1 %v3200_v56  ;;  %v452_v56 = vld [vmem:[#allocation2 + $0x121] sm:$0xff] }
  0xc6   : > { %1730 = vmatmul.mubr.bf16.gmra.mrb[80].mxu0 %v3436_v47 }
  0xc7   : > { %1737 = vmatprep.mubr.bf16.mxu0 %v3509_v37 }
  0xcb   : > { %1827 = vmatmul.mubr.bf16.vlgmr.msra.gmra.mrb[80].mxu1 %v3221_v4  ;;  %v453_v4 = vld [vmem:[#allocation2 + $0x129] sm:$0xff] }
  0xcc   : > { %1834 = vmatprep.mubr.bf16.mxu1 %v3228_v7  ;;  %v3568_v8 = vpack.c.bf16 %v453_v4, %v452_v56  ;;  %v454_v7 = vld [vmem:[#allocation2 + $0x139] sm:$0xff] }
  0xce   : > { %1738 = vmatmul.mubr.bf16.gmra.mrb[84].mxu0 %v3456_v62 }
  0xcf   : > { %1745 = vmatprep.mubr.bf16.mxu0 %v3521_v46 }
  0xd3   : > { %1835 = vmatmul.mubr.bf16.gmra.mrb[84].mxu1 %v3252_v22  ;;  %v455_v22 = vld [vmem:[#allocation2 + $0x141] sm:$0xff] }
  0xd4   : > { %1842 = vmatprep.mubr.bf16.mxu1 %v3262_v26  ;;  %v3574_v26 = vpack.c.bf16 %v455_v22, %v454_v7 }
  0xd6   : > { %1746 = vmatmul.mubr.bf16.gmra.mrb[88].mxu0 %v3468_v2 }
  0xd7   : > { %1753 = vmatprep.mubr.bf16.mxu0 %v3530_v50 }
  0xdb   : > { %1843 = vmatmul.mubr.bf16.gmra.mrb[88].mxu1 %v3292_v41  ;;  %v456_v41 = vld [vmem:[#allocation2 + $0x151] sm:$0xff] }
  0xdc   : > { %1850 = vmatprep.mubr.bf16.mxu1 %v3298_v44  ;;  %v457_v44 = vld [vmem:[#allocation2 + $0x159] sm:$0xff] }
  0xdd   : > { %v3580_v11 = vpack.c.bf16 %v457_v44, %v456_v41 }
  0xde   : > { %1754 = vmatmul.mubr.bf16.gmra.mrb[92].mxu0 %v3568_v8 }
  0xdf   : > { %1761 = vmatprep.mubr.bf16.mxu0 %v3536_v52 }
  0xe3   : > { %1851 = vmatmul.mubr.bf16.gmra.mrb[92].mxu1 %v3332_v60  ;;  %v458_v60 = vld [vmem:[#allocation2 + $0x169] sm:$0xff] }
  0xe4   : > { %1858 = vmatprep.mubr.bf16.mxu1 %v3342_v63  ;;  %v459_v63 = vld [vmem:[#allocation2 + $0x171] sm:$0xff] }
  0xe5   : > { %v3586_v15 = vpack.c.bf16 %v459_v63, %v458_v60 }
  0xe6   : > { %1762 = vmatmul.mubr.bf16.gmra.mrb[96].mxu0 %v3574_v26 }
  0xe7   : > { %1769 = vmatprep.mubr.bf16.mxu0 %v3542_v1 }
  0xeb   : > { %1859 = vmatmul.mubr.bf16.gmra.mrb[96].mxu1 %v3368_v13  ;;  %v493_v13 = vld [vmem:[#allocation2 + $0x18a] sm:$0xff] }
  0xec   : > { %1866 = vmatprep.mubr.bf16.mxu1 %v3377_v16  ;;  %v3588_v18 = vpack.c.bf16 %v493_v13, %v492_v12  ;;  %v559_v16 = vld [vmem:[#allocation2 + $0x32] sm:$0xff] }
  0xee   : > { %1770 = vmatmul.mubr.bf16.gmra.mrb[100].mxu0 %v3580_v11 }
  0xef   : > { %1777 = vmatprep.mubr.bf16.mxu0 %v3550_v6 }
  0xf3   : > { %1867 = vmatmul.mubr.bf16.gmra.mrb[100].mxu1 %v3406_v30  ;;  %v560_v30 = vld [vmem:[#allocation2 + $0x3a] sm:$0xff] }
  0xf4   : > { %1874 = vmatprep.mubr.bf16.mxu1 %v3412_v33  ;;  %v599_v28 = vpack.c.bf16 %v560_v30, %v559_v16 }
  0xf6   : > { %1778 = vmatmul.mubr.bf16.gmra.mrb[104].mxu0 %v3586_v15 }
  0xf7   : > { %1785 = vmatprep.mubr.bf16.mxu0 %v3588_v18 }
  0xf9   : > { %v2445_v19 = vpop.f32.mrb[0].mxu0 }
  0xfa   : > { %v2446_v25 = vpop.f32.mrb[1].mxu0 }
  0xfb   : > { %1875 = vmatmul.mubr.bf16.gmra.mrb[104].mxu1 %v3427_v43  ;;  %v3594_v29 = vadd.f32 %v2446_v25, %v2445_v19  ;;  %v2448_v35 = vpop.f32.mrb[2].mxu0 }
  0xfc   : > { %1882 = vmatprep.mubr.bf16.mxu1 %v3436_v47  ;;  %v2449_v36 = vpop.f32.mrb[3].mxu0 }
  0xfd   : > { %v3598_v43 = vadd.f32 %v2449_v36, %v2448_v35  ;;  %v518_v35 = vld [vmem:[#allocation2 + $0x140] sm:$0xff] }
  0xfe   : > { %v2517_v33 = vpop.f32.mrb[0].mxu1  ;;  %1786 = vmatmul.mubr.bf16.gmra.mrb[108].mxu0 %v3478_v21 }
  0xff   : > { %v2518_v27 = vpop.f32.mrb[1].mxu1  ;;  %2917 = vmatprep.mubr.bf16.mxu0 %v599_v28 }
 0x100   : > { %v3596_v61 = vadd.f32 %v2518_v27, %v2517_v33  ;;  %v2520_v14 = vpop.f32.mrb[2].mxu1 }
 0x101   : > { %v2521_v38 = vpop.f32.mrb[3].mxu1  ;;  %v2451_v47 = vpop.f32.mrb[4].mxu0 }
 0x102   : > { %v3600_v39 = vadd.f32 %v2521_v38, %v2520_v14  ;;  %v2452_v42 = vpop.f32.mrb[5].mxu0 }
 0x103   : > { %1883 = vmatmul.mubr.bf16.gmra.mrb[108].mxu1 %v3450_v58  ;;  %v3605_v31 = vadd.f32 %v2452_v42, %v2451_v47  ;;  %v2454_v51 = vpop.f32.mrb[6].mxu0 }
 0x104   : > { %1890 = vmatprep.mubr.bf16.mxu1 %v3456_v62  ;;  %v2455_v54 = vpop.f32.mrb[7].mxu0 }
 0x105   : > { %v3609_v57 = vadd.f32 %v2455_v54, %v2454_v51 }
 0x106   : > { %v2523_v40 = vpop.f32.mrb[4].mxu1  ;;  %2918 = vmatmul.mubr.bf16.vlgmr.msra.gmra.mrb[112].mxu0 %v3408_v32  ;;  %v515_v32 = vld [vmem:[#allocation2 + $0x120] sm:$0xff] }
 0x107   : > { %v2524_v48 = vpop.f32.mrb[5].mxu1  ;;  %2921 = vmatprep.mubr.bf16.mxu0 %v3429_v45  ;;  %v516_v45 = vld [vmem:[#allocation2 + $0x128] sm:$0xff] }
 0x108   : > { %v3607_v49 = vadd.f32 %v2524_v48, %v2523_v40  ;;  %v2526_v53 = vpop.f32.mrb[6].mxu1  ;;  %v687_v16 = vpack.c.bf16 %v516_v45, %v515_v32 }
 0x109   : > { %v2527_v55 = vpop.f32.mrb[7].mxu1  ;;  %v2457_v58 = vpop.f32.mrb[8].mxu0 }
 0x10a   : > { %v3611_v0 = vadd.f32 %v2527_v55, %v2526_v53  ;;  %v2458_v3 = vpop.f32.mrb[9].mxu0 }
 0x10b   : > { %1891 = vmatmul.mubr.bf16.gmra.mrb[112].mxu1 %v3462_v9  ;;  %v3617_v56 = vadd.f32 %v2458_v3, %v2457_v58  ;;  %v2460_v7 = vpop.f32.mrb[10].mxu0  ;;  %v519_v58 = vld [vmem:[#allocation2 + $0x150] sm:$0xff] }
 0x10c   : > { %1898 = vmatprep.mubr.bf16.mxu1 %v3468_v2  ;;  %v2461_v41 = vpop.f32.mrb[11].mxu0 }
 0x10d   : > { %v3621_v60 = vadd.f32 %v2461_v41, %v2460_v7 }
 0x10e   : > { %v2529_v62 = vpop.f32.mrb[8].mxu1  ;;  %2922 = vmatmul.mubr.bf16.gmra.mrb[116].mxu0 %v3452_v59 }
 0x10f   : > { %v2530_v23 = vpop.f32.mrb[9].mxu1  ;;  %2925 = vmatprep.mubr.bf16.mxu0 %v3464_v10  ;;  %v517_v10 = vld [vmem:[#allocation2 + $0x138] sm:$0xff] }
 0x110   : > { %v3619_v4 = vadd.f32 %v2530_v23, %v2529_v62  ;;  %v2532_v22 = vpop.f32.mrb[10].mxu1  ;;  %v696_v47 = vpack.c.bf16 %v518_v35, %v517_v10  ;;  %v520_v62 = vld [vmem:[#allocation2 + $0x158] sm:$0xff] }
 0x111   : > { %v2533_v44 = vpop.f32.mrb[11].mxu1  ;;  %v2463_v2 = vpop.f32.mrb[12].mxu0 }
 0x112   : > { %v3623_v9 = vadd.f32 %v2533_v44, %v2532_v22  ;;  %v2464_v12 = vpop.f32.mrb[13].mxu0  ;;  %v705_v22 = vpack.c.bf16 %v520_v62, %v519_v58 }
 0x113   : > { %1899 = vmatmul.mubr.bf16.gmra.mrb[116].mxu1 %v3474_v17  ;;  %v3629_v30 = vadd.f32 %v2464_v12, %v2463_v2  ;;  %v2466_v33 = vpop.f32.mrb[14].mxu0  ;;  %v521_v12 = vld [vmem:[#allocation2 + $0x168] sm:$0xff] }
 0x114   : > { %1906 = vmatprep.mubr.bf16.mxu1 %v3568_v8  ;;  %v2467_v17 = vpop.f32.mrb[15].mxu0 }
 0x115   : > { %v3633_v59 = vadd.f32 %v2467_v17, %v2466_v33 }
 0x116   : > { %v2535_v63 = vpop.f32.mrb[12].mxu1  ;;  %2926 = vmatmul.mubr.bf16.gmra.mrb[120].mxu0 %v3476_v20 }
 0x117   : > { %v2536_v13 = vpop.f32.mrb[13].mxu1  ;;  %2929 = vmatprep.mubr.bf16.mxu0 %v3484_v24 }
 0x118   : > { %v3631_v19 = vadd.f32 %v2536_v13, %v2535_v63  ;;  %v2538_v25 = vpop.f32.mrb[14].mxu1  ;;  %v522_v13 = vld [vmem:[#allocation2 + $0x170] sm:$0xff] }
 0x119   : > { %v2539_v27 = vpop.f32.mrb[15].mxu1  ;;  %v2469_v14 = vpop.f32.mrb[16].mxu0  ;;  %v714_v17 = vpack.c.bf16 %v522_v13, %v521_v12 }
 0x11a   : > { %v3635_v8 = vadd.f32 %v2539_v27, %v2538_v25  ;;  %v2470_v36 = vpop.f32.mrb[17].mxu0 }
 0x11b   : > { %1907 = vmatmul.mubr.bf16.gmra.mrb[120].mxu1 %v687_v16  ;;  %v3640_v40 = vadd.f32 %v2470_v36, %v2469_v14  ;;  %v2472_v48 = vpop.f32.mrb[18].mxu0 }
 0x11c   : > { %1914 = vmatprep.mubr.bf16.mxu1 %v3574_v26  ;;  %v2473_v53 = vpop.f32.mrb[19].mxu0 }
 0x11d   : > { %v3645_v26 = vadd.f32 %v2473_v53, %v2472_v48 }
 0x11e   : > { %v2557_v28 = vpop.f32.mrb[16].mxu1  ;;  %2930 = vmatmul.mubr.bf16.gmra.mrb[124].mxu0 %v3497_v34 }
 0x11f   : > { %v2558_v38 = vpop.f32.mrb[17].mxu1  ;;  %2933 = vmatprep.mubr.bf16.mxu0 %v3509_v37 }
 0x120   : > { %v2559_v42 = vadd.f32 %v2558_v38, %v2557_v28  ;;  %v2560_v51 = vpop.f32.mrb[18].mxu1  ;;  %v557_v38 = vld [vmem:[#allocation2 + $0x199] sm:$0xff] }
 0x121   : > { %v2561_v54 = vpop.f32.mrb[19].mxu1  ;;  %v2475_v3 = vpop.f32.mrb[20].mxu0 }
 0x122   : > { %v3643_v20 = vadd.f32 %v2559_v42, %v3594_v29  ;;  %v2562_v24 = vadd.f32 %v2561_v54, %v2560_v51  ;;  %v2476_v7 = vpop.f32.mrb[21].mxu0 }
 0x123   : > { %1915 = vmatmul.mubr.bf16.gmra.mrb[124].mxu1 %v696_v47  ;;  %v3653_v41 = vadd.f32 %v2476_v7, %v2475_v3  ;;  %v2478_v32 = vpop.f32.mrb[22].mxu0  ;;  %v558_v47 = vld [vmem:[#allocation2 + $0x1a1] sm:$0xff] }
 0x124   : > { %v3649_v55 = vadd.f32 %v2562_v24, %v3598_v43  ;;  %1922 = vmatprep.mubr.bf16.mxu1 %v3580_v11  ;;  %v2479_v34 = vpop.f32.mrb[23].mxu0  ;;  %v733_v62 = vpack.c.bf16 %v558_v47, %v557_v38  ;;  %v589_v7 = vld [vmem:[#allocation2 + $0x19a] sm:$0xff] }
 0x125   : > { %v3658_v11 = vadd.f32 %v2479_v34, %v2478_v32 }
 0x126   : > { %v2563_v23 = vpop.f32.mrb[20].mxu1  ;;  %2934 = vmatmul.mubr.bf16.gmra.mrb[128].mxu0 %v3521_v46 }
 0x127   : > { %v2564_v29 = vpop.f32.mrb[21].mxu1  ;;  %2937 = vmatprep.mubr.bf16.mxu0 %v3530_v50 }
 0x128   : > { %v2565_v44 = vadd.f32 %v2564_v29, %v2563_v23  ;;  %v2566_v45 = vpop.f32.mrb[22].mxu1  ;;  %v590_v29 = vld [vmem:[#allocation2 + $0x1a2] sm:$0xff] }
 0x129   : > { %v2567_v2 = vpop.f32.mrb[23].mxu1  ;;  %v2481_v16 = vpop.f32.mrb[24].mxu0 }
 0x12a   : > { %v3656_v43 = vadd.f32 %v2565_v44, %v3605_v31  ;;  %v2568_v37 = vadd.f32 %v2567_v2, %v2566_v45  ;;  %v2482_v25 = vpop.f32.mrb[25].mxu0  ;;  %v3046_v45 = vld [vmem:[#allocation2] sm:$0xff]  ;;  %v734_v2 = vpack.c.bf16 %v590_v29, %v589_v7 }
 0x12b   : > { %1923 = vmatmul.mubr.bf16.gmra.mrb[128].mxu1 %v705_v22  ;;  %v3666_v27 = vadd.f32 %v2482_v25, %v2481_v16  ;;  %v2484_v35 = vpop.f32.mrb[26].mxu0  ;;  %v732_v34 = vpack.c.bf16 %v3046_v45, %v3046_v45 }
 0x12c   : > { %v3662_v63 = vadd.f32 %v2568_v37, %v3609_v57  ;;  %1930 = vmatprep.mubr.bf16.mxu1 %v3586_v15  ;;  %v2485_v46 = vpop.f32.mrb[27].mxu0 }
 0x12d   : > { %v3671_v15 = vadd.f32 %v2485_v46, %v2484_v35 }
 0x12e   : > { %v2569_v33 = vpop.f32.mrb[24].mxu1  ;;  %2938 = vmatmul.mubr.bf16.gmra.mrb[132].mxu0 %v3536_v52 }
 0x12f   : > { %v2570_v31 = vpop.f32.mrb[25].mxu1  ;;  %2941 = vmatprep.mubr.bf16.mxu0 %v3542_v1 }
 0x130   : > { %v2571_v10 = vadd.f32 %v2570_v31, %v2569_v33  ;;  %v2572_v14 = vpop.f32.mrb[26].mxu1 }
 0x131   : > { %v2573_v28 = vpop.f32.mrb[27].mxu1  ;;  %v2487_v42 = vpop.f32.mrb[28].mxu0 }
 0x132   : > { %v3669_v57 = vadd.f32 %v2571_v10, %v3617_v56  ;;  %v2574_v50 = vadd.f32 %v2573_v28, %v2572_v14  ;;  %v2488_v51 = vpop.f32.mrb[29].mxu0 }
 0x133   : > { %1931 = vmatmul.mubr.bf16.gmra.mrb[132].mxu1 %v714_v17  ;;  %v3679_v53 = vadd.f32 %v2488_v51, %v2487_v42  ;;  %v2490_v24 = vpop.f32.mrb[30].mxu0 }
 0x134   : > { %v3675_v36 = vadd.f32 %v2574_v50, %v3621_v60  ;;  %1938 = vmatprep.mubr.bf16.mxu1 %v3478_v21  ;;  %v2491_v52 = vpop.f32.mrb[31].mxu0 }
 0x135   : > { %v3684_v21 = vadd.f32 %v2491_v52, %v2490_v24 }
 0x136   : > { %v2575_v48 = vpop.f32.mrb[28].mxu1  ;;  %2942 = vmatmul.mubr.bf16.gmra.mrb[136].mxu0 %v3550_v6 }
 0x137   : > { %v2576_v56 = vpop.f32.mrb[29].mxu1  ;;  %2945 = vmatprep.mubr.bf16.mxu0 %v3588_v18 }
 0x138   : > { %v2577_v54 = vadd.f32 %v2576_v56, %v2575_v48  ;;  %v2578_v58 = vpop.f32.mrb[30].mxu1 }
 0x139   : > { %v2579_v3 = vpop.f32.mrb[31].mxu1  ;;  %v2493_v22 = vpop.f32.mrb[32].mxu0 }
 0x13a   : > { %v3682_v60 = vadd.f32 %v2577_v54, %v3629_v30  ;;  %v2580_v1 = vadd.f32 %v2579_v3, %v2578_v58  ;;  %v2494_v32 = vpop.f32.mrb[33].mxu0 }
 0x13b   : > { %1939 = vmatmul.mubr.bf16.gmra.mrb[136].mxu1 %v3544_v5  ;;  %v3692_v37 = vadd.f32 %v2494_v32, %v2493_v22  ;;  %v2496_v12 = vpop.f32.mrb[34].mxu0 }
 0x13c   : > { %v3689_v23 = vadd.f32 %v2580_v1, %v3633_v59  ;;  %1946 = vmatprep.mubr.bf16.mxu1 %v733_v62  ;;  %v2497_v13 = vpop.f32.mrb[35].mxu0 }
 0x13d   : > { %v2498_v18 = vadd.f32 %v2497_v13, %v2496_v12 }
 0x13e   : > { %v2581_v44 = vpop.f32.mrb[32].mxu1  ;;  %2946 = vmatmul.mubr.bf16.gmra.mrb[140].mxu0 %v734_v2 }
 0x13f   : > { %v2582_v30 = vpop.f32.mrb[33].mxu1 }
 0x140   : > { %v2583_v5 = vadd.f32 %v2582_v30, %v2581_v44  ;;  %v2584_v6 = vpop.f32.mrb[34].mxu1 }
 0x141   : > { %v2585_v59 = vpop.f32.mrb[35].mxu1  ;;  %v2499_v31 = vpop.f32.mrb[36].mxu0 }
 0x142   : > { %v3695_v16 = vadd.f32 %v2583_v5, %v3640_v40  ;;  %v2586_v33 = vadd.f32 %v2585_v59, %v2584_v6  ;;  %v2500_v10 = vpop.f32.mrb[37].mxu0 }
 0x143   : > { %1947 = vmatmul.mubr.bf16.gmra.mrb[140].mxu1 %v732_v34  ;;  %v3700_v14 = vadd.f32 %v2500_v10, %v2499_v31  ;;  %v2502_v28 = vpop.f32.mrb[38].mxu0 }
 0x144   : > { %v3698_v25 = vadd.f32 %v2586_v33, %v3645_v26  ;;  %v2503_v38 = vpop.f32.mrb[39].mxu0 }
 0x145   : > { %v2504_v42 = vadd.f32 %v2503_v38, %v2502_v28 }
 0x146   : > { %v2587_v17 = vpop.f32.mrb[36].mxu1 }
 0x147   : > { %v2588_v35 = vpop.f32.mrb[37].mxu1 }
 0x148   : > { %v2589_v46 = vadd.f32 %v2588_v35, %v2587_v17  ;;  %v2590_v50 = vpop.f32.mrb[38].mxu1 }
 0x149   : > { %v2591_v47 = vpop.f32.mrb[39].mxu1  ;;  %v2505_v26 = vpop.f32.mrb[40].mxu0 }
 0x14a   : > { %v3703_v40 = vadd.f32 %v2589_v46, %v3653_v41  ;;  %v2592_v48 = vadd.f32 %v2591_v47, %v2590_v50  ;;  %v2506_v54 = vpop.f32.mrb[41].mxu0 }
 0x14b   : > { %v3708_v58 = vadd.f32 %v2506_v54, %v2505_v26  ;;  %v2508_v52 = vpop.f32.mrb[42].mxu0 }
 0x14c   : > { %v3706_v51 = vadd.f32 %v2592_v48, %v3658_v11  ;;  %v2509_v1 = vpop.f32.mrb[43].mxu0 }
 0x14d   : > { %v3713_v41 = vadd.f32 %v2509_v1, %v2508_v52 }
 0x14e   : > { %v2593_v56 = vpop.f32.mrb[40].mxu1 }
 0x14f   : > { %v2594_v24 = vpop.f32.mrb[41].mxu1 }
 0x150   : > { %v2595_v62 = vadd.f32 %v2594_v24, %v2593_v56  ;;  %v2596_v3 = vpop.f32.mrb[42].mxu1 }
 0x151   : > { %v2597_v7 = vpop.f32.mrb[43].mxu1  ;;  %v2511_v44 = vpop.f32.mrb[44].mxu0 }
 0x152   : > { %v3711_v29 = vadd.f32 %v2595_v62, %v3666_v27  ;;  %v2598_v22 = vadd.f32 %v2597_v7, %v2596_v3  ;;  %v2512_v30 = vpop.f32.mrb[45].mxu0 }
 0x153   : > { %v3718_v34 = vadd.f32 %v2512_v30, %v2511_v44  ;;  %v2514_v5 = vpop.f32.mrb[46].mxu0 }
 0x154   : > { %v3716_v11 = vadd.f32 %v2598_v22, %v3671_v15  ;;  %v2515_v6 = vpop.f32.mrb[47].mxu0 }
 0x155   : > { %v3723_v59 = vadd.f32 %v2515_v6, %v2514_v5 }
 0x156   : > { %v2599_v32 = vpop.f32.mrb[44].mxu1 }
 0x157   : > { %v2600_v45 = vpop.f32.mrb[45].mxu1 }
 0x158   : > { %v2601_v2 = vadd.f32 %v2600_v45, %v2599_v32  ;;  %v2602_v12 = vpop.f32.mrb[46].mxu1 }
 0x159   : > { %v2603_v13 = vpop.f32.mrb[47].mxu1  ;;  %v2669_v17 = vpop.f32.mrb[48].mxu0 }
 0x15a   : > { %v3721_v27 = vadd.f32 %v2601_v2, %v3679_v53  ;;  %v2604_v33 = vadd.f32 %v2603_v13, %v2602_v12  ;;  %v2670_v35 = vpop.f32.mrb[49].mxu0 }
 0x15b   : > { %v2671_v28 = vadd.f32 %v2670_v35, %v2669_v17  ;;  %v2672_v38 = vpop.f32.mrb[50].mxu0 }
 0x15c   : > { %v3726_v15 = vadd.f32 %v2604_v33, %v3684_v21  ;;  %v2673_v48 = vpop.f32.mrb[51].mxu0 }
 0x15d   : > { %v3732_v53 = vadd.f32 %v2671_v28, %v3643_v20  ;;  %v2674_v54 = vadd.f32 %v2673_v48, %v2672_v38 }
 0x15e   : > { %v2605_v31 = vpop.f32.mrb[48].mxu1 }
 0x15f   : > { %v2606_v10 = vpop.f32.mrb[49].mxu1  ;;  %v3737_v24 = vadd.f32 %v2674_v54, %v3649_v55 }
 0x160   : > { %v2607_v46 = vadd.f32 %v2606_v10, %v2605_v31  ;;  %v2608_v50 = vpop.f32.mrb[50].mxu1 }
 0x161   : > { %v2609_v47 = vpop.f32.mrb[51].mxu1  ;;  %v2675_v52 = vpop.f32.mrb[52].mxu0 }
 0x162   : > { %v3729_v26 = vadd.f32 %v2607_v46, %v3692_v37  ;;  %v2610_v56 = vadd.f32 %v2609_v47, %v2608_v50  ;;  %v2676_v1 = vpop.f32.mrb[53].mxu0 }
 0x163   : > { %v2677_v22 = vadd.f32 %v2676_v1, %v2675_v52  ;;  %v2678_v32 = vpop.f32.mrb[54].mxu0 }
 0x164   : > { %v3734_v21 = vadd.f32 %v2610_v56, %v2498_v18  ;;  %v2679_v30 = vpop.f32.mrb[55].mxu0 }
 0x165   : > { %v3743_v45 = vadd.f32 %v2677_v22, %v3656_v43  ;;  %v2680_v2 = vadd.f32 %v2679_v30, %v2678_v32 }
 0x166   : > { %v2611_v62 = vpop.f32.mrb[52].mxu1 }
 0x167   : > { %v2612_v3 = vpop.f32.mrb[53].mxu1  ;;  %v3748_v5 = vadd.f32 %v2680_v2, %v3662_v63 }
 0x168   : > { %v2613_v7 = vadd.f32 %v2612_v3, %v2611_v62  ;;  %v2614_v44 = vpop.f32.mrb[54].mxu1 }
 0x169   : > { %v2615_v37 = vpop.f32.mrb[55].mxu1  ;;  %v2681_v6 = vpop.f32.mrb[56].mxu0 }
 0x16a   : > { %v3740_v20 = vadd.f32 %v2613_v7, %v3700_v14  ;;  %v2616_v18 = vadd.f32 %v2615_v37, %v2614_v44  ;;  %v2682_v33 = vpop.f32.mrb[57].mxu0 }
 0x16b   : > { %v2683_v17 = vadd.f32 %v2682_v33, %v2681_v6  ;;  %v2684_v35 = vpop.f32.mrb[58].mxu0 }
 0x16c   : > { %v3745_v55 = vadd.f32 %v2616_v18, %v2504_v42  ;;  %v2685_v46 = vpop.f32.mrb[59].mxu0 }
 0x16d   : > { %v3754_v28 = vadd.f32 %v2683_v17, %v3669_v57  ;;  %v2686_v50 = vadd.f32 %v2685_v46, %v2684_v35 }
 0x16e   : > { %v2617_v12 = vpop.f32.mrb[56].mxu1 }
 0x16f   : > { %v2618_v13 = vpop.f32.mrb[57].mxu1  ;;  %v3760_v38 = vadd.f32 %v2686_v50, %v3675_v36 }
 0x170   : > { %v2619_v31 = vadd.f32 %v2618_v13, %v2617_v12  ;;  %v2620_v10 = vpop.f32.mrb[58].mxu1 }
 0x171   : > { %v2621_v14 = vpop.f32.mrb[59].mxu1  ;;  %v2687_v48 = vpop.f32.mrb[60].mxu0 }
 0x172   : > { %v3751_v43 = vadd.f32 %v2619_v31, %v3708_v58  ;;  %v2622_v42 = vadd.f32 %v2621_v14, %v2620_v10  ;;  %v2688_v54 = vpop.f32.mrb[61].mxu0 }
 0x173   : > { %v2689_v52 = vadd.f32 %v2688_v54, %v2687_v48  ;;  %v2690_v58 = vpop.f32.mrb[62].mxu0 }
 0x174   : > { %v3757_v63 = vadd.f32 %v2622_v42, %v3713_v41  ;;  %v2691_v7 = vpop.f32.mrb[63].mxu0 }
 0x175   : > { %v3766_v22 = vadd.f32 %v2689_v52, %v3682_v60  ;;  %v2692_v44 = vadd.f32 %v2691_v7, %v2690_v58 }
 0x176   : > { %v2623_v47 = vpop.f32.mrb[60].mxu1 }
 0x177   : > { %v2624_v56 = vpop.f32.mrb[61].mxu1  ;;  %v3772_v32 = vadd.f32 %v2692_v44, %v3689_v23 }
 0x178   : > { %v2625_v62 = vadd.f32 %v2624_v56, %v2623_v47  ;;  %v2626_v3 = vpop.f32.mrb[62].mxu1 }
 0x179   : > { %v2627_v1 = vpop.f32.mrb[63].mxu1  ;;  %v2693_v30 = vpop.f32.mrb[64].mxu0 }
 0x17a   : > { %v3763_v57 = vadd.f32 %v2625_v62, %v3718_v34  ;;  %v2628_v41 = vadd.f32 %v2627_v1, %v2626_v3  ;;  %v2694_v2 = vpop.f32.mrb[65].mxu0 }
 0x17b   : > { %v2695_v6 = vadd.f32 %v2694_v2, %v2693_v30  ;;  %v2696_v34 = vpop.f32.mrb[66].mxu0 }
 0x17c   : > { %v3769_v36 = vadd.f32 %v2628_v41, %v3723_v59  ;;  %v2697_v31 = vpop.f32.mrb[67].mxu0 }
 0x17d   : > { %v3778_v17 = vadd.f32 %v2695_v6, %v3695_v16  ;;  %v2698_v10 = vadd.f32 %v2697_v31, %v2696_v34 }
 0x17e   : > { %v2629_v37 = vpop.f32.mrb[64].mxu1 }
 0x17f   : > { %v2630_v18 = vpop.f32.mrb[65].mxu1  ;;  %v3784_v35 = vadd.f32 %v2698_v10, %v3698_v25 }
 0x180   : > { %v2631_v12 = vadd.f32 %v2630_v18, %v2629_v37  ;;  %v2632_v13 = vpop.f32.mrb[66].mxu1 }
 0x181   : > { %v2633_v33 = vpop.f32.mrb[67].mxu1  ;;  %v2699_v46 = vpop.f32.mrb[68].mxu0 }
 0x182   : > { %v3775_v60 = vadd.f32 %v2631_v12, %v3596_v61  ;;  %v2634_v59 = vadd.f32 %v2633_v33, %v2632_v13  ;;  %v2700_v50 = vpop.f32.mrb[69].mxu0 }
 0x183   : > { %v2701_v48 = vadd.f32 %v2700_v50, %v2699_v46  ;;  %v2702_v61 = vpop.f32.mrb[70].mxu0 }
 0x184   : > { %v3781_v23 = vadd.f32 %v2634_v59, %v3600_v39  ;;  %v2703_v62 = vpop.f32.mrb[71].mxu0 }
 0x185   : > { %v3790_v52 = vadd.f32 %v2701_v48, %v3703_v40  ;;  %v2704_v3 = vadd.f32 %v2703_v62, %v2702_v61 }
 0x186   : > { %v2635_v14 = vpop.f32.mrb[68].mxu1 }
 0x187   : > { %v2636_v42 = vpop.f32.mrb[69].mxu1  ;;  %v3796_v58 = vadd.f32 %v2704_v3, %v3706_v51 }
 0x188   : > { %v2637_v47 = vadd.f32 %v2636_v42, %v2635_v14  ;;  %v2638_v56 = vpop.f32.mrb[70].mxu1 }
 0x189   : > { %v2639_v54 = vpop.f32.mrb[71].mxu1  ;;  %v2705_v7 = vpop.f32.mrb[72].mxu0 }
 0x18a   : > { %v3787_v16 = vadd.f32 %v2637_v47, %v3607_v49  ;;  %v2640_v39 = vadd.f32 %v2639_v54, %v2638_v56  ;;  %v2706_v44 = vpop.f32.mrb[73].mxu0 }
 0x18b   : > { %v2707_v30 = vadd.f32 %v2706_v44, %v2705_v7  ;;  %v2708_v49 = vpop.f32.mrb[74].mxu0 }
 0x18c   : > { %v3793_v25 = vadd.f32 %v2640_v39, %v3611_v0  ;;  %v2709_v12 = vpop.f32.mrb[75].mxu0 }
 0x18d   : > { %v3802_v6 = vadd.f32 %v2707_v30, %v3711_v29  ;;  %v2710_v13 = vadd.f32 %v2709_v12, %v2708_v49 }
 0x18e   : > { %v2641_v1 = vpop.f32.mrb[72].mxu1 }
 0x18f   : > { %v2642_v41 = vpop.f32.mrb[73].mxu1  ;;  %v3808_v34 = vadd.f32 %v2710_v13, %v3716_v11 }
 0x190   : > { %v2643_v37 = vadd.f32 %v2642_v41, %v2641_v1  ;;  %v2644_v18 = vpop.f32.mrb[74].mxu1 }
 0x191   : > { %v2645_v2 = vpop.f32.mrb[75].mxu1  ;;  %v2711_v31 = vpop.f32.mrb[76].mxu0 }
 0x192   : > { %v3799_v40 = vadd.f32 %v2643_v37, %v3619_v4  ;;  %v2646_v0 = vadd.f32 %v2645_v2, %v2644_v18  ;;  %v2712_v10 = vpop.f32.mrb[77].mxu0 }
 0x193   : > { %v2713_v46 = vadd.f32 %v2712_v10, %v2711_v31  ;;  %v2714_v4 = vpop.f32.mrb[78].mxu0 }
 0x194   : > { %v3805_v51 = vadd.f32 %v2646_v0, %v3623_v9  ;;  %v2715_v47 = vpop.f32.mrb[79].mxu0 }
 0x195   : > { %v3814_v48 = vadd.f32 %v2713_v46, %v3721_v27  ;;  %v2716_v56 = vadd.f32 %v2715_v47, %v2714_v4 }
 0x196   : > { %v2647_v33 = vpop.f32.mrb[76].mxu1 }
 0x197   : > { %v2648_v59 = vpop.f32.mrb[77].mxu1  ;;  %v3820_v61 = vadd.f32 %v2716_v56, %v3726_v15 }
 0x198   : > { %v2649_v14 = vadd.f32 %v2648_v59, %v2647_v33  ;;  %v2650_v42 = vpop.f32.mrb[78].mxu1 }
 0x199   : > { %v2651_v50 = vpop.f32.mrb[79].mxu1  ;;  %v2717_v54 = vpop.f32.mrb[80].mxu0 }
 0x19a   : > { %v3811_v29 = vadd.f32 %v2649_v14, %v3631_v19  ;;  %v2652_v9 = vadd.f32 %v2651_v50, %v2650_v42  ;;  %v2718_v39 = vpop.f32.mrb[81].mxu0 }
 0x19b   : > { %v2719_v1 = vadd.f32 %v2718_v39, %v2717_v54  ;;  %v2720_v41 = vpop.f32.mrb[82].mxu0 }
 0x19c   : > { %v3817_v11 = vadd.f32 %v2652_v9, %v3635_v8  ;;  %v2721_v44 = vpop.f32.mrb[83].mxu0 }
 0x19d   : > { %v3823_v27 = vadd.f32 %v2719_v1, %v3729_v26  ;;  %v2722_v30 = vadd.f32 %v2721_v44, %v2720_v41 }
 0x19e   : > { %v2781_v62 = vpop.f32.mrb[80].mxu1 }
 0x19f   : > { %v2782_v3 = vpop.f32.mrb[81].mxu1  ;;  %v3829_v15 = vadd.f32 %v2722_v30, %v3734_v21 }
 0x1a0   : > { %v2783_v7 = vadd.f32 %v2782_v3, %v2781_v62  ;;  %v2784_v19 = vpop.f32.mrb[82].mxu1 }
 0x1a1   : > { %v2785_v37 = vpop.f32.mrb[83].mxu1  ;;  %v2723_v2 = vpop.f32.mrb[84].mxu0 }
 0x1a2   : > { %v2786_v18 = vadd.f32 %v2785_v37, %v2784_v19  ;;  %v3826_v8 = vadd.f32 %v2783_v7, %v3732_v53  ;;  %v2724_v0 = vpop.f32.mrb[85].mxu0 }
 0x1a3   : > { %v2725_v33 = vadd.f32 %v2724_v0, %v2723_v2  ;;  %v2726_v59 = vpop.f32.mrb[86].mxu0 }
 0x1a4   : > { %v3832_v49 = vadd.f32 %v2786_v18, %v3737_v24  ;;  %v2727_v10 = vpop.f32.mrb[87].mxu0 }
 0x1a5   : > { %v3835_v46 = vadd.f32 %v2725_v33, %v3740_v20  ;;  %v2728_v53 = vadd.f32 %v2727_v10, %v2726_v59 }
 0x1a6   : > { %v2787_v12 = vpop.f32.mrb[84].mxu1 }
 0x1a7   : > { %v2788_v13 = vpop.f32.mrb[85].mxu1  ;;  %v3841_v24 = vadd.f32 %v2728_v53, %v3745_v55 }
 0x1a8   : > { %v2789_v31 = vadd.f32 %v2788_v13, %v2787_v12  ;;  %v2790_v26 = vpop.f32.mrb[86].mxu1 }
 0x1a9   : > { %v2791_v14 = vpop.f32.mrb[87].mxu1  ;;  %v2729_v50 = vpop.f32.mrb[88].mxu0 }
 0x1aa   : > { %v2792_v42 = vadd.f32 %v2791_v14, %v2790_v26  ;;  %v3838_v21 = vadd.f32 %v2789_v31, %v3743_v45  ;;  %v2730_v9 = vpop.f32.mrb[89].mxu0 }
 0x1ab   : > { %v2731_v54 = vadd.f32 %v2730_v9, %v2729_v50  ;;  %v2732_v39 = vpop.f32.mrb[90].mxu0 }
 0x1ac   : > { %v3844_v4 = vadd.f32 %v2792_v42, %v3748_v5  ;;  %v2733_v3 = vpop.f32.mrb[91].mxu0 }
 0x1ad   : > { %v3847_v7 = vadd.f32 %v2731_v54, %v3751_v43  ;;  %v2734_v45 = vadd.f32 %v2733_v3, %v2732_v39 }
 0x1ae   : > { %v2793_v47 = vpop.f32.mrb[88].mxu1 }
 0x1af   : > { %v2794_v56 = vpop.f32.mrb[89].mxu1  ;;  %v3853_v5 = vadd.f32 %v2734_v45, %v3757_v63 }
 0x1b0   : > { %v2795_v62 = vadd.f32 %v2794_v56, %v2793_v47  ;;  %v2796_v20 = vpop.f32.mrb[90].mxu1 }
 0x1b1   : > { %v2797_v1 = vpop.f32.mrb[91].mxu1  ;;  %v2735_v44 = vpop.f32.mrb[92].mxu0 }
 0x1b2   : > { %v2798_v41 = vadd.f32 %v2797_v1, %v2796_v20  ;;  %v3850_v55 = vadd.f32 %v2795_v62, %v3754_v28  ;;  %v2736_v30 = vpop.f32.mrb[93].mxu0 }
 0x1b3   : > { %v2737_v2 = vadd.f32 %v2736_v30, %v2735_v44  ;;  %v2738_v0 = vpop.f32.mrb[94].mxu0 }
 0x1b4   : > { %v3856_v19 = vadd.f32 %v2798_v41, %v3760_v38  ;;  %v2739_v13 = vpop.f32.mrb[95].mxu0 }
 0x1b5   : > { %v3859_v31 = vadd.f32 %v2737_v2, %v3763_v57  ;;  %v2740_v28 = vadd.f32 %v2739_v13, %v2738_v0 }
 0x1b6   : > { %v2799_v37 = vpop.f32.mrb[92].mxu1 }
 0x1b7   : > { %v2800_v18 = vpop.f32.mrb[93].mxu1  ;;  %v3865_v38 = vadd.f32 %v2740_v28, %v3769_v36 }
 0x1b8   : > { %v2801_v12 = vadd.f32 %v2800_v18, %v2799_v37  ;;  %v2802_v43 = vpop.f32.mrb[94].mxu1 }
 0x1b9   : > { %v2803_v33 = vpop.f32.mrb[95].mxu1  ;;  %v2741_v10 = vpop.f32.mrb[96].mxu0 }
 0x1ba   : > { %v2804_v59 = vadd.f32 %v2803_v33, %v2802_v43  ;;  %v3862_v63 = vadd.f32 %v2801_v12, %v3766_v22  ;;  %v2742_v53 = vpop.f32.mrb[97].mxu0 }
 0x1bb   : > { %v2743_v50 = vadd.f32 %v2742_v53, %v2741_v10  ;;  %v2744_v9 = vpop.f32.mrb[98].mxu0 }
 0x1bc   : > { %v3868_v26 = vadd.f32 %v2804_v59, %v3772_v32  ;;  %v2745_v56 = vpop.f32.mrb[99].mxu0 }
 0x1bd   : > { %v3871_v62 = vadd.f32 %v2743_v50, %v3775_v60  ;;  %v2746_v22 = vadd.f32 %v2745_v56, %v2744_v9 }
 0x1be   : > { %v2805_v14 = vpop.f32.mrb[96].mxu1 }
 0x1bf   : > { %v2806_v42 = vpop.f32.mrb[97].mxu1  ;;  %v3877_v32 = vadd.f32 %v2746_v22, %v3781_v23 }
 0x1c0   : > { %v2807_v47 = vadd.f32 %v2806_v42, %v2805_v14  ;;  %v2808_v57 = vpop.f32.mrb[98].mxu1 }
 0x1c1   : > { %v2809_v54 = vpop.f32.mrb[99].mxu1  ;;  %v2747_v3 = vpop.f32.mrb[100].mxu0 }
 0x1c2   : > { %v2810_v39 = vadd.f32 %v2809_v54, %v2808_v57  ;;  %v3874_v36 = vadd.f32 %v2807_v47, %v3778_v17  ;;  %v2748_v45 = vpop.f32.mrb[101].mxu0 }
 0x1c3   : > { %v2749_v44 = vadd.f32 %v2748_v45, %v2747_v3  ;;  %v2750_v30 = vpop.f32.mrb[102].mxu0 }
 0x1c4   : > { %v3880_v20 = vadd.f32 %v2810_v39, %v3784_v35  ;;  %v2751_v18 = vpop.f32.mrb[103].mxu0 }
 0x1c5   : > { %v3883_v12 = vadd.f32 %v2749_v44, %v3787_v16  ;;  %v2752_v17 = vadd.f32 %v2751_v18, %v2750_v30 }
 0x1c6   : > { %v2811_v1 = vpop.f32.mrb[100].mxu1 }
 0x1c7   : > { %v2812_v41 = vpop.f32.mrb[101].mxu1  ;;  %v3889_v35 = vadd.f32 %v2752_v17, %v3793_v25 }
 0x1c8   : > { %v2813_v37 = vadd.f32 %v2812_v41, %v2811_v1  ;;  %v2814_v60 = vpop.f32.mrb[102].mxu1 }
 0x1c9   : > { %v2815_v2 = vpop.f32.mrb[103].mxu1  ;;  %v2753_v13 = vpop.f32.mrb[104].mxu0 }
 0x1ca   : > { %v2816_v0 = vadd.f32 %v2815_v2, %v2814_v60  ;;  %v3886_v23 = vadd.f32 %v2813_v37, %v3790_v52  ;;  %v2754_v28 = vpop.f32.mrb[105].mxu0 }
 0x1cb   : > { %v2755_v10 = vadd.f32 %v2754_v28, %v2753_v13  ;;  %v2756_v53 = vpop.f32.mrb[106].mxu0 }
 0x1cc   : > { %v3892_v43 = vadd.f32 %v2816_v0, %v3796_v58  ;;  %v2757_v42 = vpop.f32.mrb[107].mxu0 }
 0x1cd   : > { %v3895_v47 = vadd.f32 %v2755_v10, %v3799_v40  ;;  %v2758_v52 = vadd.f32 %v2757_v42, %v2756_v53 }
 0x1ce   : > { %v2817_v33 = vpop.f32.mrb[104].mxu1 }
 0x1cf   : > { %v2818_v59 = vpop.f32.mrb[105].mxu1  ;;  %v3901_v58 = vadd.f32 %v2758_v52, %v3805_v51 }
 0x1d0   : > { %v2819_v14 = vadd.f32 %v2818_v59, %v2817_v33  ;;  %v2820_v16 = vpop.f32.mrb[106].mxu1 }
 0x1d1   : > { %v2821_v50 = vpop.f32.mrb[107].mxu1  ;;  %v2759_v56 = vpop.f32.mrb[108].mxu0 }
 0x1d2   : > { %v2822_v9 = vadd.f32 %v2821_v50, %v2820_v16  ;;  %v3898_v25 = vadd.f32 %v2819_v14, %v3802_v6  ;;  %v2760_v22 = vpop.f32.mrb[109].mxu0 }
 0x1d3   : > { %v2761_v3 = vadd.f32 %v2760_v22, %v2759_v56  ;;  %v2762_v40 = vpop.f32.mrb[110].mxu0 }
 0x1d4   : > { %v3904_v57 = vadd.f32 %v2822_v9, %v3808_v34  ;;  %v2763_v41 = vpop.f32.mrb[111].mxu0 }
 0x1d5   : > { %v3907_v6 = vadd.f32 %v2761_v3, %v3811_v29  ;;  %v2764_v37 = vadd.f32 %v2763_v41, %v2762_v40 }
 0x1d6   : > { %v2823_v54 = vpop.f32.mrb[108].mxu1 }
 0x1d7   : > { %v2824_v39 = vpop.f32.mrb[109].mxu1  ;;  %v3913_v34 = vadd.f32 %v2764_v37, %v3817_v11 }
 0x1d8   : > { %v2825_v1 = vadd.f32 %v2824_v39, %v2823_v54  ;;  %v2826_v45 = vpop.f32.mrb[110].mxu1 }
 0x1d9   : > { %v2827_v44 = vpop.f32.mrb[111].mxu1  ;;  %v2919_v29 = vpop.f32.mrb[112].mxu0 }
 0x1da   : > { %v2828_v51 = vadd.f32 %v2827_v44, %v2826_v45  ;;  %v3910_v30 = vadd.f32 %v2825_v1, %v3814_v48  ;;  %v1998_v48 = vadd.f32 %v2919_v29, %v3838_v21  ;;  %v1989_v11 = vpop.f32.mrb[113].mxu0 }
 0x1db   : > { %v2920_v13 = vpop.f32.mrb[114].mxu0 }
 0x1dc   : > { %v3916_v60 = vadd.f32 %v2828_v51, %v3820_v61  ;;  %v1990_v61 = vadd.f32 %v1989_v11, %v3826_v8  ;;  %2118 = vst [vmem:[%s3923_s23 + $0x10] sm:$0xff] %v1998_v48  ;;  %v2001_v33 = vadd.f32 %v2920_v13, %v3844_v4  ;;  %v1992_v59 = vpop.f32.mrb[115].mxu0  ;;  %v2187_v50 = vmul.f32 %v1998_v48, %v1998_v48 }
 0x1dd   : > { %v1993_v14 = vadd.f32 %v1992_v59, %v3832_v49 }
 0x1de   : > { %v2829_v18 = vpop.f32.mrb[112].mxu1  ;;  %2116 = vst [vmem:[%s3923_s23] sm:$0xff] %v1990_v61  ;;  %2119 = vst [vmem:[%s3923_s23 + $0x18] sm:$0xff] %v2001_v33  ;;  %v2185_v21 = vmul.f32 %v1990_v61, %v1990_v61  ;;  %v2188_v54 = vmul.f32 %v2001_v33, %v2001_v33 }
 0x1df   : > { %v2830_v2 = vpop.f32.mrb[113].mxu1  ;;  %2117 = vst [vmem:[%s3923_s23 + $0x8] sm:$0xff] %v1993_v14  ;;  %v2148_v16 = vadd.f32 %v1993_v14, %v1990_v61  ;;  %v2186_v42 = vmul.f32 %v1993_v14, %v1993_v14 }
 0x1e0   : > { %v2831_v17 = vadd.f32 %v2830_v2, %v2829_v18  ;;  %v2832_v0 = vpop.f32.mrb[114].mxu1 }
 0x1e1   : > { %v2833_v28 = vpop.f32.mrb[115].mxu1  ;;  %v2149_v4 = vadd.f32 %v2148_v16, %v1998_v48  ;;  %v2217_v52 = vadd.f32 %v2186_v42, %v2185_v21  ;;  %v2923_v56 = vpop.f32.mrb[116].mxu0 }
 0x1e2   : > { %v2834_v10 = vadd.f32 %v2833_v28, %v2832_v0  ;;  %v3932_v53 = vadd.f32 %v2831_v17, %v3823_v27  ;;  %v2014_v49 = vadd.f32 %v2923_v56, %v3862_v63  ;;  %v2005_v22 = vpop.f32.mrb[117].mxu0 }
 0x1e3   : > { %v2218_v39 = vadd.f32 %v2217_v52, %v2187_v50  ;;  %v2006_v1 = vadd.f32 %v2005_v22, %v3850_v55  ;;  %v2150_v40 = vadd.f32 %v2149_v4, %v2001_v33  ;;  %v2924_v45 = vpop.f32.mrb[118].mxu0 }
 0x1e4   : > { %v3937_v8 = vadd.f32 %v2834_v10, %v3829_v15  ;;  %2122 = vst [vmem:[%s3923_s23 + $0x30] sm:$0xff] %v2014_v49  ;;  %v2017_v41 = vadd.f32 %v2924_v45, %v3868_v26  ;;  %v2008_v37 = vpop.f32.mrb[119].mxu0  ;;  %v2191_v13 = vmul.f32 %v2014_v49, %v2014_v49 }
 0x1e5   : > { %2120 = vst [vmem:[%s3923_s23 + $0x20] sm:$0xff] %v2006_v1  ;;  %v2151_v51 = vadd.f32 %v2150_v40, %v2006_v1  ;;  %v2189_v18 = vmul.f32 %v2006_v1, %v2006_v1  ;;  %v2219_v63 = vadd.f32 %v2218_v39, %v2188_v54  ;;  %v2009_v48 = vadd.f32 %v2008_v37, %v3856_v19 }
 0x1e6   : > { %v2835_v9 = vpop.f32.mrb[116].mxu1  ;;  %2123 = vst [vmem:[%s3923_s23 + $0x38] sm:$0xff] %v2017_v41  ;;  %v2192_v16 = vmul.f32 %v2017_v41, %v2017_v41 }
 0x1e7   : > { %v2836_v27 = vpop.f32.mrb[117].mxu1  ;;  %v2220_v55 = vadd.f32 %v2219_v63, %v2189_v18  ;;  %2121 = vst [vmem:[%s3923_s23 + $0x28] sm:$0xff] %v2009_v48  ;;  %v2152_v17 = vadd.f32 %v2151_v51, %v2009_v48  ;;  %v2190_v26 = vmul.f32 %v2009_v48, %v2009_v48 }
 0x1e8   : > { %v2837_v3 = vadd.f32 %v2836_v27, %v2835_v9  ;;  %v2838_v15 = vpop.f32.mrb[118].mxu1 }
 0x1e9   : > { %v2839_v44 = vpop.f32.mrb[119].mxu1  ;;  %v2927_v0 = vpop.f32.mrb[120].mxu0  ;;  %v2153_v33 = vadd.f32 %v2152_v17, %v2014_v49  ;;  %v2221_v28 = vadd.f32 %v2220_v55, %v2190_v26 }
 0x1ea   : > { %v2840_v29 = vadd.f32 %v2839_v44, %v2838_v15  ;;  %v3947_v2 = vadd.f32 %v2837_v3, %v3835_v46  ;;  %v2030_v59 = vadd.f32 %v2927_v0, %v3886_v23  ;;  %v2021_v10 = vpop.f32.mrb[121].mxu0 }
 0x1eb   : > { %v2022_v14 = vadd.f32 %v2021_v10, %v3874_v36  ;;  %v2222_v42 = vadd.f32 %v2221_v28, %v2191_v13  ;;  %v2154_v50 = vadd.f32 %v2153_v33, %v2017_v41 }
 0x1ec   : > { %v3950_v11 = vadd.f32 %v2840_v29, %v3841_v24  ;;  %v2928_v24 = vpop.f32.mrb[122].mxu0  ;;  %2126 = vst [vmem:[%s3923_s23 + $0x50] sm:$0xff] %v2030_v59  ;;  %v2195_v15 = vmul.f32 %v2030_v59, %v2030_v59 }
 0x1ed   : > { %v2033_v4 = vadd.f32 %v2928_v24, %v3892_v43  ;;  %v2024_v9 = vpop.f32.mrb[123].mxu0  ;;  %2124 = vst [vmem:[%s3923_s23 + $0x40] sm:$0xff] %v2022_v14  ;;  %v2193_v56 = vmul.f32 %v2022_v14, %v2022_v14  ;;  %v2155_v36 = vadd.f32 %v2154_v50, %v2022_v14  ;;  %v2223_v27 = vadd.f32 %v2222_v42, %v2192_v16 }
 0x1ee   : > { %v2841_v61 = vpop.f32.mrb[120].mxu1  ;;  %v2025_v54 = vadd.f32 %v2024_v9, %v3880_v20 }
 0x1ef   : > { %v2842_v19 = vpop.f32.mrb[121].mxu1  ;;  %2127 = vst [vmem:[%s3923_s23 + $0x58] sm:$0xff] %v2033_v4  ;;  %v2224_v3 = vadd.f32 %v2223_v27, %v2193_v56  ;;  %v2196_v63 = vmul.f32 %v2033_v4, %v2033_v4 }
 0x1f0   : > { %v2843_v46 = vadd.f32 %v2842_v19, %v2841_v61  ;;  %v2844_v21 = vpop.f32.mrb[122].mxu1  ;;  %2125 = vst [vmem:[%s3923_s23 + $0x48] sm:$0xff] %v2025_v54  ;;  %v2194_v22 = vmul.f32 %v2025_v54, %v2025_v54  ;;  %v2156_v43 = vadd.f32 %v2155_v36, %v2025_v54 }
 0x1f1   : > { %v2845_v52 = vpop.f32.mrb[123].mxu1  ;;  %v2931_v40 = vpop.f32.mrb[124].mxu0 }
 0x1f2   : > { %v2846_v23 = vadd.f32 %v2845_v52, %v2844_v21  ;;  %v3960_v49 = vadd.f32 %v2843_v46, %v3847_v7  ;;  %v2157_v45 = vadd.f32 %v2156_v43, %v2030_v59  ;;  %v2225_v20 = vadd.f32 %v2224_v3, %v2194_v22  ;;  %v2037_v44 = vpop.f32.mrb[125].mxu0 }
 0x1f3   : > { %v2046_v7 = vadd.f32 %v2931_v40, %v3910_v30  ;;  %v2038_v51 = vadd.f32 %v2037_v44, %v3898_v25 }
 0x1f4   : > { %v3965_v39 = vadd.f32 %v2846_v23, %v3853_v5  ;;  %v2932_v5 = vpop.f32.mrb[126].mxu0  ;;  %v2226_v29 = vadd.f32 %v2225_v20, %v2195_v15  ;;  %v2158_v48 = vadd.f32 %v2157_v45, %v2033_v4 }
 0x1f5   : > { %2130 = vst [vmem:[%s3923_s23 + $0x70] sm:$0xff] %v2046_v7  ;;  %v2049_v55 = vadd.f32 %v2932_v5, %v3916_v60  ;;  %v2040_v26 = vpop.f32.mrb[127].mxu0  ;;  %2128 = vst [vmem:[%s3923_s23 + $0x60] sm:$0xff] %v2038_v51  ;;  %v2197_v61 = vmul.f32 %v2038_v51, %v2038_v51  ;;  %v2199_v14 = vmul.f32 %v2046_v7, %v2046_v7 }
 0x1f6   : > { %v2847_v1 = vpop.f32.mrb[124].mxu1  ;;  %v2041_v0 = vadd.f32 %v2040_v26, %v3904_v57  ;;  %v2159_v25 = vadd.f32 %v2158_v48, %v2038_v51  ;;  %v2227_v33 = vadd.f32 %v2226_v29, %v2196_v63 }
 0x1f7   : > { %v2848_v41 = vpop.f32.mrb[125].mxu1  ;;  %2131 = vst [vmem:[%s3923_s23 + $0x78] sm:$0xff] %v2049_v55 }
 0x1f8   : > { %v2849_v37 = vadd.f32 %v2848_v41, %v2847_v1  ;;  %v2850_v18 = vpop.f32.mrb[126].mxu1  ;;  %2129 = vst [vmem:[%s3923_s23 + $0x68] sm:$0xff] %v2041_v0  ;;  %v2198_v28 = vmul.f32 %v2041_v0, %v2041_v0  ;;  %v2228_v19 = vadd.f32 %v2227_v33, %v2197_v61  ;;  %v2160_v10 = vadd.f32 %v2159_v25, %v2041_v0 }
 0x1f9   : > { %v2851_v17 = vpop.f32.mrb[127].mxu1  ;;  %v2935_v46 = vpop.f32.mrb[128].mxu0 }
 0x1fa   : > { %v2852_v30 = vadd.f32 %v2851_v17, %v2850_v18  ;;  %v1917_v13 = vadd.f32 %v2849_v37, %v3859_v31  ;;  %v2161_v21 = vadd.f32 %v2160_v10, %v2046_v7  ;;  %v2229_v24 = vadd.f32 %v2228_v19, %v2198_v28  ;;  %v2053_v31 = vpop.f32.mrb[129].mxu0 }
 0x1fb   : > { %v2062_v57 = vadd.f32 %v2935_v46, %v3947_v2  ;;  %v2054_v50 = vadd.f32 %v2053_v31, %v3932_v53  ;;  %v2936_v52 = vpop.f32.mrb[130].mxu0 }
 0x1fc   : > { %v1920_v59 = vadd.f32 %v2852_v30, %v3865_v38  ;;  %v2200_v38 = vmul.f32 %v2049_v55, %v2049_v55  ;;  %v2230_v9 = vadd.f32 %v2229_v24, %v2199_v14  ;;  %v2162_v56 = vadd.f32 %v2161_v21, %v2049_v55  ;;  %v2056_v36 = vpop.f32.mrb[131].mxu0 }
 0x1fd   : > { %2134 = vst [vmem:[%s3923_s23 + $0x90] sm:$0xff] %v2062_v57  ;;  %v2065_v23 = vadd.f32 %v2936_v52, %v3950_v11  ;;  %2132 = vst [vmem:[%s3923_s23 + $0x80] sm:$0xff] %v2054_v50  ;;  %v2201_v27 = vmul.f32 %v2054_v50, %v2054_v50  ;;  %v2057_v22 = vadd.f32 %v2056_v36, %v3937_v8 }
 0x1fe   : > { %v2853_v60 = vpop.f32.mrb[128].mxu1  ;;  %v2163_v53 = vadd.f32 %v2162_v56, %v2054_v50  ;;  %v2231_v43 = vadd.f32 %v2230_v9, %v2200_v38  ;;  %v2203_v7 = vmul.f32 %v2062_v57, %v2062_v57 }
 0x1ff   : > { %v2854_v16 = vpop.f32.mrb[129].mxu1  ;;  %2135 = vst [vmem:[%s3923_s23 + $0x98] sm:$0xff] %v2065_v23  ;;  %2133 = vst [vmem:[%s3923_s23 + $0x88] sm:$0xff] %v2057_v22  ;;  %v2202_v1 = vmul.f32 %v2057_v22, %v2057_v22 }
 0x200   : > { %v2855_v42 = vadd.f32 %v2854_v16, %v2853_v60  ;;  %v2856_v4 = vpop.f32.mrb[130].mxu1  ;;  %v2232_v15 = vadd.f32 %v2231_v43, %v2201_v27  ;;  %v2164_v45 = vadd.f32 %v2163_v53, %v2057_v22 }
 0x201   : > { %v2857_v54 = vpop.f32.mrb[131].mxu1  ;;  %v2939_v20 = vpop.f32.mrb[132].mxu0 }
 0x202   : > { %v2858_v2 = vadd.f32 %v2857_v54, %v2856_v4  ;;  %v1925_v3 = vadd.f32 %v2855_v42, %v3871_v62  ;;  %v2165_v41 = vadd.f32 %v2164_v45, %v2062_v57  ;;  %v2233_v44 = vadd.f32 %v2232_v15, %v2202_v1  ;;  %v2069_v51 = vpop.f32.mrb[133].mxu0 }
 0x203   : > { %v2078_v37 = vadd.f32 %v2939_v20, %v1917_v13  ;;  %v2070_v18 = vadd.f32 %v2069_v51, %v3960_v49  ;;  %v2940_v63 = vpop.f32.mrb[134].mxu0 }
 0x204   : > { %v1928_v40 = vadd.f32 %v2858_v2, %v3877_v32  ;;  %v2204_v32 = vmul.f32 %v2065_v23, %v2065_v23  ;;  %v2234_v29 = vadd.f32 %v2233_v44, %v2203_v7  ;;  %v2166_v48 = vadd.f32 %v2165_v41, %v2065_v23  ;;  %v2072_v26 = vpop.f32.mrb[135].mxu0 }
 0x205   : > { %2138 = vst [vmem:[%s3923_s23 + $0xb0] sm:$0xff] %v2078_v37  ;;  %v2081_v55 = vadd.f32 %v2940_v63, %v1920_v59  ;;  %2136 = vst [vmem:[%s3923_s23 + $0xa0] sm:$0xff] %v2070_v18  ;;  %v2205_v61 = vmul.f32 %v2070_v18, %v2070_v18  ;;  %v2073_v0 = vadd.f32 %v2072_v26, %v3965_v39 }
 0x206   : > { %v2859_v11 = vpop.f32.mrb[132].mxu1  ;;  %v2167_v25 = vadd.f32 %v2166_v48, %v2070_v18  ;;  %v2235_v49 = vadd.f32 %v2234_v29, %v2204_v32  ;;  %v2207_v46 = vmul.f32 %v2078_v37, %v2078_v37 }
 0x207   : > { %v2860_v8 = vpop.f32.mrb[133].mxu1  ;;  %2139 = vst [vmem:[%s3923_s23 + $0xb8] sm:$0xff] %v2081_v55  ;;  %2137 = vst [vmem:[%s3923_s23 + $0xa8] sm:$0xff] %v2073_v0  ;;  %v2206_v33 = vmul.f32 %v2073_v0, %v2073_v0  ;;  %v2208_v50 = vmul.f32 %v2081_v55, %v2081_v55 }
 0x208   : > { %v2861_v62 = vadd.f32 %v2860_v8, %v2859_v11  ;;  %v2862_v5 = vpop.f32.mrb[134].mxu1  ;;  %v2236_v19 = vadd.f32 %v2235_v49, %v2205_v61  ;;  %v2168_v10 = vadd.f32 %v2167_v25, %v2073_v0 }
 0x209   : > { %v2863_v17 = vpop.f32.mrb[135].mxu1  ;;  %v2943_v60 = vpop.f32.mrb[136].mxu0 }
 0x20a   : > { %v2864_v30 = vadd.f32 %v2863_v17, %v2862_v5  ;;  %v1933_v13 = vadd.f32 %v2861_v62, %v3883_v12  ;;  %v2169_v14 = vadd.f32 %v2168_v10, %v2078_v37  ;;  %v2237_v21 = vadd.f32 %v2236_v19, %v2206_v33  ;;  %v2085_v57 = vpop.f32.mrb[137].mxu0 }
 0x20b   : > { %v2086_v16 = vadd.f32 %v2085_v57, %v1925_v3  ;;  %v2944_v42 = vpop.f32.mrb[138].mxu0 }
 0x20c   : > { %v1936_v28 = vadd.f32 %v2864_v30, %v3889_v35  ;;  %v2094_v24 = vadd.f32 %v2943_v60, %v1933_v13  ;;  %v2238_v35 = vadd.f32 %v2237_v21, %v2207_v46  ;;  %v2170_v4 = vadd.f32 %v2169_v14, %v2081_v55  ;;  %v2088_v9 = vpop.f32.mrb[139].mxu0 }
 0x20d   : > { %2140 = vst [vmem:[%s3923_s23 + $0xc0] sm:$0xff] %v2086_v16  ;;  %v2209_v56 = vmul.f32 %v2086_v16, %v2086_v16  ;;  %v2089_v54 = vadd.f32 %v2088_v9, %v1928_v40 }
 0x20e   : > { %v2865_v59 = vpop.f32.mrb[136].mxu1  ;;  %2142 = vst [vmem:[%s3923_s23 + $0xd0] sm:$0xff] %v2094_v24  ;;  %v2097_v52 = vadd.f32 %v2944_v42, %v1936_v28  ;;  %v2171_v27 = vadd.f32 %v2170_v4, %v2086_v16  ;;  %v2239_v2 = vadd.f32 %v2238_v35, %v2208_v50  ;;  %v2211_v45 = vmul.f32 %v2094_v24, %v2094_v24 }
 0x20f   : > { %v2866_v39 = vpop.f32.mrb[137].mxu1  ;;  %2141 = vst [vmem:[%s3923_s23 + $0xc8] sm:$0xff] %v2089_v54  ;;  %v2210_v22 = vmul.f32 %v2089_v54, %v2089_v54 }
 0x210   : > { %v2867_v12 = vadd.f32 %v2866_v39, %v2865_v59  ;;  %v2868_v31 = vpop.f32.mrb[138].mxu1  ;;  %2143 = vst [vmem:[%s3923_s23 + $0xd8] sm:$0xff] %v2097_v52  ;;  %v2240_v53 = vadd.f32 %v2239_v2, %v2209_v56  ;;  %v2172_v43 = vadd.f32 %v2171_v27, %v2089_v54  ;;  %v2212_v8 = vmul.f32 %v2097_v52, %v2097_v52 }
 0x211   : > { %v2869_v38 = vpop.f32.mrb[139].mxu1  ;;  %v2947_v15 = vpop.f32.mrb[140].mxu0 }
 0x212   : > { %v2870_v23 = vadd.f32 %v2869_v38, %v2868_v31  ;;  %v1941_v36 = vadd.f32 %v2867_v12, %v3895_v47  ;;  %v2173_v11 = vadd.f32 %v2172_v43, %v2094_v24  ;;  %v2241_v20 = vadd.f32 %v2240_v53, %v2210_v22  ;;  %v2101_v41 = vpop.f32.mrb[141].mxu0 }
 0x213   : > { %v2948_v37 = vpop.f32.mrb[142].mxu0 }
 0x214   : > { %v1944_v3 = vadd.f32 %v2870_v23, %v3901_v58  ;;  %v2102_v44 = vadd.f32 %v2101_v41, %v1941_v36  ;;  %v2242_v51 = vadd.f32 %v2241_v20, %v2211_v45  ;;  %v2174_v62 = vadd.f32 %v2173_v11, %v2097_v52  ;;  %v2104_v18 = vpop.f32.mrb[143].mxu0 }
 0x216   : > { %v2871_v1 = vpop.f32.mrb[140].mxu1  ;;  %2144 = vst [vmem:[%s3923_s23 + $0xe0] sm:$0xff] %v2102_v44  ;;  %v2213_v63 = vmul.f32 %v2102_v44, %v2102_v44  ;;  %v2105_v29 = vadd.f32 %v2104_v18, %v1944_v3  ;;  %v2175_v48 = vadd.f32 %v2174_v62, %v2102_v44  ;;  %v2243_v55 = vadd.f32 %v2242_v51, %v2212_v8 }
 0x217   : > { %v2872_v7 = vpop.f32.mrb[141].mxu1 }
 0x218   : > { %v2873_v40 = vadd.f32 %v2872_v7, %v2871_v1  ;;  %v2874_v47 = vpop.f32.mrb[142].mxu1  ;;  %2145 = vst [vmem:[%s3923_s23 + $0xe8] sm:$0xff] %v2105_v29  ;;  %v2214_v61 = vmul.f32 %v2105_v29, %v2105_v29  ;;  %v2244_v30 = vadd.f32 %v2243_v55, %v2213_v63  ;;  %v2176_v0 = vadd.f32 %v2175_v48, %v2105_v29 }
 0x219   : > { %v2875_v58 = vpop.f32.mrb[143].mxu1 }
 0x21a   : > { %v1949_v5 = vadd.f32 %v2873_v40, %v3907_v6  ;;  %v2876_v32 = vadd.f32 %v2875_v58, %v2874_v47  ;;  %v2245_v6 = vadd.f32 %v2244_v30, %v2214_v61 }
 0x21c   : > { %v2110_v17 = vadd.f32 %v2947_v15, %v1949_v5  ;;  %v1952_v26 = vadd.f32 %v2876_v32, %v3913_v34 }
 0x21e   : > { %2146 = vst [vmem:[%s3923_s23 + $0xf0] sm:$0xff] %v2110_v17  ;;  %v2215_v13 = vmul.f32 %v2110_v17, %v2110_v17  ;;  %v2113_v25 = vadd.f32 %v2948_v37, %v1952_v26  ;;  %v2177_v49 = vadd.f32 %v2176_v0, %v2110_v17 }
 0x220   : > { %2147 = vst [vmem:[%s3923_s23 + $0xf8] sm:$0xff] %v2113_v25  ;;  %v2216_v33 = vmul.f32 %v2113_v25, %v2113_v25  ;;  %v2178_v28 = vadd.f32 %v2177_v49, %v2113_v25  ;;  %v2246_v19 = vadd.f32 %v2245_v6, %v2215_v13 }
 0x222   : > { %v2179_v10 = vrot.slane %v2178_v28, 4  ;;  %v2247_v59 = vadd.f32 %v2246_v19, %v2216_v33 }
 0x224   : > { %v2180_v60 = vadd.f32 %v2179_v10, %v2178_v28  ;;  %v2248_v46 = vrot.slane %v2247_v59, 4 }
 0x226   : > { %v2181_v14 = vrot.slane %v2180_v60, 2  ;;  %v2249_v34 = vadd.f32 %v2248_v46, %v2247_v59 }
 0x228   : > { %v2182_v21 = vadd.f32 %v2181_v14, %v2180_v60  ;;  %v2250_v24 = vrot.slane %v2249_v34, 2 }
 0x22a   : > { %v2183_v39 = vrot.slane %v2182_v21, 1  ;;  %v2251_v57 = vadd.f32 %v2250_v24, %v2249_v34 }
 0x22c   : > { %v2252_v12 = vrot.slane %v2251_v57, 1  ;;  %v2184_v16 = vadd.f32 %v2183_v39, %v2182_v21 }
 0x22e   : > { %v2253_v31 = vadd.f32 %v2252_v12, %v2251_v57 }
 0x230   : > { %v2255_v42 = vsel %vm2254_vm0, %v2184_v16, %v2253_v31 }
 0x231   : > { %2256 = vst [vmem:[%s181_s26] sm:$0x3] %v2255_v42 }
 0x232 PF: > { %s14_s12 = sadd.s32 1, %s3053_s12  }
 0x233   : > { %p11_p4 = scmp.ge.s32.totalorder %s14_s12, 4  }
 0x235   :  { %13 = sbr.rel (!%p11_p4) target bundleno = 1 (0x1), region = 72 }

</bundles_post_ra>
